<compile_context>
chip_gen: v5e
topology: v5e:2x2
jax: 0.10.0
libtpu: 0.0.40
codegen_flags: <defaults>
</compile_context>

<pallas_src>
import functools

import jax
import jax.numpy as jnp
from jax import lax
from jax.experimental import pallas as pl
from jax.experimental.pallas import tpu as pltpu


def _conv3x3_kernel(x_ref, w_ref, b_ref, o_ref, *, apply_sigmoid):
    """3x3 / stride-1 / 'same' conv on one image (input pre-padded by 1), NHWC.

    x_ref: (H+2, W+2, Cin)   zero-padded image, channels on the lane dim
    w_ref: (3, 3, Cin, Cout) HWIO weights (constant index -> stays resident)
    b_ref: (1, Cout)
    o_ref: (H, W, Cout)
    """
    H, W, Cout = o_ref.shape
    bias = b_ref[...]                                   # hoisted out of the loop

    def row_body(h, carry):
        acc = jnp.zeros((W, Cout), jnp.float32)
        # 3x3 conv as 9 shifted (W, Cin) @ (Cin, Cout) MXU matmuls per out-row,
        # f32 accumulation.
        for dy in range(3):                             # static unroll (9 taps)
            for dx in range(3):
                lhs = x_ref[h + dy, pl.ds(dx, W), :]    # (W, Cin)
                acc = acc + jnp.dot(lhs, w_ref[dy, dx],
                                    preferred_element_type=jnp.float32)
        acc = acc + bias                                # f32 bias add
        if apply_sigmoid:
            acc = 1.0 / (1.0 + jnp.exp(-acc))           # fused sigmoid
        o_ref[h, :, :] = acc.astype(o_ref.dtype)
        return carry

    lax.fori_loop(0, H, row_body, 0)


def _conv3x3_same(x_nhwc, w_hwio, bias, *, apply_sigmoid=False):
    """Pallas 3x3 conv (stride 1, padding 1) over an NHWC tensor."""
    B, H, W, Cin = x_nhwc.shape
    Cout = w_hwio.shape[-1]
    x_pad = jnp.pad(x_nhwc, ((0, 0), (1, 1), (1, 1), (0, 0)))

    kernel = functools.partial(_conv3x3_kernel, apply_sigmoid=apply_sigmoid)
    return pl.pallas_call(
        kernel,
        out_shape=jax.ShapeDtypeStruct((B, H, W, Cout), x_nhwc.dtype),
        grid=(B,),
        in_specs=[
            # One padded image per grid step (batch dim squeezed); spatial and
            # channel dims are full-extent blocks -> double-buffered streaming,
            # no ragged tiles.
            pl.BlockSpec((None, H + 2, W + 2, Cin), lambda b: (b, 0, 0, 0)),
            # Weights / bias: constant block index -> resident across the grid.
            pl.BlockSpec((3, 3, Cin, Cout), lambda b: (0, 0, 0, 0)),
            pl.BlockSpec((1, Cout), lambda b: (0, 0)),
        ],
        out_specs=pl.BlockSpec((None, H, W, Cout), lambda b: (b, 0, 0, 0)),
        compiler_params=pltpu.CompilerParams(
            dimension_semantics=("parallel",)),   # megacore split on v7x
    )(x_pad, w_hwio, bias.reshape(1, Cout))


def _upsample2_nearest_nhwc(x):
    # nn.Upsample(scale_factor=2) default mode='nearest' (pure data movement,
    # done as a JAX repeat feeding the Pallas conv kernels).
    return jnp.repeat(jnp.repeat(x, 2, axis=1), 2, axis=2)


_LANE = 128  # lane-dense output width for the num_classes conv


def conv_head_forward(x_nchw, params):
    """conv_head forward on the backbone's patch-feature map.

    x_nchw: (B, E, Hp, Wp) f32 -> (B, num_classes, 4*Hp, 4*Wp) f32 (sigmoid).
    """
    w1, b1 = params["w1"], params["b1"]       # (64, E, 3, 3), (64,)
    w2, b2 = params["w2"], params["b2"]       # (C, 64, 3, 3), (C,)
    num_classes = w2.shape[0]

    x = jnp.transpose(x_nchw, (0, 2, 3, 1))                  # NCHW -> NHWC

    # Upsample(x2) + Conv2d(E, 64), no activation.
    x = _upsample2_nearest_nhwc(x)
    w1_hwio = jnp.transpose(w1, (2, 3, 1, 0))                # (3, 3, E, 64)
    y = _conv3x3_same(x, w1_hwio, b1, apply_sigmoid=False)

    # Upsample(x2) + Conv2d(64, C) + sigmoid.  The C=5 output is padded to a
    # lane-dense 128 channels inside the kernel (unmasked stores) and sliced
    # back outside the pallas_call.
    y = _upsample2_nearest_nhwc(y)
    w2_hwio = jnp.transpose(w2, (2, 3, 1, 0))                # (3, 3, 64, C)
    w2_pad = jnp.zeros((3, 3, w2_hwio.shape[2], _LANE), w2_hwio.dtype)
    w2_pad = w2_pad.at[..., :num_classes].set(w2_hwio)
    b2_pad = jnp.zeros((_LANE,), b2.dtype).at[:num_classes].set(b2)
    z = _conv3x3_same(y, w2_pad, b2_pad, apply_sigmoid=True)
    z = z[..., :num_classes]

    return jnp.transpose(z, (0, 3, 1, 2))                    # NHWC -> NCHW


def conv_head_reference(x_nchw, params):
    """Pure-JAX reference (same math as the torch module's head)."""
    def up2(t):
        return jnp.repeat(jnp.repeat(t, 2, axis=2), 2, axis=3)

    def conv(t, w, b):
        out = lax.conv_general_dilated(
            t, w, window_strides=(1, 1), padding=((1, 1), (1, 1)),
            dimension_numbers=("NCHW", "OIHW", "NCHW"),
            precision=lax.Precision.HIGHEST)
        return out + b.reshape(1, -1, 1, 1)

    t = conv(up2(x_nchw), params["w1"], params["b1"])
    t = conv(up2(t), params["w2"], params["b2"])
    return jax.nn.sigmoid(t)


if __name__ == "__main__":
    # Small shapes consistent with Segmentor('dinov2_s', num_classes=5):
    # embedding_size=384, patch_size=14 -> a 224x224 image gives a 16x16 patch
    # grid; batch=2.
    B, E, Hp, Wp, C = 2, 384, 16, 16, 5

    key = jax.random.PRNGKey(0)
    kx, kw1, kb1, kw2, kb2 = jax.random.split(key, 5)

    # TODO(synk): the DINOv2 ViT backbone (pretrained torch.hub model) is not
    # translated; `x` stands in for its x_norm_patchtokens output reshaped to
    # (B, embedding_size, H/14, W/14), which is what feeds the head.
    x = jax.random.normal(kx, (B, E, Hp, Wp), jnp.float32)

    # nn.Conv2d default init: U(+-1/sqrt(fan_in)), fan_in = Cin * 3 * 3.
    bnd1 = 1.0 / (E * 9) ** 0.5
    w1 = jax.random.uniform(kw1, (64, E, 3, 3), jnp.float32, -bnd1, bnd1)
    b1 = jax.random.uniform(kb1, (64,), jnp.float32, -bnd1, bnd1)
    bnd2 = 1.0 / (64 * 9) ** 0.5
    w2 = jax.random.uniform(kw2, (C, 64, 3, 3), jnp.float32, -bnd2, bnd2)
    b2 = jax.random.uniform(kb2, (C,), jnp.float32, -bnd2, bnd2)
    params = {"w1": w1, "b1": b1, "w2": w2, "b2": b2}

    out = jax.block_until_ready(jax.jit(conv_head_forward)(x, params))
    ref = conv_head_reference(x, params)

    assert out.shape == (B, C, 4 * Hp, 4 * Wp), out.shape
    # Tolerance covers MXU f32 matmul-pass differences vs. the XLA reference.
    assert jnp.allclose(out, ref, atol=2e-3, rtol=2e-3), float(
        jnp.max(jnp.abs(out - ref)))

    print("KERNEL_OK")
</pallas_src>

<mosaic_0001>
module attributes {stable_mosaic.version = 11 : i64} {
  func.func @_conv3x3_kernel(%arg0: i32, %arg1: memref<1x34x34x384xf32, #tpu.memory_space<vmem>>, %arg2: memref<3x3x384x64xf32, #tpu.memory_space<vmem>>, %arg3: memref<1x64xf32, #tpu.memory_space<vmem>>, %arg4: memref<1x32x32x64xf32, #tpu.memory_space<vmem>>) attributes {dimension_semantics = [#tpu.dimension_semantics<parallel>], iteration_bounds = array<i64: 2>, scalar_prefetch = 0 : i64, scratch_operands = 0 : i64, tpu.core_type = #tpu.core_type<tc>, window_params = [{transform_indices = @transform_0, window_bounds = array<i64: 1, 34, 34, 384>}, {pipeline_mode = #tpu.pipeline_mode<synchronous>, transform_indices = @transform_1, window_bounds = array<i64: 3, 3, 384, 64>}, {pipeline_mode = #tpu.pipeline_mode<synchronous>, transform_indices = @transform_2, window_bounds = array<i64: 1, 64>}, {transform_indices = @transform_3, window_bounds = array<i64: 1, 32, 32, 64>}]} {
    %c0 = arith.constant 0 : index
    %c0_0 = arith.constant 0 : index
    %0 = vector.load %arg3[%c0, %c0_0] : memref<1x64xf32, #tpu.memory_space<vmem>>, vector<1x64xf32>
    %c0_i32 = arith.constant 0 : i32
    %c32_i32 = arith.constant 32 : i32
    %1 = arith.addi %c0_i32, %c32_i32 : i32
    %c1_i32 = arith.constant 1 : i32
    scf.for %arg5 = %c0_i32 to %1 step %c1_i32  : i32 {
      %cst = arith.constant 0.000000e+00 : f32
      %2 = vector.broadcast %cst : f32 to vector<32x64xf32>
      %c0_i32_2 = arith.constant 0 : i32
      %3 = arith.addi %arg5, %c0_i32_2 : i32
      %c0_3 = arith.constant 0 : index
      %4 = arith.index_cast %3 : i32 to index
      %c0_4 = arith.constant 0 : index
      %c0_5 = arith.constant 0 : index
      %5 = vector.load %arg1[%c0_3, %4, %c0_4, %c0_5] : memref<1x34x34x384xf32, #tpu.memory_space<vmem>>, vector<1x1x32x384xf32>
      %6 = vector.shape_cast %5 : vector<1x1x32x384xf32> to vector<32x384xf32>
      %c0_6 = arith.constant 0 : index
      %c0_7 = arith.constant 0 : index
      %c0_8 = arith.constant 0 : index
      %c0_9 = arith.constant 0 : index
      %7 = vector.load %arg2[%c0_6, %c0_7, %c0_8, %c0_9] : memref<3x3x384x64xf32, #tpu.memory_space<vmem>>, vector<1x1x384x64xf32>
      %8 = vector.shape_cast %7 : vector<1x1x384x64xf32> to vector<384x64xf32>
      %cst_10 = arith.constant dense<0.000000e+00> : vector<32x64xf32>
      %9 = tpu.matmul %6, %8, %cst_10 {dimension_numbers = #tpu.dot_dimension_numbers<[1], [0], [0], [1], [0, 0, 1, 1], [], []>} : vector<32x384xf32>, vector<384x64xf32>, vector<32x64xf32> -> vector<32x64xf32>
      %10 = arith.addf %2, %9 : vector<32x64xf32>
      %c0_i32_11 = arith.constant 0 : i32
      %11 = arith.addi %arg5, %c0_i32_11 : i32
      %c0_12 = arith.constant 0 : index
      %12 = arith.index_cast %11 : i32 to index
      %c1 = arith.constant 1 : index
      %c0_13 = arith.constant 0 : index
      %13 = vector.load %arg1[%c0_12, %12, %c1, %c0_13] : memref<1x34x34x384xf32, #tpu.memory_space<vmem>>, vector<1x1x32x384xf32>
      %14 = vector.shape_cast %13 : vector<1x1x32x384xf32> to vector<32x384xf32>
      %c0_14 = arith.constant 0 : index
      %c1_15 = arith.constant 1 : index
      %c0_16 = arith.constant 0 : index
      %c0_17 = arith.constant 0 : index
      %15 = vector.load %arg2[%c0_14, %c1_15, %c0_16, %c0_17] : memref<3x3x384x64xf32, #tpu.memory_space<vmem>>, vector<1x1x384x64xf32>
      %16 = vector.shape_cast %15 : vector<1x1x384x64xf32> to vector<384x64xf32>
      %cst_18 = arith.constant dense<0.000000e+00> : vector<32x64xf32>
      %17 = tpu.matmul %14, %16, %cst_18 {dimension_numbers = #tpu.dot_dimension_numbers<[1], [0], [0], [1], [0, 0, 1, 1], [], []>} : vector<32x384xf32>, vector<384x64xf32>, vector<32x64xf32> -> vector<32x64xf32>
      %18 = arith.addf %10, %17 : vector<32x64xf32>
      %c0_i32_19 = arith.constant 0 : i32
      %19 = arith.addi %arg5, %c0_i32_19 : i32
      %c0_20 = arith.constant 0 : index
      %20 = arith.index_cast %19 : i32 to index
      %c2 = arith.constant 2 : index
      %c0_21 = arith.constant 0 : index
      %21 = vector.load %arg1[%c0_20, %20, %c2, %c0_21] : memref<1x34x34x384xf32, #tpu.memory_space<vmem>>, vector<1x1x32x384xf32>
      %22 = vector.shape_cast %21 : vector<1x1x32x384xf32> to vector<32x384xf32>
      %c0_22 = arith.constant 0 : index
      %c2_23 = arith.constant 2 : index
      %c0_24 = arith.constant 0 : index
      %c0_25 = arith.constant 0 : index
      %23 = vector.load %arg2[%c0_22, %c2_23, %c0_24, %c0_25] : memref<3x3x384x64xf32, #tpu.memory_space<vmem>>, vector<1x1x384x64xf32>
      %24 = vector.shape_cast %23 : vector<1x1x384x64xf32> to vector<384x64xf32>
      %cst_26 = arith.constant dense<0.000000e+00> : vector<32x64xf32>
      %25 = tpu.matmul %22, %24, %cst_26 {dimension_numbers = #tpu.dot_dimension_numbers<[1], [0], [0], [1], [0, 0, 1, 1], [], []>} : vector<32x384xf32>, vector<384x64xf32>, vector<32x64xf32> -> vector<32x64xf32>
      %26 = arith.addf %18, %25 : vector<32x64xf32>
      %c1_i32_27 = arith.constant 1 : i32
      %27 = arith.addi %arg5, %c1_i32_27 : i32
      %c0_28 = arith.constant 0 : index
      %28 = arith.index_cast %27 : i32 to index
      %c0_29 = arith.constant 0 : index
      %c0_30 = arith.constant 0 : index
      %29 = vector.load %arg1[%c0_28, %28, %c0_29, %c0_30] : memref<1x34x34x384xf32, #tpu.memory_space<vmem>>, vector<1x1x32x384xf32>
      %30 = vector.shape_cast %29 : vector<1x1x32x384xf32> to vector<32x384xf32>
      %c1_31 = arith.constant 1 : index
      %c0_32 = arith.constant 0 : index
      %c0_33 = arith.constant 0 : index
      %c0_34 = arith.constant 0 : index
      %31 = vector.load %arg2[%c1_31, %c0_32, %c0_33, %c0_34] : memref<3x3x384x64xf32, #tpu.memory_space<vmem>>, vector<1x1x384x64xf32>
      %32 = vector.shape_cast %31 : vector<1x1x384x64xf32> to vector<384x64xf32>
      %cst_35 = arith.constant dense<0.000000e+00> : vector<32x64xf32>
      %33 = tpu.matmul %30, %32, %cst_35 {dimension_numbers = #tpu.dot_dimension_numbers<[1], [0], [0], [1], [0, 0, 1, 1], [], []>} : vector<32x384xf32>, vector<384x64xf32>, vector<32x64xf32> -> vector<32x64xf32>
      %34 = arith.addf %26, %33 : vector<32x64xf32>
      %c1_i32_36 = arith.constant 1 : i32
      %35 = arith.addi %arg5, %c1_i32_36 : i32
      %c0_37 = arith.constant 0 : index
      %36 = arith.index_cast %35 : i32 to index
      %c1_38 = arith.constant 1 : index
      %c0_39 = arith.constant 0 : index
      %37 = vector.load %arg1[%c0_37, %36, %c1_38, %c0_39] : memref<1x34x34x384xf32, #tpu.memory_space<vmem>>, vector<1x1x32x384xf32>
      %38 = vector.shape_cast %37 : vector<1x1x32x384xf32> to vector<32x384xf32>
      %c1_40 = arith.constant 1 : index
      %c1_41 = arith.constant 1 : index
      %c0_42 = arith.constant 0 : index
      %c0_43 = arith.constant 0 : index
      %39 = vector.load %arg2[%c1_40, %c1_41, %c0_42, %c0_43] : memref<3x3x384x64xf32, #tpu.memory_space<vmem>>, vector<1x1x384x64xf32>
      %40 = vector.shape_cast %39 : vector<1x1x384x64xf32> to vector<384x64xf32>
      %cst_44 = arith.constant dense<0.000000e+00> : vector<32x64xf32>
      %41 = tpu.matmul %38, %40, %cst_44 {dimension_numbers = #tpu.dot_dimension_numbers<[1], [0], [0], [1], [0, 0, 1, 1], [], []>} : vector<32x384xf32>, vector<384x64xf32>, vector<32x64xf32> -> vector<32x64xf32>
      %42 = arith.addf %34, %41 : vector<32x64xf32>
      %c1_i32_45 = arith.constant 1 : i32
      %43 = arith.addi %arg5, %c1_i32_45 : i32
      %c0_46 = arith.constant 0 : index
      %44 = arith.index_cast %43 : i32 to index
      %c2_47 = arith.constant 2 : index
      %c0_48 = arith.constant 0 : index
      %45 = vector.load %arg1[%c0_46, %44, %c2_47, %c0_48] : memref<1x34x34x384xf32, #tpu.memory_space<vmem>>, vector<1x1x32x384xf32>
      %46 = vector.shape_cast %45 : vector<1x1x32x384xf32> to vector<32x384xf32>
      %c1_49 = arith.constant 1 : index
      %c2_50 = arith.constant 2 : index
      %c0_51 = arith.constant 0 : index
      %c0_52 = arith.constant 0 : index
      %47 = vector.load %arg2[%c1_49, %c2_50, %c0_51, %c0_52] : memref<3x3x384x64xf32, #tpu.memory_space<vmem>>, vector<1x1x384x64xf32>
      %48 = vector.shape_cast %47 : vector<1x1x384x64xf32> to vector<384x64xf32>
      %cst_53 = arith.constant dense<0.000000e+00> : vector<32x64xf32>
      %49 = tpu.matmul %46, %48, %cst_53 {dimension_numbers = #tpu.dot_dimension_numbers<[1], [0], [0], [1], [0, 0, 1, 1], [], []>} : vector<32x384xf32>, vector<384x64xf32>, vector<32x64xf32> -> vector<32x64xf32>
      %50 = arith.addf %42, %49 : vector<32x64xf32>
      %c2_i32 = arith.constant 2 : i32
      %51 = arith.addi %arg5, %c2_i32 : i32
      %c0_54 = arith.constant 0 : index
      %52 = arith.index_cast %51 : i32 to index
      %c0_55 = arith.constant 0 : index
      %c0_56 = arith.constant 0 : index
      %53 = vector.load %arg1[%c0_54, %52, %c0_55, %c0_56] : memref<1x34x34x384xf32, #tpu.memory_space<vmem>>, vector<1x1x32x384xf32>
      %54 = vector.shape_cast %53 : vector<1x1x32x384xf32> to vector<32x384xf32>
      %c2_57 = arith.constant 2 : index
      %c0_58 = arith.constant 0 : index
      %c0_59 = arith.constant 0 : index
      %c0_60 = arith.constant 0 : index
      %55 = vector.load %arg2[%c2_57, %c0_58, %c0_59, %c0_60] : memref<3x3x384x64xf32, #tpu.memory_space<vmem>>, vector<1x1x384x64xf32>
      %56 = vector.shape_cast %55 : vector<1x1x384x64xf32> to vector<384x64xf32>
      %cst_61 = arith.constant dense<0.000000e+00> : vector<32x64xf32>
      %57 = tpu.matmul %54, %56, %cst_61 {dimension_numbers = #tpu.dot_dimension_numbers<[1], [0], [0], [1], [0, 0, 1, 1], [], []>} : vector<32x384xf32>, vector<384x64xf32>, vector<32x64xf32> -> vector<32x64xf32>
      %58 = arith.addf %50, %57 : vector<32x64xf32>
      %c2_i32_62 = arith.constant 2 : i32
      %59 = arith.addi %arg5, %c2_i32_62 : i32
      %c0_63 = arith.constant 0 : index
      %60 = arith.index_cast %59 : i32 to index
      %c1_64 = arith.constant 1 : index
      %c0_65 = arith.constant 0 : index
      %61 = vector.load %arg1[%c0_63, %60, %c1_64, %c0_65] : memref<1x34x34x384xf32, #tpu.memory_space<vmem>>, vector<1x1x32x384xf32>
      %62 = vector.shape_cast %61 : vector<1x1x32x384xf32> to vector<32x384xf32>
      %c2_66 = arith.constant 2 : index
      %c1_67 = arith.constant 1 : index
      %c0_68 = arith.constant 0 : index
      %c0_69 = arith.constant 0 : index
      %63 = vector.load %arg2[%c2_66, %c1_67, %c0_68, %c0_69] : memref<3x3x384x64xf32, #tpu.memory_space<vmem>>, vector<1x1x384x64xf32>
      %64 = vector.shape_cast %63 : vector<1x1x384x64xf32> to vector<384x64xf32>
      %cst_70 = arith.constant dense<0.000000e+00> : vector<32x64xf32>
      %65 = tpu.matmul %62, %64, %cst_70 {dimension_numbers = #tpu.dot_dimension_numbers<[1], [0], [0], [1], [0, 0, 1, 1], [], []>} : vector<32x384xf32>, vector<384x64xf32>, vector<32x64xf32> -> vector<32x64xf32>
      %66 = arith.addf %58, %65 : vector<32x64xf32>
      %c2_i32_71 = arith.constant 2 : i32
      %67 = arith.addi %arg5, %c2_i32_71 : i32
      %c0_72 = arith.constant 0 : index
      %68 = arith.index_cast %67 : i32 to index
      %c2_73 = arith.constant 2 : index
      %c0_74 = arith.constant 0 : index
      %69 = vector.load %arg1[%c0_72, %68, %c2_73, %c0_74] : memref<1x34x34x384xf32, #tpu.memory_space<vmem>>, vector<1x1x32x384xf32>
      %70 = vector.shape_cast %69 : vector<1x1x32x384xf32> to vector<32x384xf32>
      %c2_75 = arith.constant 2 : index
      %c2_76 = arith.constant 2 : index
      %c0_77 = arith.constant 0 : index
      %c0_78 = arith.constant 0 : index
      %71 = vector.load %arg2[%c2_75, %c2_76, %c0_77, %c0_78] : memref<3x3x384x64xf32, #tpu.memory_space<vmem>>, vector<1x1x384x64xf32>
      %72 = vector.shape_cast %71 : vector<1x1x384x64xf32> to vector<384x64xf32>
      %cst_79 = arith.constant dense<0.000000e+00> : vector<32x64xf32>
      %73 = tpu.matmul %70, %72, %cst_79 {dimension_numbers = #tpu.dot_dimension_numbers<[1], [0], [0], [1], [0, 0, 1, 1], [], []>} : vector<32x384xf32>, vector<384x64xf32>, vector<32x64xf32> -> vector<32x64xf32>
      %74 = arith.addf %66, %73 : vector<32x64xf32>
      %75 = vector.broadcast %0 : vector<1x64xf32> to vector<32x64xf32>
      %76 = arith.addf %74, %75 : vector<32x64xf32>
      %c0_80 = arith.constant 0 : index
      %77 = arith.index_cast %arg5 : i32 to index
      %c0_81 = arith.constant 0 : index
      %c0_82 = arith.constant 0 : index
      %78 = vector.load %arg4[%c0_80, %77, %c0_81, %c0_82] : memref<1x32x32x64xf32, #tpu.memory_space<vmem>>, vector<1x1x32x64xf32>
      %79 = vector.shape_cast %78 : vector<1x1x32x64xf32> to vector<32x64xf32>
      %80 = vector.shape_cast %76 : vector<32x64xf32> to vector<1x1x32x64xf32>
      tpu.vector_store %arg4[%c0_80, %77, %c0_81, %c0_82], %80 {strides = array<i32>} : memref<1x32x32x64xf32, #tpu.memory_space<vmem>>, vector<1x1x32x64xf32>,
    }
    %c32_i32_1 = arith.constant 32 : i32
    return
  }
  func.func @transform_0(%arg0: i32) -> (i32, i32, i32, i32) {
    %c0_i32 = arith.constant 0 : i32
    %c0_i32_0 = arith.constant 0 : i32
    %c0_i32_1 = arith.constant 0 : i32
    %c0_i32_2 = arith.constant 0 : i32
    return %arg0, %c0_i32, %c0_i32_0, %c0_i32_1 : i32, i32, i32, i32
  }
  func.func @transform_1(%arg0: i32) -> (i32, i32, i32, i32) {
    %c0_i32 = arith.constant 0 : i32
    %c0_i32_0 = arith.constant 0 : i32
    %c0_i32_1 = arith.constant 0 : i32
    %c0_i32_2 = arith.constant 0 : i32
    %c0_i32_3 = arith.constant 0 : i32
    return %c0_i32, %c0_i32_0, %c0_i32_1, %c0_i32_2 : i32, i32, i32, i32
  }
  func.func @transform_2(%arg0: i32) -> (i32, i32) {
    %c0_i32 = arith.constant 0 : i32
    %c0_i32_0 = arith.constant 0 : i32
    %c0_i32_1 = arith.constant 0 : i32
    return %c0_i32, %c0_i32_0 : i32, i32
  }
  func.func @transform_3(%arg0: i32) -> (i32, i32, i32, i32) {
    %c0_i32 = arith.constant 0 : i32
    %c0_i32_0 = arith.constant 0 : i32
    %c0_i32_1 = arith.constant 0 : i32
    %c0_i32_2 = arith.constant 0 : i32
    return %arg0, %c0_i32, %c0_i32_0, %c0_i32_1 : i32, i32, i32, i32
  }
}

module attributes {stable_mosaic.version = 11 : i64} {
  func.func @_conv3x3_kernel(%arg0: i32, %arg1: memref<1x66x66x64xf32, #tpu.memory_space<vmem>>, %arg2: memref<3x3x64x128xf32, #tpu.memory_space<vmem>>, %arg3: memref<1x128xf32, #tpu.memory_space<vmem>>, %arg4: memref<1x64x64x128xf32, #tpu.memory_space<vmem>>) attributes {dimension_semantics = [#tpu.dimension_semantics<parallel>], iteration_bounds = array<i64: 2>, scalar_prefetch = 0 : i64, scratch_operands = 0 : i64, tpu.core_type = #tpu.core_type<tc>, window_params = [{transform_indices = @transform_0, window_bounds = array<i64: 1, 66, 66, 64>}, {pipeline_mode = #tpu.pipeline_mode<synchronous>, transform_indices = @transform_1, window_bounds = array<i64: 3, 3, 64, 128>}, {pipeline_mode = #tpu.pipeline_mode<synchronous>, transform_indices = @transform_2, window_bounds = array<i64: 1, 128>}, {transform_indices = @transform_3, window_bounds = array<i64: 1, 64, 64, 128>}]} {
    %c0 = arith.constant 0 : index
    %c0_0 = arith.constant 0 : index
    %0 = vector.load %arg3[%c0, %c0_0] : memref<1x128xf32, #tpu.memory_space<vmem>>, vector<1x128xf32>
    %c0_i32 = arith.constant 0 : i32
    %c64_i32 = arith.constant 64 : i32
    %1 = arith.addi %c0_i32, %c64_i32 : i32
    %c1_i32 = arith.constant 1 : i32
    scf.for %arg5 = %c0_i32 to %1 step %c1_i32  : i32 {
      %cst = arith.constant 0.000000e+00 : f32
      %2 = vector.broadcast %cst : f32 to vector<64x128xf32>
      %c0_i32_2 = arith.constant 0 : i32
      %3 = arith.addi %arg5, %c0_i32_2 : i32
      %c0_3 = arith.constant 0 : index
      %4 = arith.index_cast %3 : i32 to index
      %c0_4 = arith.constant 0 : index
      %c0_5 = arith.constant 0 : index
      %5 = vector.load %arg1[%c0_3, %4, %c0_4, %c0_5] : memref<1x66x66x64xf32, #tpu.memory_space<vmem>>, vector<1x1x64x64xf32>
      %6 = vector.shape_cast %5 : vector<1x1x64x64xf32> to vector<64x64xf32>
      %c0_6 = arith.constant 0 : index
      %c0_7 = arith.constant 0 : index
      %c0_8 = arith.constant 0 : index
      %c0_9 = arith.constant 0 : index
      %7 = vector.load %arg2[%c0_6, %c0_7, %c0_8, %c0_9] : memref<3x3x64x128xf32, #tpu.memory_space<vmem>>, vector<1x1x64x128xf32>
      %8 = vector.shape_cast %7 : vector<1x1x64x128xf32> to vector<64x128xf32>
      %cst_10 = arith.constant dense<0.000000e+00> : vector<64x128xf32>
      %9 = tpu.matmul %6, %8, %cst_10 {dimension_numbers = #tpu.dot_dimension_numbers<[1], [0], [0], [1], [0, 0, 1, 1], [], []>} : vector<64x64xf32>, vector<64x128xf32>, vector<64x128xf32> -> vector<64x128xf32>
      %10 = arith.addf %2, %9 : vector<64x128xf32>
      %c0_i32_11 = arith.constant 0 : i32
      %11 = arith.addi %arg5, %c0_i32_11 : i32
      %c0_12 = arith.constant 0 : index
      %12 = arith.index_cast %11 : i32 to index
      %c1 = arith.constant 1 : index
      %c0_13 = arith.constant 0 : index
      %13 = vector.load %arg1[%c0_12, %12, %c1, %c0_13] : memref<1x66x66x64xf32, #tpu.memory_space<vmem>>, vector<1x1x64x64xf32>
      %14 = vector.shape_cast %13 : vector<1x1x64x64xf32> to vector<64x64xf32>
      %c0_14 = arith.constant 0 : index
      %c1_15 = arith.constant 1 : index
      %c0_16 = arith.constant 0 : index
      %c0_17 = arith.constant 0 : index
      %15 = vector.load %arg2[%c0_14, %c1_15, %c0_16, %c0_17] : memref<3x3x64x128xf32, #tpu.memory_space<vmem>>, vector<1x1x64x128xf32>
      %16 = vector.shape_cast %15 : vector<1x1x64x128xf32> to vector<64x128xf32>
      %cst_18 = arith.constant dense<0.000000e+00> : vector<64x128xf32>
      %17 = tpu.matmul %14, %16, %cst_18 {dimension_numbers = #tpu.dot_dimension_numbers<[1], [0], [0], [1], [0, 0, 1, 1], [], []>} : vector<64x64xf32>, vector<64x128xf32>, vector<64x128xf32> -> vector<64x128xf32>
      %18 = arith.addf %10, %17 : vector<64x128xf32>
      %c0_i32_19 = arith.constant 0 : i32
      %19 = arith.addi %arg5, %c0_i32_19 : i32
      %c0_20 = arith.constant 0 : index
      %20 = arith.index_cast %19 : i32 to index
      %c2 = arith.constant 2 : index
      %c0_21 = arith.constant 0 : index
      %21 = vector.load %arg1[%c0_20, %20, %c2, %c0_21] : memref<1x66x66x64xf32, #tpu.memory_space<vmem>>, vector<1x1x64x64xf32>
      %22 = vector.shape_cast %21 : vector<1x1x64x64xf32> to vector<64x64xf32>
      %c0_22 = arith.constant 0 : index
      %c2_23 = arith.constant 2 : index
      %c0_24 = arith.constant 0 : index
      %c0_25 = arith.constant 0 : index
      %23 = vector.load %arg2[%c0_22, %c2_23, %c0_24, %c0_25] : memref<3x3x64x128xf32, #tpu.memory_space<vmem>>, vector<1x1x64x128xf32>
      %24 = vector.shape_cast %23 : vector<1x1x64x128xf32> to vector<64x128xf32>
      %cst_26 = arith.constant dense<0.000000e+00> : vector<64x128xf32>
      %25 = tpu.matmul %22, %24, %cst_26 {dimension_numbers = #tpu.dot_dimension_numbers<[1], [0], [0], [1], [0, 0, 1, 1], [], []>} : vector<64x64xf32>, vector<64x128xf32>, vector<64x128xf32> -> vector<64x128xf32>
      %26 = arith.addf %18, %25 : vector<64x128xf32>
      %c1_i32_27 = arith.constant 1 : i32
      %27 = arith.addi %arg5, %c1_i32_27 : i32
      %c0_28 = arith.constant 0 : index
      %28 = arith.index_cast %27 : i32 to index
      %c0_29 = arith.constant 0 : index
      %c0_30 = arith.constant 0 : index
      %29 = vector.load %arg1[%c0_28, %28, %c0_29, %c0_30] : memref<1x66x66x64xf32, #tpu.memory_space<vmem>>, vector<1x1x64x64xf32>
      %30 = vector.shape_cast %29 : vector<1x1x64x64xf32> to vector<64x64xf32>
      %c1_31 = arith.constant 1 : index
      %c0_32 = arith.constant 0 : index
      %c0_33 = arith.constant 0 : index
      %c0_34 = arith.constant 0 : index
      %31 = vector.load %arg2[%c1_31, %c0_32, %c0_33, %c0_34] : memref<3x3x64x128xf32, #tpu.memory_space<vmem>>, vector<1x1x64x128xf32>
      %32 = vector.shape_cast %31 : vector<1x1x64x128xf32> to vector<64x128xf32>
      %cst_35 = arith.constant dense<0.000000e+00> : vector<64x128xf32>
      %33 = tpu.matmul %30, %32, %cst_35 {dimension_numbers = #tpu.dot_dimension_numbers<[1], [0], [0], [1], [0, 0, 1, 1], [], []>} : vector<64x64xf32>, vector<64x128xf32>, vector<64x128xf32> -> vector<64x128xf32>
      %34 = arith.addf %26, %33 : vector<64x128xf32>
      %c1_i32_36 = arith.constant 1 : i32
      %35 = arith.addi %arg5, %c1_i32_36 : i32
      %c0_37 = arith.constant 0 : index
      %36 = arith.index_cast %35 : i32 to index
      %c1_38 = arith.constant 1 : index
      %c0_39 = arith.constant 0 : index
      %37 = vector.load %arg1[%c0_37, %36, %c1_38, %c0_39] : memref<1x66x66x64xf32, #tpu.memory_space<vmem>>, vector<1x1x64x64xf32>
      %38 = vector.shape_cast %37 : vector<1x1x64x64xf32> to vector<64x64xf32>
      %c1_40 = arith.constant 1 : index
      %c1_41 = arith.constant 1 : index
      %c0_42 = arith.constant 0 : index
      %c0_43 = arith.constant 0 : index
      %39 = vector.load %arg2[%c1_40, %c1_41, %c0_42, %c0_43] : memref<3x3x64x128xf32, #tpu.memory_space<vmem>>, vector<1x1x64x128xf32>
      %40 = vector.shape_cast %39 : vector<1x1x64x128xf32> to vector<64x128xf32>
      %cst_44 = arith.constant dense<0.000000e+00> : vector<64x128xf32>
      %41 = tpu.matmul %38, %40, %cst_44 {dimension_numbers = #tpu.dot_dimension_numbers<[1], [0], [0], [1], [0, 0, 1, 1], [], []>} : vector<64x64xf32>, vector<64x128xf32>, vector<64x128xf32> -> vector<64x128xf32>
      %42 = arith.addf %34, %41 : vector<64x128xf32>
      %c1_i32_45 = arith.constant 1 : i32
      %43 = arith.addi %arg5, %c1_i32_45 : i32
      %c0_46 = arith.constant 0 : index
      %44 = arith.index_cast %43 : i32 to index
      %c2_47 = arith.constant 2 : index
      %c0_48 = arith.constant 0 : index
      %45 = vector.load %arg1[%c0_46, %44, %c2_47, %c0_48] : memref<1x66x66x64xf32, #tpu.memory_space<vmem>>, vector<1x1x64x64xf32>
      %46 = vector.shape_cast %45 : vector<1x1x64x64xf32> to vector<64x64xf32>
      %c1_49 = arith.constant 1 : index
      %c2_50 = arith.constant 2 : index
      %c0_51 = arith.constant 0 : index
      %c0_52 = arith.constant 0 : index
      %47 = vector.load %arg2[%c1_49, %c2_50, %c0_51, %c0_52] : memref<3x3x64x128xf32, #tpu.memory_space<vmem>>, vector<1x1x64x128xf32>
      %48 = vector.shape_cast %47 : vector<1x1x64x128xf32> to vector<64x128xf32>
      %cst_53 = arith.constant dense<0.000000e+00> : vector<64x128xf32>
      %49 = tpu.matmul %46, %48, %cst_53 {dimension_numbers = #tpu.dot_dimension_numbers<[1], [0], [0], [1], [0, 0, 1, 1], [], []>} : vector<64x64xf32>, vector<64x128xf32>, vector<64x128xf32> -> vector<64x128xf32>
      %50 = arith.addf %42, %49 : vector<64x128xf32>
      %c2_i32 = arith.constant 2 : i32
      %51 = arith.addi %arg5, %c2_i32 : i32
      %c0_54 = arith.constant 0 : index
      %52 = arith.index_cast %51 : i32 to index
      %c0_55 = arith.constant 0 : index
      %c0_56 = arith.constant 0 : index
      %53 = vector.load %arg1[%c0_54, %52, %c0_55, %c0_56] : memref<1x66x66x64xf32, #tpu.memory_space<vmem>>, vector<1x1x64x64xf32>
      %54 = vector.shape_cast %53 : vector<1x1x64x64xf32> to vector<64x64xf32>
      %c2_57 = arith.constant 2 : index
      %c0_58 = arith.constant 0 : index
      %c0_59 = arith.constant 0 : index
      %c0_60 = arith.constant 0 : index
      %55 = vector.load %arg2[%c2_57, %c0_58, %c0_59, %c0_60] : memref<3x3x64x128xf32, #tpu.memory_space<vmem>>, vector<1x1x64x128xf32>
      %56 = vector.shape_cast %55 : vector<1x1x64x128xf32> to vector<64x128xf32>
      %cst_61 = arith.constant dense<0.000000e+00> : vector<64x128xf32>
      %57 = tpu.matmul %54, %56, %cst_61 {dimension_numbers = #tpu.dot_dimension_numbers<[1], [0], [0], [1], [0, 0, 1, 1], [], []>} : vector<64x64xf32>, vector<64x128xf32>, vector<64x128xf32> -> vector<64x128xf32>
      %58 = arith.addf %50, %57 : vector<64x128xf32>
      %c2_i32_62 = arith.constant 2 : i32
      %59 = arith.addi %arg5, %c2_i32_62 : i32
      %c0_63 = arith.constant 0 : index
      %60 = arith.index_cast %59 : i32 to index
      %c1_64 = arith.constant 1 : index
      %c0_65 = arith.constant 0 : index
      %61 = vector.load %arg1[%c0_63, %60, %c1_64, %c0_65] : memref<1x66x66x64xf32, #tpu.memory_space<vmem>>, vector<1x1x64x64xf32>
      %62 = vector.shape_cast %61 : vector<1x1x64x64xf32> to vector<64x64xf32>
      %c2_66 = arith.constant 2 : index
      %c1_67 = arith.constant 1 : index
      %c0_68 = arith.constant 0 : index
      %c0_69 = arith.constant 0 : index
      %63 = vector.load %arg2[%c2_66, %c1_67, %c0_68, %c0_69] : memref<3x3x64x128xf32, #tpu.memory_space<vmem>>, vector<1x1x64x128xf32>
      %64 = vector.shape_cast %63 : vector<1x1x64x128xf32> to vector<64x128xf32>
      %cst_70 = arith.constant dense<0.000000e+00> : vector<64x128xf32>
      %65 = tpu.matmul %62, %64, %cst_70 {dimension_numbers = #tpu.dot_dimension_numbers<[1], [0], [0], [1], [0, 0, 1, 1], [], []>} : vector<64x64xf32>, vector<64x128xf32>, vector<64x128xf32> -> vector<64x128xf32>
      %66 = arith.addf %58, %65 : vector<64x128xf32>
      %c2_i32_71 = arith.constant 2 : i32
      %67 = arith.addi %arg5, %c2_i32_71 : i32
      %c0_72 = arith.constant 0 : index
      %68 = arith.index_cast %67 : i32 to index
      %c2_73 = arith.constant 2 : index
      %c0_74 = arith.constant 0 : index
      %69 = vector.load %arg1[%c0_72, %68, %c2_73, %c0_74] : memref<1x66x66x64xf32, #tpu.memory_space<vmem>>, vector<1x1x64x64xf32>
      %70 = vector.shape_cast %69 : vector<1x1x64x64xf32> to vector<64x64xf32>
      %c2_75 = arith.constant 2 : index
      %c2_76 = arith.constant 2 : index
      %c0_77 = arith.constant 0 : index
      %c0_78 = arith.constant 0 : index
      %71 = vector.load %arg2[%c2_75, %c2_76, %c0_77, %c0_78] : memref<3x3x64x128xf32, #tpu.memory_space<vmem>>, vector<1x1x64x128xf32>
      %72 = vector.shape_cast %71 : vector<1x1x64x128xf32> to vector<64x128xf32>
      %cst_79 = arith.constant dense<0.000000e+00> : vector<64x128xf32>
      %73 = tpu.matmul %70, %72, %cst_79 {dimension_numbers = #tpu.dot_dimension_numbers<[1], [0], [0], [1], [0, 0, 1, 1], [], []>} : vector<64x64xf32>, vector<64x128xf32>, vector<64x128xf32> -> vector<64x128xf32>
      %74 = arith.addf %66, %73 : vector<64x128xf32>
      %75 = vector.broadcast %0 : vector<1x128xf32> to vector<64x128xf32>
      %76 = arith.addf %74, %75 : vector<64x128xf32>
      %cst_80 = arith.constant 0.000000e+00 : f32
      %77 = vector.broadcast %cst_80 : f32 to vector<64x128xf32>
      %78 = arith.subf %77, %76 : vector<64x128xf32>
      %79 = math.exp %78 : vector<64x128xf32>
      %cst_81 = arith.constant 1.000000e+00 : f32
      %80 = vector.broadcast %cst_81 : f32 to vector<64x128xf32>
      %81 = arith.addf %80, %79 : vector<64x128xf32>
      %cst_82 = arith.constant 1.000000e+00 : f32
      %82 = vector.broadcast %cst_82 : f32 to vector<64x128xf32>
      %83 = arith.divf %82, %81 : vector<64x128xf32>
      %c0_83 = arith.constant 0 : index
      %84 = arith.index_cast %arg5 : i32 to index
      %c0_84 = arith.constant 0 : index
      %c0_85 = arith.constant 0 : index
      %85 = vector.load %arg4[%c0_83, %84, %c0_84, %c0_85] : memref<1x64x64x128xf32, #tpu.memory_space<vmem>>, vector<1x1x64x128xf32>
      %86 = vector.shape_cast %85 : vector<1x1x64x128xf32> to vector<64x128xf32>
      %87 = vector.shape_cast %83 : vector<64x128xf32> to vector<1x1x64x128xf32>
      tpu.vector_store %arg4[%c0_83, %84, %c0_84, %c0_85], %87 {strides = array<i32>} : memref<1x64x64x128xf32, #tpu.memory_space<vmem>>, vector<1x1x64x128xf32>,
    }
    %c64_i32_1 = arith.constant 64 : i32
    return
  }
  func.func @transform_0(%arg0: i32) -> (i32, i32, i32, i32) {
    %c0_i32 = arith.constant 0 : i32
    %c0_i32_0 = arith.constant 0 : i32
    %c0_i32_1 = arith.constant 0 : i32
    %c0_i32_2 = arith.constant 0 : i32
    return %arg0, %c0_i32, %c0_i32_0, %c0_i32_1 : i32, i32, i32, i32
  }
  func.func @transform_1(%arg0: i32) -> (i32, i32, i32, i32) {
    %c0_i32 = arith.constant 0 : i32
    %c0_i32_0 = arith.constant 0 : i32
    %c0_i32_1 = arith.constant 0 : i32
    %c0_i32_2 = arith.constant 0 : i32
    %c0_i32_3 = arith.constant 0 : i32
    return %c0_i32, %c0_i32_0, %c0_i32_1, %c0_i32_2 : i32, i32, i32, i32
  }
  func.func @transform_2(%arg0: i32) -> (i32, i32) {
    %c0_i32 = arith.constant 0 : i32
    %c0_i32_0 = arith.constant 0 : i32
    %c0_i32_1 = arith.constant 0 : i32
    return %c0_i32, %c0_i32_0 : i32, i32
  }
  func.func @transform_3(%arg0: i32) -> (i32, i32, i32, i32) {
    %c0_i32 = arith.constant 0 : i32
    %c0_i32_0 = arith.constant 0 : i32
    %c0_i32_1 = arith.constant 0 : i32
    %c0_i32_2 = arith.constant 0 : i32
    return %arg0, %c0_i32, %c0_i32_0, %c0_i32_1 : i32, i32, i32, i32
  }
}

</mosaic_0001>

<bundles_post_ra>
// kernel: conv_head_forward.2
= control target key start
LH: loop header
LB: loop body
LE: loop exit
PB: predicated region body
PF: predicated region fallthrough
CT: control target
= control target key end

     0   :  { %s2446_s12 = smov 0   ;;  %s4292_s0 = inlined_call_operand.vmem [shape: f32[2,34,34,384], index: 0, kind: input, shape index: {}]   ;;  %s4293_s1 = inlined_call_operand.vmem [shape: f32[3,3,384,64], index: 1, kind: input, shape index: {}]   ;;  %s4294_s2 = inlined_call_operand.vmem [shape: f32[1,64], index: 2, kind: input, shape index: {}]   ;;  %s4295_s3 = inlined_call_operand.vmem [shape: f32[2,32,32,64], index: 3, kind: output, shape index: {}]  }
   0x1 LB: > { %s1913_s13 = sadd.s32 4294967295, %s2420_s12   ;;  %p1917_p0 = scmp.ge.s32.totalorder %s2420_s12, 1  ;;  %s2420_s12 = sphi %s2446_s12, %s13_s12  }
   0x2   : > { %p137_p1 = scmp.lt.s32.totalorder %s2420_s12, 3 }
   0x4   : > { %p138_p2 = pnand %p1917_p0, %p137_p1 }
   0x5   : > { %p161_p3 = scmp.lt.s32.totalorder (!%p138_p2), %s1913_s13, 1  ;;  %s2469_s24 = smov (!%p138_p2), 0  }
   0x6   : > { %141 = sbr.rel (%p138_p2) target bundleno = 449 (0x1c1), region = 32 }
   0xb   : > { %v2457_v0 = vld [vmem:[%s4294_s2] sm:$0x1]  ;;  %s4297_s13 = smov (!%p161_p3, %s1913_s13), 1 }
   0xc   : > { %s2393_s16 = smul.u32 4080, %s4297_s13  ;;  %s2375_s17 = sshll.u32 %s4297_s13, 10 }
   0xd   : > { %s2462_s20 = scalar_lea.vmem %s4295_s3, %s2375_s17 }
   0xe   : > { %s2467_s23 = scalar_lea.vmem %s4292_s0, %s2393_s16 }
   0xf LB: >> { %v1937_v1 = vld [vmem:[%s4293_s1 + $0x1f8] sm:$0xff]  ;;  %v1936_v4 = vld [vmem:[%s4293_s1 + $0x1f0] sm:$0xff]  ;;  %v1935_v8 = vld [vmem:[%s4293_s1 + $0x1e8] sm:$0xff]  ;;  %s2376_s28 = smul.u32 120, %s2424_s24  ;;  %vm311_vm0 = vcmask 1046528   ;;  %vm586_vm1 = vcmask 1045504   ;;  %s2424_s24 = sphi %s2469_s24, %s177_s24  }
  0x10   : >> { %v1969_v2 = vld [vmem:[%s4293_s1 + $0x2f8] sm:$0xff]  ;;  %351 = vmatpush.msra.mxu0 %v1937_v1  ;;  %v1968_v6 = vld [vmem:[%s4293_s1 + $0x2f0] sm:$0xff]  ;;  %v1967_v10 = vld [vmem:[%s4293_s1 + $0x2e8] sm:$0xff]  ;;  %vm1838_vm2 = vcmask 523264  }
  0x11   : >> { %v208_v3 = vld [vmem:[%s4293_s1 + $0x78] sm:$0xff]  ;;  %409 = vmatpush.msra.mxu2 %v1969_v2  ;;  %v207_v7 = vld [vmem:[%s4293_s1 + $0x70] sm:$0xff]  ;;  %v206_v11 = vld [vmem:[%s4293_s1 + $0x68] sm:$0xff]  ;;  %s2608_s19 = scalar_lea.vmem %s2467_s23, %s2376_s28 }
  0x12   : >> { %v1953_v5 = vld [vmem:[%s4293_s1 + $0x278] sm:$0xff]  ;;  %438 = vmatpush.msra.mxu3 %v208_v3  ;;  %v1952_v9 = vld [vmem:[%s4293_s1 + $0x270] sm:$0xff]  ;;  %352 = vmatpush.msra.mxu0 %v1936_v4  ;;  %v1934_v12 = vld [vmem:[%s4293_s1 + $0x1e0] sm:$0xff] }
  0x13   : >> { %380 = vmatpush.msra.mxu1 %v1953_v5  ;;  %410 = vmatpush.msra.mxu2 %v1968_v6  ;;  %v1951_v13 = vld [vmem:[%s4293_s1 + $0x268] sm:$0xff]  ;;  %v1966_v14 = vld [vmem:[%s4293_s1 + $0x2e0] sm:$0xff]  ;;  %v1933_v17 = vld [vmem:[%s4293_s1 + $0x1d8] sm:$0xff] }
  0x14   : >> { %439 = vmatpush.msra.mxu3 %v207_v7  ;;  %353 = vmatpush.msra.mxu0 %v1935_v8  ;;  %v205_v15 = vld [vmem:[%s4293_s1 + $0x60] sm:$0xff]  ;;  %v1965_v18 = vld [vmem:[%s4293_s1 + $0x2d8] sm:$0xff]  ;;  %v1932_v21 = vld [vmem:[%s4293_s1 + $0x1d0] sm:$0xff] }
  0x15   : >> { %381 = vmatpush.msra.mxu1 %v1952_v9  ;;  %411 = vmatpush.msra.mxu2 %v1967_v10  ;;  %v1950_v16 = vld [vmem:[%s4293_s1 + $0x260] sm:$0xff]  ;;  %v204_v19 = vld [vmem:[%s4293_s1 + $0x58] sm:$0xff]  ;;  %v1964_v22 = vld [vmem:[%s4293_s1 + $0x2d0] sm:$0xff] }
  0x16   : >> { %440 = vmatpush.msra.mxu3 %v206_v11  ;;  %354 = vmatpush.msra.mxu0 %v1934_v12  ;;  %v1949_v20 = vld [vmem:[%s4293_s1 + $0x258] sm:$0xff]  ;;  %v203_v23 = vld [vmem:[%s4293_s1 + $0x50] sm:$0xff]  ;;  %v1931_v25 = vld [vmem:[%s4293_s1 + $0x1c8] sm:$0xff] }
  0x17   : >> { %382 = vmatpush.msra.mxu1 %v1951_v13  ;;  %412 = vmatpush.msra.mxu2 %v1966_v14  ;;  %v1948_v24 = vld [vmem:[%s4293_s1 + $0x250] sm:$0xff]  ;;  %v1963_v26 = vld [vmem:[%s4293_s1 + $0x2c8] sm:$0xff]  ;;  %v1930_v29 = vld [vmem:[%s4293_s1 + $0x1c0] sm:$0xff] }
  0x18   : >> { %441 = vmatpush.msra.mxu3 %v205_v15  ;;  %355 = vmatpush.msra.mxu0 %v1933_v17  ;;  %v202_v27 = vld [vmem:[%s4293_s1 + $0x48] sm:$0xff]  ;;  %v1962_v30 = vld [vmem:[%s4293_s1 + $0x2c0] sm:$0xff]  ;;  %v1929_v33 = vld [vmem:[%s4293_s1 + $0x1b8] sm:$0xff] }
  0x19   : >> { %383 = vmatpush.msra.mxu1 %v1950_v16  ;;  %413 = vmatpush.msra.mxu2 %v1965_v18  ;;  %v1947_v28 = vld [vmem:[%s4293_s1 + $0x248] sm:$0xff]  ;;  %v201_v31 = vld [vmem:[%s4293_s1 + $0x40] sm:$0xff]  ;;  %v1961_v34 = vld [vmem:[%s4293_s1 + $0x2b8] sm:$0xff] }
  0x1a   : >> { %442 = vmatpush.msra.mxu3 %v204_v19  ;;  %356 = vmatpush.msra.mxu0 %v1932_v21  ;;  %v1946_v32 = vld [vmem:[%s4293_s1 + $0x240] sm:$0xff]  ;;  %v200_v35 = vld [vmem:[%s4293_s1 + $0x38] sm:$0xff]  ;;  %v1928_v37 = vld [vmem:[%s4293_s1 + $0x1b0] sm:$0xff] }
  0x1b   : >> { %384 = vmatpush.msra.mxu1 %v1949_v20  ;;  %414 = vmatpush.msra.mxu2 %v1964_v22  ;;  %v1945_v36 = vld [vmem:[%s4293_s1 + $0x238] sm:$0xff]  ;;  %v1960_v38 = vld [vmem:[%s4293_s1 + $0x2b0] sm:$0xff]  ;;  %v1927_v41 = vld [vmem:[%s4293_s1 + $0x1a8] sm:$0xff] }
  0x1c   : >> { %443 = vmatpush.msra.mxu3 %v203_v23  ;;  %357 = vmatpush.msra.mxu0 %v1931_v25  ;;  %v199_v39 = vld [vmem:[%s4293_s1 + $0x30] sm:$0xff]  ;;  %v1959_v42 = vld [vmem:[%s4293_s1 + $0x2a8] sm:$0xff]  ;;  %v1926_v45 = vld [vmem:[%s4293_s1 + $0x1a0] sm:$0xff] }
  0x1d   : >> { %385 = vmatpush.msra.mxu1 %v1948_v24  ;;  %415 = vmatpush.msra.mxu2 %v1963_v26  ;;  %v1944_v40 = vld [vmem:[%s4293_s1 + $0x230] sm:$0xff]  ;;  %v198_v43 = vld [vmem:[%s4293_s1 + $0x28] sm:$0xff]  ;;  %v1958_v46 = vld [vmem:[%s4293_s1 + $0x2a0] sm:$0xff] }
  0x1e   : >> { %444 = vmatpush.msra.mxu3 %v202_v27  ;;  %358 = vmatpush.msra.mxu0 %v1930_v29  ;;  %v1943_v44 = vld [vmem:[%s4293_s1 + $0x228] sm:$0xff]  ;;  %v197_v47 = vld [vmem:[%s4293_s1 + $0x20] sm:$0xff]  ;;  %v1925_v48 = vld [vmem:[%s4293_s1 + $0x198] sm:$0xff] }
  0x1f   : >> { %386 = vmatpush.msra.mxu1 %v1947_v28  ;;  %416 = vmatpush.msra.mxu2 %v1962_v30  ;;  %v1942_v49 = vld [vmem:[%s4293_s1 + $0x220] sm:$0xff]  ;;  %v1957_v50 = vld [vmem:[%s4293_s1 + $0x298] sm:$0xff]  ;;  %v2639_v55 = vld [vmem:[%s2608_s19 + $0x28] sm:$0xff] }
  0x20   : >> { %445 = vmatpush.msra.mxu3 %v201_v31  ;;  %359 = vmatpush.msra.mxu0 %v1929_v33  ;;  %v196_v51 = vld [vmem:[%s4293_s1 + $0x18] sm:$0xff]  ;;  %v241_v53 = vld [vmem:[%s2608_s19] sm:$0xfe]  ;;  %v243_v56 = vld [vmem:[%s2608_s19 + $0x10] sm:$0xfe]  ;;  %v319_v3 = vrot.slane %v2639_v55, 1 }
  0x21   : >> { %387 = vmatpush.msra.mxu1 %v1946_v32  ;;  %417 = vmatpush.msra.mxu2 %v1961_v34  ;;  %v2632_v52 = vld [vmem:[%s2608_s19 + $0x18] sm:$0xff]  ;;  %v1924_v57 = vld [vmem:[%s4293_s1 + $0x190] sm:$0xff]  ;;  %v1923_v60 = vld [vmem:[%s4293_s1 + $0x188] sm:$0xff]  ;;  %v312_v62 = vrot.slane %v241_v53, 1  ;;  %v318_v2 = vrot.slane %v243_v56, 1 }
  0x22   : >> { %446 = vmatpush.msra.mxu3 %v200_v35  ;;  %360 = vmatpush.msra.mxu0 %v1928_v37  ;;  %v1941_v54 = vld [vmem:[%s4293_s1 + $0x218] sm:$0xff]  ;;  %v1956_v58 = vld [vmem:[%s4293_s1 + $0x290] sm:$0xff]  ;;  %v313_v63 = vrot.slane %v2632_v52, 1  ;;  %v1955_v1 = vld [vmem:[%s4293_s1 + $0x288] sm:$0xff] }
  0x23   : >> { %388 = vmatpush.msra.mxu1 %v1945_v36  ;;  %418 = vmatpush.msra.mxu2 %v1960_v38  ;;  %v195_v59 = vld [vmem:[%s4293_s1 + $0x10] sm:$0xff]  ;;  %v2663_v4 = vld [vmem:[%s2608_s19 + $0x20] sm:$0xff]  ;;  %v242_v5 = vld [vmem:[%s2608_s19 + $0x8] sm:$0xfe]  ;;  %v320_v14 = vsel %vm311_vm0, %v318_v2, %v319_v3 }
  0x24   : >> { %447 = vmatpush.msra.mxu3 %v199_v39  ;;  %361 = vmatpush.msra.mxu0 %v1927_v41  ;;  %v1940_v61 = vld [vmem:[%s4293_s1 + $0x210] sm:$0xff]  ;;  %v194_v6 = vld [vmem:[%s4293_s1 + $0x8] sm:$0xff]  ;;  %v1922_v8 = vld [vmem:[%s4293_s1 + $0x180] sm:$0xff]  ;;  %v314_v11 = vsel %vm311_vm0, %v312_v62, %v313_v63  ;;  %v315_v12 = vrot.slane %v242_v5, 1  ;;  %v316_v13 = vrot.slane %v2663_v4, 1 }
  0x25   : >> { %389 = vmatpush.msra.mxu1 %v1944_v40  ;;  %419 = vmatpush.msra.mxu2 %v1959_v42  ;;  %v1939_v7 = vld [vmem:[%s4293_s1 + $0x208] sm:$0xff]  ;;  %v1954_v9 = vld [vmem:[%s4293_s1 + $0x280] sm:$0xff]  ;;  %v1985_v16 = vld [vmem:[%s4293_s1 + $0x378] sm:$0xff] }
  0x26   : >> { %448 = vmatpush.msra.mxu3 %v198_v43  ;;  %362 = vmatpush.msra.mxu0 %v1926_v45  ;;  %v193_v10 = vld [vmem:[%s4293_s1] sm:$0xff]  ;;  %v224_v18 = vld [vmem:[%s4293_s1 + $0xf8] sm:$0xff]  ;;  %v2702_v20 = vld [vmem:[%s2608_s19 + $0x30] sm:$0xff]  ;;  %v317_v21 = vsel %vm311_vm0, %v315_v12, %v316_v13 }
  0x27   : >> { %390 = vmatpush.msra.mxu1 %v1943_v44  ;;  %420 = vmatpush.msra.mxu2 %v1958_v46  ;;  %v181_v15 = vld [vmem:[%s2608_s19] sm:$0xff]  ;;  %v2001_v19 = vld [vmem:[%s4293_s1 + $0x3f8] sm:$0xff]  ;;  %v1984_v22 = vld [vmem:[%s4293_s1 + $0x370] sm:$0xff]  ;;  %v321_v28 = vrot.slane %v2702_v20, 1 }
  0x28   : >> { %449 = vmatpush.msra.mxu3 %v197_v47  ;;  %363 = vmatpush.msra.mxu0 %v1925_v48  ;;  %v1938_v17 = vld [vmem:[%s4293_s1 + $0x200] sm:$0xff]  ;;  %v223_v24 = vld [vmem:[%s4293_s1 + $0xf0] sm:$0xff]  ;;  %v240_v25 = vld [vmem:[%s4293_s1 + $0x178] sm:$0xff] }
  0x29   : >> { %391 = vmatpush.msra.mxu1 %v1942_v49  ;;  %421 = vmatpush.msra.mxu2 %v1957_v50  ;;  %v2709_v23 = vld [vmem:[%s2608_s19 + $0x40] sm:$0xff]  ;;  %v2000_v26 = vld [vmem:[%s4293_s1 + $0x3f0] sm:$0xff]  ;;  %v1983_v27 = vld [vmem:[%s4293_s1 + $0x368] sm:$0xff]  ;;  %v322_v38 = vsel %vm311_vm0, %v313_v63, %v321_v28 }
  0x2a   : >> { %450 = vmatpush.msra.mxu3 %v196_v51  ;;  %364 = vmatpush.msra.mxu0 %v1924_v57  ;;  %v222_v29 = vld [vmem:[%s4293_s1 + $0xe8] sm:$0xff]  ;;  %v239_v30 = vld [vmem:[%s4293_s1 + $0x170] sm:$0xff]  ;;  %v325_v31 = vrot.slane %v2709_v23, 1  ;;  %v2732_v32 = vld [vmem:[%s2608_s19 + $0x38] sm:$0xff] }
  0x2b   : >> { %392 = vmatpush.msra.mxu1 %v1941_v54  ;;  %422 = vmatpush.msra.mxu2 %v1956_v58  ;;  %v1999_v33 = vld [vmem:[%s4293_s1 + $0x3e8] sm:$0xff]  ;;  %v1982_v34 = vld [vmem:[%s4293_s1 + $0x360] sm:$0xff]  ;;  %v323_v39 = vrot.slane %v2732_v32, 1  ;;  %v1981_v41 = vld [vmem:[%s4293_s1 + $0x358] sm:$0xff] }
  0x2c   : >> { %451 = vmatpush.msra.mxu3 %v195_v59  ;;  %365 = vmatpush.msra.mxu0 %v1923_v60  ;;  %v221_v35 = vld [vmem:[%s4293_s1 + $0xe0] sm:$0xff]  ;;  %v238_v36 = vld [vmem:[%s4293_s1 + $0x168] sm:$0xff]  ;;  %v326_v40 = vsel %vm311_vm0, %v319_v3, %v325_v31  ;;  %v220_v42 = vld [vmem:[%s4293_s1 + $0xd8] sm:$0xff] }
  0x2d   : >> { %393 = vmatpush.msra.mxu1 %v1940_v61  ;;  %423 = vmatpush.msra.mxu2 %v1955_v1  ;;  %v1998_v37 = vld [vmem:[%s4293_s1 + $0x3e0] sm:$0xff]  ;;  %v1997_v44 = vld [vmem:[%s4293_s1 + $0x3d8] sm:$0xff]  ;;  %v2773_v45 = vld [vmem:[%s2608_s19 + $0x48] sm:$0xff]  ;;  %v324_v46 = vsel %vm311_vm0, %v316_v13, %v323_v39 }
  0x2e   : >> { %452 = vmatpush.msra.mxu3 %v194_v6  ;;  %366 = vmatpush.msra.mxu0 %v1922_v8  ;;  %v237_v43 = vld [vmem:[%s4293_s1 + $0x160] sm:$0xff]  ;;  %v1980_v47 = vld [vmem:[%s4293_s1 + $0x350] sm:$0xff]  ;;  %v2781_v48 = vld [vmem:[%s2608_s19 + $0x58] sm:$0xff]  ;;  %v327_v54 = vrot.slane %v2773_v45, 1 }
  0x2f   : >> { %394 = vmatpush.msra.mxu1 %v1939_v7  ;;  %424 = vmatpush.msra.mxu2 %v1954_v9  ;;  %v219_v49 = vld [vmem:[%s4293_s1 + $0xd0] sm:$0xff]  ;;  %v236_v50 = vld [vmem:[%s4293_s1 + $0x158] sm:$0xff]  ;;  %v1979_v53 = vld [vmem:[%s4293_s1 + $0x348] sm:$0xff]  ;;  %v331_v58 = vrot.slane %v2781_v48, 1 }
  0x30   : >> { %453 = vmatpush.msra.mxu3 %v193_v10  ;;  %367 = vmatmul.f32.vlgmr.msra.gmra.mxu0 %v314_v11  ;;  %v1996_v51 = vld [vmem:[%s4293_s1 + $0x3d0] sm:$0xff]  ;;  %v218_v56 = vld [vmem:[%s4293_s1 + $0xc8] sm:$0xff]  ;;  %v1978_v61 = vld [vmem:[%s4293_s1 + $0x340] sm:$0xff]  ;;  %v328_v2 = vsel %vm311_vm0, %v321_v28, %v327_v54 }
  0x31   : >> { %425 = vmatmul.f32.vlgmr.msra.gmra.mxu2 %v320_v14  ;;  %454 = vmatmul.f32.vlgmr.msra.gmra.mxu3 %v181_v15  ;;  %v235_v57 = vld [vmem:[%s4293_s1 + $0x150] sm:$0xff]  ;;  %v1995_v60 = vld [vmem:[%s4293_s1 + $0x3c8] sm:$0xff]  ;;  %v217_v62 = vld [vmem:[%s4293_s1 + $0xc0] sm:$0xff]  ;;  %v332_v5 = vsel %vm311_vm0, %v325_v31, %v331_v58 }
  0x32   : >> { %626 = vmatpush.msrb.mxu2 %v1985_v16  ;;  %395 = vmatpush.msra.mxu1 %v1938_v17  ;;  %v2804_v59 = vld [vmem:[%s2608_s19 + $0x50] sm:$0xff]  ;;  %v234_v63 = vld [vmem:[%s4293_s1 + $0x148] sm:$0xff]  ;;  %v1994_v1 = vld [vmem:[%s4293_s1 + $0x3c0] sm:$0xff] }
  0x33   : >> { %467 = vmatpush.msrb.mxu0 %v224_v18  ;;  %655 = vmatpush.msrb.mxu3 %v2001_v19  ;;  %v329_v3 = vrot.slane %v2804_v59, 1  ;;  %v1977_v6 = vld [vmem:[%s4293_s1 + $0x338] sm:$0xff]  ;;  %v233_v8 = vld [vmem:[%s4293_s1 + $0x140] sm:$0xff]  ;;  %v1976_v12 = vld [vmem:[%s4293_s1 + $0x330] sm:$0xff] }
  0x34   : >> { %396 = vmatmul.f32.vlgmr.msra.gmra.mxu1 %v317_v21  ;;  %627 = vmatpush.msrb.mxu2 %v1984_v22  ;;  %v216_v7 = vld [vmem:[%s4293_s1 + $0xb8] sm:$0xff]  ;;  %v244_v10 = vld [vmem:[%s2608_s19 + $0x60] sm:$0x1]  ;;  %v246_v13 = vld [vmem:[%s2608_s19 + $0x70] sm:$0x1] }
  0x35   : >> { %468 = vmatpush.msrb.mxu0 %v223_v24  ;;  %496 = vmatpush.msrb.mxu1 %v240_v25  ;;  %v1993_v9 = vld [vmem:[%s4293_s1 + $0x3b8] sm:$0xff]  ;;  %v330_v11 = vsel %vm311_vm0, %v323_v39, %v329_v3  ;;  %v215_v14 = vld [vmem:[%s4293_s1 + $0xb0] sm:$0xff]  ;;  %v1975_v17 = vld [vmem:[%s4293_s1 + $0x328] sm:$0xff]  ;;  %v333_v18 = vrot.slane %v244_v10, 1  ;;  %v337_v22 = vrot.slane %v246_v13, 1 }
  0x36   : >> { %656 = vmatpush.msrb.mxu3 %v2000_v26  ;;  %628 = vmatpush.msrb.mxu2 %v1983_v27  ;;  %v232_v15 = vld [vmem:[%s4293_s1 + $0x138] sm:$0xff]  ;;  %v1992_v16 = vld [vmem:[%s4293_s1 + $0x3b0] sm:$0xff]  ;;  %v214_v19 = vld [vmem:[%s4293_s1 + $0xa8] sm:$0xff] }
  0x37   : >> { %469 = vmatpush.msrb.mxu0 %v222_v29  ;;  %497 = vmatpush.msrb.mxu1 %v239_v30  ;;  %v231_v21 = vld [vmem:[%s4293_s1 + $0x130] sm:$0xff]  ;;  %v245_v24 = vld [vmem:[%s2608_s19 + $0x68] sm:$0x1]  ;;  %v1974_v26 = vld [vmem:[%s4293_s1 + $0x320] sm:$0xff]  ;;  %v334_v30 = vsel %vm311_vm0, %v327_v54, %v333_v18  ;;  %v591_v54 = vrot.slane %v2663_v4, 2 }
  0x38   : >> { %657 = vmatpush.msrb.mxu3 %v1999_v33  ;;  %629 = vmatpush.msrb.mxu2 %v1982_v34  ;;  %v1991_v25 = vld [vmem:[%s4293_s1 + $0x3a8] sm:$0xff]  ;;  %v213_v27 = vld [vmem:[%s4293_s1 + $0xa0] sm:$0xff]  ;;  %v335_v31 = vrot.slane %v245_v24, 1  ;;  %v338_v33 = vsel %vm311_vm0, %v331_v58, %v337_v22  ;;  %v1973_v34 = vld [vmem:[%s4293_s1 + $0x318] sm:$0xff] }
  0x39   : >> { %470 = vmatpush.msrb.mxu0 %v221_v35  ;;  %498 = vmatpush.msrb.mxu1 %v238_v36  ;;  %v230_v28 = vld [vmem:[%s4293_s1 + $0x128] sm:$0xff]  ;;  %v1990_v29 = vld [vmem:[%s4293_s1 + $0x3a0] sm:$0xff]  ;;  %v212_v35 = vld [vmem:[%s4293_s1 + $0x98] sm:$0xff] }
  0x3a   : >> { %658 = vmatpush.msrb.mxu3 %v1998_v37  ;;  %370 = vmatmul.f32.gmra.mxu0 %v322_v38  ;;  %v229_v36 = vld [vmem:[%s4293_s1 + $0x120] sm:$0xff]  ;;  %v1989_v37 = vld [vmem:[%s4293_s1 + $0x398] sm:$0xff]  ;;  %v336_v38 = vsel %vm311_vm0, %v329_v3, %v335_v31  ;;  %v1972_v39 = vld [vmem:[%s4293_s1 + $0x310] sm:$0xff] }
  0x3b   : >> { %428 = vmatmul.f32.gmra.mxu2 %v326_v40  ;;  %457 = vmatmul.f32.gmra.mxu3 %v2632_v52  ;;  %v525_v40 = vld [vmem:[%s2608_s19] sm:$0xfc]  ;;  %v226_v58 = vld [vmem:[%s4293_s1 + $0x108] sm:$0xff]  ;;  %v2017_v3 = vld [vmem:[%s4293_s1 + $0x478] sm:$0xff] }
  0x3c   : >> { %630 = vmatpush.msrb.mxu2 %v1981_v41  ;;  %471 = vmatpush.msrb.mxu0 %v220_v42  ;;  %v526_v41 = vld [vmem:[%s2608_s19 + $0x8] sm:$0xfc]  ;;  %v211_v42 = vld [vmem:[%s4293_s1 + $0x90] sm:$0xff]  ;;  %v2014_v18 = vld [vmem:[%s4293_s1 + $0x460] sm:$0xff] }
  0x3d   : >> { %499 = vmatpush.msrb.mxu1 %v237_v43  ;;  %659 = vmatpush.msrb.mxu3 %v1997_v44  ;;  %v228_v43 = vld [vmem:[%s4293_s1 + $0x118] sm:$0xff]  ;;  %v1988_v44 = vld [vmem:[%s4293_s1 + $0x390] sm:$0xff]  ;;  %v2055_v31 = vld [vmem:[%s4293_s1 + $0x548] sm:$0xff] }
  0x3e   : >> { %399 = vmatmul.f32.gmra.mxu1 %v324_v46  ;;  %631 = vmatpush.msrb.mxu2 %v1980_v47  ;;  %v1971_v46 = vld [vmem:[%s4293_s1 + $0x308] sm:$0xff]  ;;  %v2076_v10 = vld [vmem:[%s4293_s1 + $0x5f0] sm:$0xff]  ;;  %v2057_v24 = vld [vmem:[%s4293_s1 + $0x558] sm:$0xff] }
  0x3f   : >> { %472 = vmatpush.msrb.mxu0 %v219_v49  ;;  %500 = vmatpush.msrb.mxu1 %v236_v50  ;;  %v210_v47 = vld [vmem:[%s4293_s1 + $0x88] sm:$0xff]  ;;  %v227_v49 = vld [vmem:[%s4293_s1 + $0x110] sm:$0xff]  ;;  %v587_v50 = vrot.slane %v525_v40, 2  ;;  %v2070_v40 = vld [vmem:[%s4293_s1 + $0x5c0] sm:$0xff] }
  0x40   : >> { %660 = vmatpush.msrb.mxu3 %v1996_v51  ;;  %632 = vmatpush.msrb.mxu2 %v1979_v53  ;;  %v588_v51 = vrot.slane %v2632_v52, 2  ;;  %v590_v53 = vrot.slane %v526_v41, 2  ;;  %v209_v52 = vld [vmem:[%s4293_s1 + $0x80] sm:$0xff]  ;;  %v2044_v13 = vld [vmem:[%s4293_s1 + $0x4f0] sm:$0xff] }
  0x41   : >> { %473 = vmatpush.msrb.mxu0 %v218_v56  ;;  %501 = vmatpush.msrb.mxu1 %v235_v57  ;;  %v1987_v56 = vld [vmem:[%s4293_s1 + $0x388] sm:$0xff]  ;;  %v1970_v57 = vld [vmem:[%s4293_s1 + $0x300] sm:$0xff] }
  0x42   : >> { %661 = vmatpush.msrb.mxu3 %v1995_v60  ;;  %633 = vmatpush.msrb.mxu2 %v1978_v61  ;;  %v1986_v60 = vld [vmem:[%s4293_s1 + $0x380] sm:$0xff]  ;;  %v182_v61 = vld [vmem:[%s2608_s19 + $0x8] sm:$0xff] }
  0x43   : >> { %474 = vmatpush.msrb.mxu0 %v217_v62  ;;  %502 = vmatpush.msrb.mxu1 %v234_v63  ;;  %v589_v62 = vsel %vm586_vm1, %v587_v50, %v588_v51  ;;  %v592_v63 = vsel %vm586_vm1, %v590_v53, %v591_v54  ;;  %v528_v50 = vld [vmem:[%s2608_s19 + $0x60] sm:$0x3]  ;;  %v2037_v53 = vld [vmem:[%s4293_s1 + $0x4b8] sm:$0xff] }
  0x44   : >> { %662 = vmatpush.msrb.mxu3 %v1994_v1  ;;  %373 = vmatmul.f32.gmra.mxu0 %v328_v2  ;;  %v2061_v1 = vld [vmem:[%s4293_s1 + $0x578] sm:$0xff]  ;;  %v225_v2 = vld [vmem:[%s4293_s1 + $0x100] sm:$0xff] }
  0x45   : >> { %431 = vmatmul.f32.gmra.mxu2 %v332_v5  ;;  %460 = vmatmul.f32.gmra.mxu3 %v2702_v20  ;;  %v2077_v5 = vld [vmem:[%s4293_s1 + $0x5f8] sm:$0xff] }
  0x46   : >> { %634 = vmatpush.msrb.mxu2 %v1977_v6  ;;  %475 = vmatpush.msrb.mxu0 %v216_v7  ;;  %v183_v6 = vld [vmem:[%s2608_s19 + $0x10] sm:$0xff] }
  0x47   : >> { %503 = vmatpush.msrb.mxu1 %v233_v8  ;;  %663 = vmatpush.msrb.mxu3 %v1993_v9  ;;  %v2060_v7 = vld [vmem:[%s4293_s1 + $0x570] sm:$0xff]  ;;  %v2045_v9 = vld [vmem:[%s4293_s1 + $0x4f8] sm:$0xff] }
  0x48   : >> { %402 = vmatmul.f32.gmra.mxu1 %v330_v11  ;;  %635 = vmatpush.msrb.mxu2 %v1976_v12  ;;  %v2016_v8 = vld [vmem:[%s4293_s1 + $0x470] sm:$0xff]  ;;  %v2059_v11 = vld [vmem:[%s4293_s1 + $0x568] sm:$0xff] }
  0x49   : >> { %476 = vmatpush.msrb.mxu0 %v215_v14  ;;  %504 = vmatpush.msrb.mxu1 %v232_v15  ;;  %v2015_v12 = vld [vmem:[%s4293_s1 + $0x468] sm:$0xff]  ;;  %v596_v14 = vrot.slane %v2702_v20, 2  ;;  %v598_v15 = vrot.slane %v2732_v32, 2 }
  0x4a   : >> { %664 = vmatpush.msrb.mxu3 %v1992_v16  ;;  %636 = vmatpush.msrb.mxu2 %v1975_v17  ;;  %v2075_v16 = vld [vmem:[%s4293_s1 + $0x5e8] sm:$0xff]  ;;  %v2058_v17 = vld [vmem:[%s4293_s1 + $0x560] sm:$0xff] }
  0x4b   : >> { %477 = vmatpush.msrb.mxu0 %v214_v19  ;;  %505 = vmatpush.msrb.mxu1 %v231_v21  ;;  %v2043_v20 = vld [vmem:[%s4293_s1 + $0x4e8] sm:$0xff]  ;;  %v2074_v19 = vld [vmem:[%s4293_s1 + $0x5e0] sm:$0xff]  ;;  %v597_v21 = vsel %vm586_vm1, %v588_v51, %v596_v14  ;;  %v599_v22 = vsel %vm586_vm1, %v591_v54, %v598_v15  ;;  %v2068_v54 = vld [vmem:[%s4293_s1 + $0x5b0] sm:$0xff] }
  0x4c   : >> { %665 = vmatpush.msrb.mxu3 %v1991_v25  ;;  %637 = vmatpush.msrb.mxu2 %v1974_v26  ;;  %v2013_v25 = vld [vmem:[%s4293_s1 + $0x458] sm:$0xff]  ;;  %v2042_v26 = vld [vmem:[%s4293_s1 + $0x4e0] sm:$0xff]  ;;  %v529_v51 = vld [vmem:[%s2608_s19 + $0x68] sm:$0x3] }
  0x4d   : >> { %478 = vmatpush.msrb.mxu0 %v213_v27  ;;  %506 = vmatpush.msrb.mxu1 %v230_v28  ;;  %v2073_v27 = vld [vmem:[%s4293_s1 + $0x5d8] sm:$0xff]  ;;  %v2056_v28 = vld [vmem:[%s4293_s1 + $0x550] sm:$0xff] }
  0x4e   : >> { %666 = vmatpush.msrb.mxu3 %v1990_v29  ;;  %376 = vmatmul.f32.gmra.mxu0 %v334_v30  ;;  %v2041_v29 = vld [vmem:[%s4293_s1 + $0x4d8] sm:$0xff]  ;;  %v2072_v30 = vld [vmem:[%s4293_s1 + $0x5d0] sm:$0xff] }
  0x4f   : >> { %434 = vmatmul.f32.gmra.mxu2 %v338_v33  ;;  %463 = vmatmul.f32.gmra.mxu3 %v2773_v45  ;;  %v2011_v33 = vld [vmem:[%s4293_s1 + $0x448] sm:$0xff] }
  0x50   : >> { %638 = vmatpush.msrb.mxu2 %v1973_v34  ;;  %479 = vmatpush.msrb.mxu0 %v212_v35  ;;  %v2040_v34 = vld [vmem:[%s4293_s1 + $0x4d0] sm:$0xff]  ;;  %v602_v35 = vrot.slane %v2773_v45, 2  ;;  %v2039_v45 = vld [vmem:[%s4293_s1 + $0x4c8] sm:$0xff] }
  0x51   : >> { %507 = vmatpush.msrb.mxu1 %v229_v36  ;;  %667 = vmatpush.msrb.mxu3 %v1989_v37  ;;  %v604_v36 = vrot.slane %v2804_v59, 2  ;;  %v2071_v37 = vld [vmem:[%s4293_s1 + $0x5c8] sm:$0xff] }
  0x52   : >> { %405 = vmatmul.f32.gmra.mxu1 %v336_v38  ;;  %639 = vmatpush.msrb.mxu2 %v1972_v39  ;;  %v2054_v38 = vld [vmem:[%s4293_s1 + $0x540] sm:$0xff]  ;;  %v603_v41 = vsel %vm586_vm1, %v596_v14, %v602_v35  ;;  %v2047_v14 = vld [vmem:[%s4293_s1 + $0x508] sm:$0xff] }
  0x53   : >> { %480 = vmatpush.msrb.mxu0 %v211_v42  ;;  %508 = vmatpush.msrb.mxu1 %v228_v43  ;;  %v2010_v39 = vld [vmem:[%s4293_s1 + $0x440] sm:$0xff]  ;;  %v605_v42 = vsel %vm586_vm1, %v598_v15, %v604_v36  ;;  %v2053_v43 = vld [vmem:[%s4293_s1 + $0x538] sm:$0xff] }
  0x54   : >> { %668 = vmatpush.msrb.mxu3 %v1988_v44  ;;  %640 = vmatpush.msrb.mxu2 %v1971_v46  ;;  %v2009_v44 = vld [vmem:[%s4293_s1 + $0x438] sm:$0xff]  ;;  %v2038_v46 = vld [vmem:[%s4293_s1 + $0x4c0] sm:$0xff] }
  0x55   : >> { %481 = vmatpush.msrb.mxu0 %v210_v47  ;;  %509 = vmatpush.msrb.mxu1 %v227_v49  ;;  %v2069_v47 = vld [vmem:[%s4293_s1 + $0x5b8] sm:$0xff]  ;;  %v2052_v49 = vld [vmem:[%s4293_s1 + $0x530] sm:$0xff] }
  0x56   : >> { %669 = vmatpush.msrb.mxu3 %v1987_v56  ;;  %641 = vmatpush.msrb.mxu2 %v1970_v57  ;;  %v2051_v56 = vld [vmem:[%s4293_s1 + $0x528] sm:$0xff] }
  0x57   : >> { %482 = vmatpush.msrb.mxu0 %v209_v52  ;;  %510 = vmatpush.msrb.mxu1 %v226_v58  ;;  %v2007_v57 = vld [vmem:[%s4293_s1 + $0x428] sm:$0xff]  ;;  %v2036_v52 = vld [vmem:[%s4293_s1 + $0x4b0] sm:$0xff]  ;;  %v608_v58 = vrot.slane %v528_v50, 2  ;;  %v2121_v50 = vld [vmem:[%s4293_s1 + $0x6e0] sm:$0xff] }
  0x58   : >> { %670 = vmatpush.msrb.mxu3 %v1986_v60  ;;  %483 = vmatmul.f32.vlgmr.msrb.gmra.mxu0 %v182_v61  ;;  %v610_v60 = vrot.slane %v529_v51, 2  ;;  %v2067_v61 = vld [vmem:[%s4293_s1 + $0x5a8] sm:$0xff]  ;;  %v2158_v51 = vld [vmem:[%s4293_s1 + $0x7d8] sm:$0xff] }
  0x59   : >> { %642 = vmatmul.f32.vlgmr.msrb.gmra.mxu2 %v589_v62  ;;  %671 = vmatmul.f32.vlgmr.msrb.gmra.mxu3 %v592_v63  ;;  %v2050_v62 = vld [vmem:[%s4293_s1 + $0x520] sm:$0xff] }
  0x5a   : >> { %811 = vmatpush.msra.mxu2 %v2061_v1  ;;  %511 = vmatpush.msrb.mxu1 %v225_v2  ;;  %v2006_v63 = vld [vmem:[%s4293_s1 + $0x420] sm:$0xff]  ;;  %v2035_v1 = vld [vmem:[%s4293_s1 + $0x4a8] sm:$0xff] }
  0x5b   : >> { %684 = vmatpush.msra.mxu0 %v2017_v3  ;;  %840 = vmatpush.msra.mxu3 %v2077_v5  ;;  %v2066_v2 = vld [vmem:[%s4293_s1 + $0x5a0] sm:$0xff]  ;;  %v609_v3 = vsel %vm586_vm1, %v602_v35, %v608_v58  ;;  %v611_v5 = vsel %vm586_vm1, %v604_v36, %v610_v60  ;;  %v2161_v35 = vld [vmem:[%s4293_s1 + $0x7f0] sm:$0xff]  ;;  %v2138_v36 = vld [vmem:[%s4293_s1 + $0x768] sm:$0xff]  ;;  %v606_v58 = vrot.slane %v2781_v48, 2 }
  0x5c   : >> { %512 = vmatmul.f32.vlgmr.msrb.gmra.mxu1 %v183_v6  ;;  %812 = vmatpush.msra.mxu2 %v2060_v7  ;;  %v2049_v6 = vld [vmem:[%s4293_s1 + $0x518] sm:$0xff]  ;;  %v2102_v60 = vld [vmem:[%s4293_s1 + $0x648] sm:$0xff] }
  0x5d   : >> { %685 = vmatpush.msra.mxu0 %v2016_v8  ;;  %782 = vmatpush.msra.mxu1 %v2045_v9  ;;  %v2005_v7 = vld [vmem:[%s4293_s1 + $0x418] sm:$0xff]  ;;  %v2034_v8 = vld [vmem:[%s4293_s1 + $0x4a0] sm:$0xff] }
  0x5e   : >> { %841 = vmatpush.msra.mxu3 %v2076_v10  ;;  %813 = vmatpush.msra.mxu2 %v2059_v11  ;;  %v2065_v9 = vld [vmem:[%s4293_s1 + $0x598] sm:$0xff]  ;;  %v527_v10 = vld [vmem:[%s2608_s19 + $0x10] sm:$0xfc] }
  0x5f   : >> { %686 = vmatpush.msra.mxu0 %v2015_v12  ;;  %783 = vmatpush.msra.mxu1 %v2044_v13  ;;  %v2048_v11 = vld [vmem:[%s4293_s1 + $0x510] sm:$0xff]  ;;  %v2033_v12 = vld [vmem:[%s4293_s1 + $0x498] sm:$0xff]  ;;  %v593_v15 = vrot.slane %v527_v10, 2 }
  0x60   : >> { %842 = vmatpush.msra.mxu3 %v2075_v16  ;;  %814 = vmatpush.msra.mxu2 %v2058_v17  ;;  %v2064_v13 = vld [vmem:[%s4293_s1 + $0x590] sm:$0xff]  ;;  %v594_v16 = vrot.slane %v2639_v55, 2  ;;  %v2003_v17 = vld [vmem:[%s4293_s1 + $0x408] sm:$0xff]  ;;  %v2154_v10 = vld [vmem:[%s4293_s1 + $0x7b8] sm:$0xff] }
  0x61   : >> { %687 = vmatpush.msra.mxu0 %v2014_v18  ;;  %784 = vmatpush.msra.mxu1 %v2043_v20  ;;  %v2032_v18 = vld [vmem:[%s4293_s1 + $0x490] sm:$0xff]  ;;  %v2063_v20 = vld [vmem:[%s4293_s1 + $0x588] sm:$0xff] }
  0x62   : >> { %843 = vmatpush.msra.mxu3 %v2074_v19  ;;  %486 = vmatmul.f32.gmra.mxu0 %v2663_v4  ;;  %v2012_v4 = vld [vmem:[%s4293_s1 + $0x450] sm:$0xff]  ;;  %v2002_v19 = vld [vmem:[%s4293_s1 + $0x400] sm:$0xff] }
  0x63   : >> { %645 = vmatmul.f32.gmra.mxu2 %v597_v21  ;;  %674 = vmatmul.f32.gmra.mxu3 %v599_v22  ;;  %v2031_v21 = vld [vmem:[%s4293_s1 + $0x488] sm:$0xff]  ;;  %v2062_v22 = vld [vmem:[%s4293_s1 + $0x580] sm:$0xff] }
  0x64   : >> { %815 = vmatpush.msra.mxu2 %v2057_v24  ;;  %688 = vmatpush.msra.mxu0 %v2013_v25  ;;  %v595_v24 = vsel %vm586_vm1, %v593_v15, %v594_v16  ;;  %v2019_v25 = vld [vmem:[%s2608_s19 + $0x80] sm:$0xff]  ;;  %v2153_v15 = vld [vmem:[%s4293_s1 + $0x7b0] sm:$0xff] }
  0x65   : >> { %785 = vmatpush.msra.mxu1 %v2042_v26  ;;  %844 = vmatpush.msra.mxu3 %v2073_v27  ;;  %v2020_v26 = vld [vmem:[%s2608_s19 + $0x88] sm:$0xff]  ;;  %v2140_v27 = vld [vmem:[%s4293_s1 + $0x778] sm:$0xff] }
  0x66   : >> { %515 = vmatmul.f32.gmra.mxu1 %v2639_v55  ;;  %816 = vmatpush.msra.mxu2 %v2056_v28  ;;  %v2046_v55 = vld [vmem:[%s4293_s1 + $0x500] sm:$0xff] }
  0x67   : >> { %689 = vmatpush.msra.mxu0 %v2012_v4  ;;  %786 = vmatpush.msra.mxu1 %v2041_v29  ;;  %v2030_v28 = vld [vmem:[%s4293_s1 + $0x480] sm:$0xff]  ;;  %v2108_v4 = vld [vmem:[%s4293_s1 + $0x678] sm:$0xff] }
  0x68   : >> { %845 = vmatpush.msra.mxu3 %v2072_v30  ;;  %817 = vmatpush.msra.mxu2 %v2055_v31  ;;  %v2162_v29 = vld [vmem:[%s4293_s1 + $0x7f8] sm:$0xff]  ;;  %v2139_v31 = vld [vmem:[%s4293_s1 + $0x770] sm:$0xff] }
  0x69   : >> { %690 = vmatpush.msra.mxu0 %v2011_v33  ;;  %787 = vmatpush.msra.mxu1 %v2040_v34  ;;  %v2018_v30 = vld [vmem:[%s2608_s19 + $0x78] sm:$0xff]  ;;  %v2107_v33 = vld [vmem:[%s4293_s1 + $0x670] sm:$0xff] }
  0x6a   : >> { %846 = vmatpush.msra.mxu3 %v2071_v37  ;;  %818 = vmatpush.msra.mxu2 %v2054_v38  ;;  %v2124_v34 = vld [vmem:[%s4293_s1 + $0x6f8] sm:$0xff]  ;;  %v600_v37 = vrot.slane %v2709_v23, 2  ;;  %v2106_v38 = vld [vmem:[%s4293_s1 + $0x668] sm:$0xff] }
  0x6b   : >> { %691 = vmatpush.msra.mxu0 %v2010_v39  ;;  %788 = vmatpush.msra.mxu1 %v2039_v45  ;;  %v2123_v39 = vld [vmem:[%s4293_s1 + $0x6f0] sm:$0xff]  ;;  %v2160_v45 = vld [vmem:[%s4293_s1 + $0x7e8] sm:$0xff] }
  0x6c   : >> { %847 = vmatpush.msra.mxu3 %v2070_v40  ;;  %489 = vmatmul.f32.gmra.mxu0 %v2732_v32  ;;  %v2008_v32 = vld [vmem:[%s4293_s1 + $0x430] sm:$0xff]  ;;  %v2105_v40 = vld [vmem:[%s4293_s1 + $0x660] sm:$0xff] }
  0x6d   : >> { %648 = vmatmul.f32.gmra.mxu2 %v603_v41  ;;  %677 = vmatmul.f32.gmra.mxu3 %v605_v42  ;;  %v2122_v41 = vld [vmem:[%s4293_s1 + $0x6e8] sm:$0xff]  ;;  %v2159_v42 = vld [vmem:[%s4293_s1 + $0x7e0] sm:$0xff] }
  0x6e   : >> { %819 = vmatpush.msra.mxu2 %v2053_v43  ;;  %692 = vmatpush.msra.mxu0 %v2009_v44  ;;  %v601_v43 = vsel %vm586_vm1, %v594_v16, %v600_v37  ;;  %v3216_v44 = vld [vmem:[%s2608_s19 + $0x98] sm:$0xff]  ;;  %v2130_v16 = vld [vmem:[%s4293_s1 + $0x728] sm:$0xff] }
  0x6f   : >> { %789 = vmatpush.msra.mxu1 %v2038_v46  ;;  %848 = vmatpush.msra.mxu3 %v2069_v47  ;;  %v3219_v46 = vld [vmem:[%s2608_s19 + $0xa0] sm:$0xff]  ;;  %v2136_v47 = vld [vmem:[%s4293_s1 + $0x758] sm:$0xff] }
  0x70   : >> { %518 = vmatmul.f32.gmra.mxu1 %v2709_v23  ;;  %820 = vmatpush.msra.mxu2 %v2052_v49  ;;  %v2137_v23 = vld [vmem:[%s4293_s1 + $0x760] sm:$0xff]  ;;  %v2104_v49 = vld [vmem:[%s4293_s1 + $0x658] sm:$0xff] }
  0x71   : >> { %693 = vmatpush.msra.mxu0 %v2008_v32  ;;  %790 = vmatpush.msra.mxu1 %v2037_v53  ;;  %v3236_v32 = vld [vmem:[%s2608_s19 + $0x90] sm:$0xff] }
  0x72   : >> { %849 = vmatpush.msra.mxu3 %v2068_v54  ;;  %821 = vmatpush.msra.mxu2 %v2051_v56  ;;  %v2135_v53 = vld [vmem:[%s4293_s1 + $0x750] sm:$0xff]  ;;  %v2120_v56 = vld [vmem:[%s4293_s1 + $0x6d8] sm:$0xff] }
  0x73   : >> { %694 = vmatpush.msra.mxu0 %v2007_v57  ;;  %791 = vmatpush.msra.mxu1 %v2036_v52  ;;  %v2103_v54 = vld [vmem:[%s4293_s1 + $0x650] sm:$0xff]  ;;  %v2134_v52 = vld [vmem:[%s4293_s1 + $0x748] sm:$0xff] }
  0x74   : >> { %850 = vmatpush.msra.mxu3 %v2067_v61  ;;  %822 = vmatpush.msra.mxu2 %v2050_v62  ;;  %v2157_v57 = vld [vmem:[%s4293_s1 + $0x7d0] sm:$0xff]  ;;  %v2156_v62 = vld [vmem:[%s4293_s1 + $0x7c8] sm:$0xff] }
  0x75   : >> { %695 = vmatpush.msra.mxu0 %v2006_v63  ;;  %792 = vmatpush.msra.mxu1 %v2035_v1  ;;  %v2119_v61 = vld [vmem:[%s4293_s1 + $0x6d0] sm:$0xff]  ;;  %v2101_v63 = vld [vmem:[%s4293_s1 + $0x640] sm:$0xff]  ;;  %v2118_v1 = vld [vmem:[%s4293_s1 + $0x6c8] sm:$0xff] }
  0x76   : >> { %851 = vmatpush.msra.mxu3 %v2066_v2  ;;  %492 = vmatmul.f32.gmra.mxu0 %v2804_v59  ;;  %v2004_v59 = vld [vmem:[%s4293_s1 + $0x410] sm:$0xff]  ;;  %v2155_v2 = vld [vmem:[%s4293_s1 + $0x7c0] sm:$0xff] }
  0x77   : >> { %651 = vmatmul.f32.gmra.mxu2 %v609_v3  ;;  %680 = vmatmul.f32.gmra.mxu3 %v611_v5  ;;  %v607_v3 = vsel %vm586_vm1, %v600_v37, %v606_v58  ;;  %v3278_v5 = vld [vmem:[%s2608_s19 + $0xb0] sm:$0xff] }
  0x78   : >> { %823 = vmatpush.msra.mxu2 %v2049_v6  ;;  %696 = vmatpush.msra.mxu0 %v2005_v7  ;;  %v3281_v6 = vld [vmem:[%s2608_s19 + $0xb8] sm:$0xff]  ;;  %v2095_v37 = vld [vmem:[%s4293_s1 + $0x610] sm:$0xff] }
  0x79   : >> { %793 = vmatpush.msra.mxu1 %v2034_v8  ;;  %852 = vmatpush.msra.mxu3 %v2065_v9  ;;  %v2132_v7 = vld [vmem:[%s4293_s1 + $0x738] sm:$0xff]  ;;  %v2117_v9 = vld [vmem:[%s4293_s1 + $0x6c0] sm:$0xff] }
  0x7a   : >> { %521 = vmatmul.f32.gmra.mxu1 %v2781_v48  ;;  %824 = vmatpush.msra.mxu2 %v2048_v11  ;;  %v2133_v48 = vld [vmem:[%s4293_s1 + $0x740] sm:$0xff]  ;;  %v2100_v8 = vld [vmem:[%s4293_s1 + $0x638] sm:$0xff]  ;;  %v530_v11 = vld [vmem:[%s2608_s19 + $0x70] sm:$0x3] }
  0x7b   : >> { %697 = vmatpush.msra.mxu0 %v2004_v59  ;;  %794 = vmatpush.msra.mxu1 %v2033_v12  ;;  %v3299_v59 = vld [vmem:[%s2608_s19 + $0xa8] sm:$0xff]  ;;  %v2131_v12 = vld [vmem:[%s4293_s1 + $0x730] sm:$0xff] }
  0x7c   : >> { %853 = vmatpush.msra.mxu3 %v2064_v13  ;;  %825 = vmatpush.msra.mxu2 %v2047_v14  ;;  %v2099_v13 = vld [vmem:[%s4293_s1 + $0x630] sm:$0xff]  ;;  %v2116_v14 = vld [vmem:[%s4293_s1 + $0x6b8] sm:$0xff] }
  0x7d   : >> { %698 = vmatpush.msra.mxu0 %v2003_v17  ;;  %795 = vmatpush.msra.mxu1 %v2032_v18  ;;  %v612_v17 = vrot.slane %v530_v11, 2  ;;  %v2098_v18 = vld [vmem:[%s4293_s1 + $0x628] sm:$0xff]  ;;  %v2237_v11 = vld [vmem:[%s4293_s1 + $0x9f0] sm:$0xff] }
  0x7e   : >> { %854 = vmatpush.msra.mxu3 %v2063_v20  ;;  %826 = vmatpush.msra.mxu2 %v2046_v55  ;;  %v2115_v20 = vld [vmem:[%s4293_s1 + $0x6b0] sm:$0xff]  ;;  %v2152_v55 = vld [vmem:[%s4293_s1 + $0x7a8] sm:$0xff] }
  0x7f   : >> { %699 = vmatpush.msra.mxu0 %v2002_v19  ;;  %796 = vmatpush.msra.mxu1 %v2031_v21  ;;  %v2129_v19 = vld [vmem:[%s4293_s1 + $0x720] sm:$0xff] }
  0x80   : >> { %855 = vmatpush.msra.mxu3 %v2062_v22  ;;  %700 = vmatmul.f32.vlgmr.msra.gmra.mxu0 %v595_v24  ;;  %v2097_v21 = vld [vmem:[%s4293_s1 + $0x620] sm:$0xff]  ;;  %v2114_v22 = vld [vmem:[%s4293_s1 + $0x6a8] sm:$0xff] }
  0x81   : >> { %827 = vmatmul.f32.vlgmr.msra.gmra.mxu2 %v2019_v25  ;;  %856 = vmatmul.f32.vlgmr.msra.gmra.mxu3 %v2020_v26  ;;  %v2151_v24 = vld [vmem:[%s4293_s1 + $0x7a0] sm:$0xff]  ;;  %v613_v25 = vsel %vm586_vm1, %v606_v58, %v612_v17  ;;  %v3340_v26 = vld [vmem:[%s2608_s19 + $0xc8] sm:$0xff]  ;;  %v1152_v17 = vrot.slane %v3299_v59, 2 }
  0x82   : >> { %1049 = vmatpush.msrb.mxu2 %v2140_v27  ;;  %797 = vmatpush.msra.mxu1 %v2030_v28  ;;  %v3343_v27 = vld [vmem:[%s2608_s19 + $0xd0] sm:$0xff]  ;;  %v2128_v28 = vld [vmem:[%s4293_s1 + $0x718] sm:$0xff] }
  0x83   : >> { %991 = vmatpush.msrb.mxu0 %v2108_v4  ;;  %1182 = vmatpush.msrb.mxu3 %v2162_v29  ;;  %v2096_v4 = vld [vmem:[%s4293_s1 + $0x618] sm:$0xff]  ;;  %v2113_v29 = vld [vmem:[%s4293_s1 + $0x6a0] sm:$0xff] }
  0x84   : >> { %798 = vmatmul.f32.vlgmr.msra.gmra.mxu1 %v2018_v30  ;;  %1050 = vmatpush.msrb.mxu2 %v2139_v31  ;;  %v2150_v30 = vld [vmem:[%s4293_s1 + $0x798] sm:$0xff]  ;;  %v3358_v31 = vld [vmem:[%s2608_s19 + $0xc0] sm:$0xff] }
  0x85   : >> { %992 = vmatpush.msrb.mxu0 %v2107_v33  ;;  %1020 = vmatpush.msrb.mxu1 %v2124_v34  ;;  %v2078_v33 = vld [vmem:[%s2608_s19 + $0x78] sm:$0xfe]  ;;  %v2127_v34 = vld [vmem:[%s4293_s1 + $0x710] sm:$0xff] }
  0x86   : >> { %1183 = vmatpush.msrb.mxu3 %v2161_v35  ;;  %1051 = vmatpush.msrb.mxu2 %v2138_v36  ;;  %v2080_v35 = vld [vmem:[%s2608_s19 + $0x88] sm:$0xfe]  ;;  %v2141_v36 = vld [vmem:[%s2608_s19 + $0x78] sm:$0xfc] }
  0x87   : >> { %993 = vmatpush.msrb.mxu0 %v2106_v38  ;;  %1021 = vmatpush.msrb.mxu1 %v2123_v39  ;;  %v2112_v38 = vld [vmem:[%s4293_s1 + $0x698] sm:$0xff]  ;;  %v2149_v39 = vld [vmem:[%s4293_s1 + $0x790] sm:$0xff] }
  0x88   : >> { %1184 = vmatpush.msrb.mxu3 %v2160_v45  ;;  %1052 = vmatpush.msrb.mxu2 %v2137_v23  ;;  %v2126_v45 = vld [vmem:[%s4293_s1 + $0x708] sm:$0xff] }
  0x89   : >> { %994 = vmatpush.msrb.mxu0 %v2105_v40  ;;  %1022 = vmatpush.msrb.mxu1 %v2122_v41  ;;  %v2094_v23 = vld [vmem:[%s4293_s1 + $0x608] sm:$0xff]  ;;  %v2111_v40 = vld [vmem:[%s4293_s1 + $0x690] sm:$0xff]  ;;  %v952_v41 = vrot.slane %v2078_v33, 1 }
  0x8a   : >> { %1185 = vmatpush.msrb.mxu3 %v2159_v42  ;;  %703 = vmatmul.f32.gmra.mxu0 %v601_v43  ;;  %v953_v42 = vrot.slane %v3236_v32, 1  ;;  %v958_v43 = vrot.slane %v2080_v35, 1 }
  0x8b   : >> { %830 = vmatmul.f32.gmra.mxu2 %v3216_v44  ;;  %859 = vmatmul.f32.gmra.mxu3 %v3219_v46 }
  0x8c   : >> { %1053 = vmatpush.msrb.mxu2 %v2136_v47  ;;  %995 = vmatpush.msrb.mxu0 %v2104_v49  ;;  %v959_v47 = vrot.slane %v3219_v46, 1  ;;  %v1143_v49 = vrot.slane %v2141_v36, 2  ;;  %v954_v58 = vsel %vm311_vm0, %v952_v41, %v953_v42  ;;  %v2217_v36 = vld [vmem:[%s4293_s1 + $0x950] sm:$0xff]  ;;  %v967_v41 = vrot.slane %v3358_v31, 1 }
  0x8d   : >> { %1023 = vmatpush.msrb.mxu1 %v2121_v50  ;;  %1186 = vmatpush.msrb.mxu3 %v2158_v51  ;;  %v1144_v50 = vrot.slane %v3236_v32, 2  ;;  %v2079_v51 = vld [vmem:[%s2608_s19 + $0x80] sm:$0xfe] }
  0x8e   : >> { %801 = vmatmul.f32.gmra.mxu1 %v3236_v32  ;;  %1054 = vmatpush.msrb.mxu2 %v2135_v53  ;;  %v2148_v53 = vld [vmem:[%s4293_s1 + $0x788] sm:$0xff]  ;;  %v2191_v32 = vld [vmem:[%s4293_s1 + $0x8e0] sm:$0xff] }
  0x8f   : >> { %996 = vmatpush.msrb.mxu0 %v2103_v54  ;;  %1024 = vmatpush.msrb.mxu1 %v2120_v56  ;;  %v2125_v54 = vld [vmem:[%s4293_s1 + $0x700] sm:$0xff] }
  0x90   : >> { %1187 = vmatpush.msrb.mxu3 %v2157_v57  ;;  %1055 = vmatpush.msrb.mxu2 %v2134_v52  ;;  %v2093_v56 = vld [vmem:[%s4293_s1 + $0x600] sm:$0xff]  ;;  %v2110_v57 = vld [vmem:[%s4293_s1 + $0x688] sm:$0xff] }
  0x91   : >> { %997 = vmatpush.msrb.mxu0 %v2102_v60  ;;  %1025 = vmatpush.msrb.mxu1 %v2119_v61  ;;  %v2147_v52 = vld [vmem:[%s4293_s1 + $0x780] sm:$0xff]  ;;  %v955_v60 = vrot.slane %v2079_v51, 1  ;;  %v956_v61 = vrot.slane %v3216_v44, 1 }
  0x92   : >> { %1188 = vmatpush.msrb.mxu3 %v2156_v62  ;;  %1056 = vmatpush.msrb.mxu2 %v2133_v48  ;;  %v960_v62 = vsel %vm311_vm0, %v958_v43, %v959_v47  ;;  %v1145_v48 = vsel %vm586_vm1, %v1143_v49, %v1144_v50  ;;  %v2189_v43 = vld [vmem:[%s4293_s1 + $0x8d0] sm:$0xff]  ;;  %v1158_v49 = vrot.slane %v3358_v31, 2  ;;  %v2215_v51 = vld [vmem:[%s4293_s1 + $0x940] sm:$0xff] }
  0x93   : >> { %998 = vmatpush.msrb.mxu0 %v2101_v63  ;;  %1026 = vmatpush.msrb.mxu1 %v2118_v1  ;;  %v2222_v63 = vld [vmem:[%s4293_s1 + $0x978] sm:$0xff]  ;;  %v2109_v1 = vld [vmem:[%s4293_s1 + $0x680] sm:$0xff] }
  0x94   : >> { %1189 = vmatpush.msrb.mxu3 %v2155_v2  ;;  %706 = vmatmul.f32.gmra.mxu0 %v607_v3  ;;  %v2178_v2 = vld [vmem:[%s4293_s1 + $0x878] sm:$0xff] }
  0x95   : >> { %833 = vmatmul.f32.gmra.mxu2 %v3278_v5  ;;  %862 = vmatmul.f32.gmra.mxu3 %v3281_v6  ;;  %v2238_v3 = vld [vmem:[%s4293_s1 + $0x9f8] sm:$0xff] }
  0x96   : >> { %1057 = vmatpush.msrb.mxu2 %v2132_v7  ;;  %999 = vmatpush.msrb.mxu0 %v2100_v8  ;;  %v957_v7 = vsel %vm311_vm0, %v955_v60, %v956_v61  ;;  %v2221_v8 = vld [vmem:[%s4293_s1 + $0x970] sm:$0xff] }
  0x97   : >> { %1027 = vmatpush.msrb.mxu1 %v2117_v9  ;;  %1190 = vmatpush.msrb.mxu3 %v2154_v10  ;;  %v2177_v9 = vld [vmem:[%s4293_s1 + $0x870] sm:$0xff]  ;;  %v2194_v10 = vld [vmem:[%s4293_s1 + $0x8f8] sm:$0xff] }
  0x98   : >> { %804 = vmatmul.f32.gmra.mxu1 %v3299_v59  ;;  %1058 = vmatpush.msrb.mxu2 %v2131_v12  ;;  %v2220_v12 = vld [vmem:[%s4293_s1 + $0x968] sm:$0xff] }
  0x99   : >> { %1000 = vmatpush.msrb.mxu0 %v2099_v13  ;;  %1028 = vmatpush.msrb.mxu1 %v2116_v14  ;;  %v961_v13 = vrot.slane %v3299_v59, 1  ;;  %v2176_v14 = vld [vmem:[%s4293_s1 + $0x868] sm:$0xff]  ;;  %v2187_v59 = vld [vmem:[%s4293_s1 + $0x8c0] sm:$0xff] }
  0x9a   : >> { %1191 = vmatpush.msrb.mxu3 %v2153_v15  ;;  %1059 = vmatpush.msrb.mxu2 %v2130_v16  ;;  %v2193_v15 = vld [vmem:[%s4293_s1 + $0x8f0] sm:$0xff]  ;;  %v965_v16 = vrot.slane %v3281_v6, 1 }
  0x9b   : >> { %1001 = vmatpush.msrb.mxu0 %v2098_v18  ;;  %1029 = vmatpush.msrb.mxu1 %v2115_v20  ;;  %v2236_v18 = vld [vmem:[%s4293_s1 + $0x9e8] sm:$0xff]  ;;  %v2219_v20 = vld [vmem:[%s4293_s1 + $0x960] sm:$0xff]  ;;  %v968_v60 = vsel %vm311_vm0, %v961_v13, %v967_v41 }
  0x9c   : >> { %1192 = vmatpush.msrb.mxu3 %v2152_v55  ;;  %1060 = vmatpush.msrb.mxu2 %v2129_v19  ;;  %v2175_v19 = vld [vmem:[%s4293_s1 + $0x860] sm:$0xff] }
  0x9d   : >> { %1002 = vmatpush.msrb.mxu0 %v2097_v21  ;;  %1030 = vmatpush.msrb.mxu1 %v2114_v22  ;;  %v2192_v21 = vld [vmem:[%s4293_s1 + $0x8e8] sm:$0xff]  ;;  %v2235_v22 = vld [vmem:[%s4293_s1 + $0x9e0] sm:$0xff] }
  0x9e   : >> { %1193 = vmatpush.msrb.mxu3 %v2151_v24  ;;  %709 = vmatmul.f32.gmra.mxu0 %v613_v25  ;;  %v962_v24 = vsel %vm311_vm0, %v953_v42, %v961_v13  ;;  %v963_v25 = vrot.slane %v3278_v5, 1  ;;  %v2172_v42 = vld [vmem:[%s4293_s1 + $0x848] sm:$0xff]  ;;  %v2213_v13 = vld [vmem:[%s4293_s1 + $0x930] sm:$0xff] }
  0x9f   : >> { %836 = vmatmul.f32.gmra.mxu2 %v3340_v26  ;;  %865 = vmatmul.f32.gmra.mxu3 %v3343_v27 }
  0xa0   : >> { %1061 = vmatpush.msrb.mxu2 %v2128_v28  ;;  %1003 = vmatpush.msrb.mxu0 %v2096_v4  ;;  %v966_v28 = vsel %vm311_vm0, %v959_v47, %v965_v16  ;;  %v1153_v4 = vsel %vm586_vm1, %v1144_v50, %v1152_v17  ;;  %v964_v35 = vsel %vm311_vm0, %v956_v61, %v963_v25  ;;  %v971_v47 = vrot.slane %v3343_v27, 1  ;;  %v2232_v50 = vld [vmem:[%s4293_s1 + $0x9c8] sm:$0xff] }
  0xa1   : >> { %1031 = vmatpush.msrb.mxu1 %v2113_v29  ;;  %1194 = vmatpush.msrb.mxu3 %v2150_v30  ;;  %v2218_v29 = vld [vmem:[%s4293_s1 + $0x958] sm:$0xff]  ;;  %v969_v61 = vrot.slane %v3340_v26, 1 }
  0xa2   : >> { %807 = vmatmul.f32.gmra.mxu1 %v3358_v31  ;;  %1062 = vmatpush.msrb.mxu2 %v2127_v34  ;;  %v2174_v30 = vld [vmem:[%s4293_s1 + $0x858] sm:$0xff]  ;;  %v2183_v31 = vld [vmem:[%s4293_s1 + $0x8a0] sm:$0xff] }
  0xa3   : >> { %1004 = vmatpush.msrb.mxu0 %v2095_v37  ;;  %1032 = vmatpush.msrb.mxu1 %v2112_v38  ;;  %v2234_v34 = vld [vmem:[%s4293_s1 + $0x9d8] sm:$0xff]  ;;  %v2173_v37 = vld [vmem:[%s4293_s1 + $0x850] sm:$0xff] }
  0xa4   : >> { %1195 = vmatpush.msrb.mxu3 %v2149_v39  ;;  %1063 = vmatpush.msrb.mxu2 %v2126_v45  ;;  %v2190_v38 = vld [vmem:[%s4293_s1 + $0x8d8] sm:$0xff] }
  0xa5   : >> { %1005 = vmatpush.msrb.mxu0 %v2094_v23  ;;  %1033 = vmatpush.msrb.mxu1 %v2111_v40  ;;  %v2233_v23 = vld [vmem:[%s4293_s1 + $0x9d0] sm:$0xff]  ;;  %v2216_v40 = vld [vmem:[%s4293_s1 + $0x948] sm:$0xff] }
  0xa6   : >> { %1196 = vmatpush.msrb.mxu3 %v2148_v53  ;;  %1064 = vmatpush.msrb.mxu2 %v2125_v54  ;;  %v1147_v53 = vrot.slane %v3216_v44, 2  ;;  %v2254_v44 = vld [vmem:[%s4293_s1 + $0xa78] sm:$0xff] }
  0xa7   : >> { %1006 = vmatpush.msrb.mxu0 %v2093_v56  ;;  %1034 = vmatpush.msrb.mxu1 %v2110_v57  ;;  %v1154_v56 = vrot.slane %v3278_v5, 2  ;;  %v2171_v57 = vld [vmem:[%s4293_s1 + $0x840] sm:$0xff]  ;;  %v2210_v5 = vld [vmem:[%s4293_s1 + $0x918] sm:$0xff] }
  0xa8   : >> { %1197 = vmatpush.msrb.mxu3 %v2147_v52  ;;  %1007 = vmatmul.f32.vlgmr.msrb.gmra.mxu0 %v954_v58  ;;  %v2188_v52 = vld [vmem:[%s4293_s1 + $0x8c8] sm:$0xff]  ;;  %v2231_v58 = vld [vmem:[%s4293_s1 + $0x9c0] sm:$0xff] }
  0xa9   : >> { %1065 = vmatmul.f32.vlgmr.msrb.gmra.mxu2 %v960_v62  ;;  %1198 = vmatmul.f32.vlgmr.msrb.gmra.mxu3 %v1145_v48  ;;  %v3561_v62 = vsel %vm586_vm1, %v1147_v53, %v1154_v56  ;;  %v972_v48 = vsel %vm311_vm0, %v965_v16, %v971_v47  ;;  %v2169_v16 = vld [vmem:[%s4293_s1 + $0x830] sm:$0xff] }
  0xaa   : >> { %1338 = vmatpush.msra.mxu2 %v2222_v63  ;;  %1035 = vmatpush.msrb.mxu1 %v2109_v1  ;;  %v1159_v63 = vsel %vm586_vm1, %v1152_v17, %v1158_v49  ;;  %v1150_v1 = vrot.slane %v3219_v46, 2  ;;  %v2186_v17 = vld [vmem:[%s4293_s1 + $0x8b8] sm:$0xff]  ;;  %v2253_v46 = vld [vmem:[%s4293_s1 + $0xa70] sm:$0xff] }
  0xab   : >> { %1211 = vmatpush.msra.mxu0 %v2178_v2  ;;  %1367 = vmatpush.msra.mxu3 %v2238_v3  ;;  %v1156_v2 = vrot.slane %v3281_v6, 2  ;;  %v2214_v3 = vld [vmem:[%s4293_s1 + $0x938] sm:$0xff]  ;;  %v2165_v6 = vld [vmem:[%s4293_s1 + $0x810] sm:$0xff] }
  0xac   : >> { %1036 = vmatmul.f32.vlgmr.msrb.gmra.mxu1 %v957_v7  ;;  %1339 = vmatpush.msra.mxu2 %v2221_v8  ;;  %v2170_v7 = vld [vmem:[%s4293_s1 + $0x838] sm:$0xff] }
  0xad   : >> { %1212 = vmatpush.msra.mxu0 %v2177_v9  ;;  %1240 = vmatpush.msra.mxu1 %v2194_v10  ;;  %v3459_v55 = vpop.f32.mrf.mxu0  ;;  %v2230_v9 = vld [vmem:[%s4293_s1 + $0x9b8] sm:$0xff] }
  0xae   : >> { %1368 = vmatpush.msra.mxu3 %v2237_v11  ;;  %1340 = vmatpush.msra.mxu2 %v2220_v12  ;;  %v2090_v10 = vld [vmem:[%s2608_s19 + $0xd8] sm:$0x1]  ;;  %v3595_v11 = vsel %vm586_vm1, %v1150_v1, %v1156_v2  ;;  %v970_v12 = vsel %vm311_vm0, %v963_v25, %v969_v61  ;;  %v2185_v25 = vld [vmem:[%s4293_s1 + $0x8b0] sm:$0xff] }
  0xaf   : >> { %1213 = vmatpush.msra.mxu0 %v2176_v14  ;;  %1241 = vmatpush.msra.mxu1 %v2193_v15  ;;  %v2092_v14 = vld [vmem:[%s2608_s19 + $0xe8] sm:$0x1]  ;;  %v2144_v15 = vld [vmem:[%s2608_s19 + $0xd8] sm:$0x3] }
  0xb0   : >> { %1369 = vmatpush.msra.mxu3 %v2236_v18  ;;  %1341 = vmatpush.msra.mxu2 %v2219_v20 }
  0xb1   : >> { %1214 = vmatpush.msra.mxu0 %v2175_v19  ;;  %1242 = vmatpush.msra.mxu1 %v2192_v21  ;;  %v3492_v33 = vpop.f32.mrf.mxu1  ;;  %v2229_v19 = vld [vmem:[%s4293_s1 + $0x9b0] sm:$0xff]  ;;  %v2212_v21 = vld [vmem:[%s4293_s1 + $0x928] sm:$0xff] }
  0xb2   : >> { %1370 = vmatpush.msra.mxu3 %v2235_v22  ;;  %1010 = vmatmul.f32.gmra.mxu0 %v962_v24  ;;  %v973_v22 = vrot.slane %v2090_v10, 1  ;;  %v2168_v24 = vld [vmem:[%s4293_s1 + $0x828] sm:$0xff] }
  0xb3   : >> { %1068 = vmatmul.f32.gmra.mxu2 %v966_v28  ;;  %1201 = vmatmul.f32.gmra.mxu3 %v1153_v4  ;;  %v977_v28 = vrot.slane %v2092_v14, 1  ;;  %v1164_v4 = vrot.slane %v2144_v15, 2  ;;  %v2224_v10 = vld [vmem:[%s4293_s1 + $0x988] sm:$0xff]  ;;  %v398_v14 = vadd.f32 %v3492_v33, %v3459_v55  ;;  %v2163_v15 = vld [vmem:[%s4293_s1 + $0x800] sm:$0xff]  ;;  %v2195_v55 = vld [vmem:[%s2608_s19 + $0xf0] sm:$0xff] }
  0xb4   : >> { %1342 = vmatpush.msra.mxu2 %v2218_v29  ;;  %1215 = vmatpush.msra.mxu0 %v2174_v30  ;;  %v3512_v39 = vpop.f32.mrf.mxu2  ;;  %v3514_v45 = vpop.f32.mrf.mxu3  ;;  %v2091_v29 = vld [vmem:[%s2608_s19 + $0xe0] sm:$0x1]  ;;  %v2228_v30 = vld [vmem:[%s4293_s1 + $0x9a8] sm:$0xff]  ;;  %v2196_v33 = vld [vmem:[%s2608_s19 + $0xf8] sm:$0xff] }
  0xb5   : >> { %1243 = vmatpush.msra.mxu1 %v2191_v32  ;;  %1371 = vmatpush.msra.mxu3 %v2234_v34  ;;  %v2211_v32 = vld [vmem:[%s4293_s1 + $0x920] sm:$0xff] }
  0xb6   : >> { %1039 = vmatmul.f32.gmra.mxu1 %v964_v35  ;;  %1343 = vmatpush.msra.mxu2 %v2217_v36  ;;  %v1160_v35 = vrot.slane %v3340_v26, 2  ;;  %v2167_v36 = vld [vmem:[%s4293_s1 + $0x820] sm:$0xff]  ;;  %v2289_v26 = vld [vmem:[%s4293_s1 + $0xb18] sm:$0xff] }
  0xb7   : >> { %1216 = vmatpush.msra.mxu0 %v2173_v37  ;;  %1244 = vmatpush.msra.mxu1 %v2190_v38  ;;  %v3538_v54 = vpop.f32.mrf.mxu0  ;;  %v2184_v37 = vld [vmem:[%s4293_s1 + $0x8a8] sm:$0xff]  ;;  %v2227_v38 = vld [vmem:[%s4293_s1 + $0x9a0] sm:$0xff] }
  0xb8   : >> { %1372 = vmatpush.msra.mxu3 %v2233_v23  ;;  %1344 = vmatpush.msra.mxu2 %v2216_v40  ;;  %v974_v23 = vsel %vm311_vm0, %v967_v41, %v973_v22  ;;  %v975_v40 = vrot.slane %v2091_v29, 1  ;;  %v1162_v41 = vrot.slane %v3343_v27, 2  ;;  %v2301_v22 = vld [vmem:[%s4293_s1 + $0xb78] sm:$0xff]  ;;  %v2300_v29 = vld [vmem:[%s4293_s1 + $0xb70] sm:$0xff] }
  0xb9   : >> { %1217 = vmatpush.msra.mxu0 %v2172_v42  ;;  %1245 = vmatpush.msra.mxu1 %v2189_v43  ;;  %v3656_v42 = vsel %vm586_vm1, %v1154_v56, %v1160_v35  ;;  %v978_v43 = vsel %vm311_vm0, %v971_v47, %v977_v28  ;;  %v2226_v47 = vld [vmem:[%s4293_s1 + $0x998] sm:$0xff]  ;;  %v427_v28 = vadd.f32 %v3512_v39, %v398_v14  ;;  %v2248_v14 = vld [vmem:[%s4293_s1 + $0xa48] sm:$0xff]  ;;  %v2241_v27 = vld [vmem:[%s4293_s1 + $0xa10] sm:$0xff] }
  0xba   : >> { %1373 = vmatpush.msra.mxu3 %v2232_v50  ;;  %1345 = vmatpush.msra.mxu2 %v2215_v51  ;;  %v1165_v50 = vsel %vm586_vm1, %v1158_v49, %v1164_v4  ;;  %v2166_v51 = vld [vmem:[%s4293_s1 + $0x818] sm:$0xff]  ;;  %v2142_v49 = vld [vmem:[%s2608_s19 + $0x80] sm:$0xfc] }
  0xbb   : >> { %1218 = vmatpush.msra.mxu0 %v2171_v57  ;;  %1246 = vmatpush.msra.mxu1 %v2188_v52  ;;  %v3581_v8 = vpop.f32.mrf.mxu1  ;;  %v3685_v57 = vsel %vm586_vm1, %v1156_v2, %v1162_v41  ;;  %v976_v52 = vsel %vm311_vm0, %v969_v61, %v975_v40  ;;  %v2225_v61 = vld [vmem:[%s4293_s1 + $0x990] sm:$0xff]  ;;  %v2208_v2 = vld [vmem:[%s4293_s1 + $0x908] sm:$0xff]  ;;  %v2285_v39 = vld [vmem:[%s4293_s1 + $0xaf8] sm:$0xff] }
  0xbc   : >> { %1374 = vmatpush.msra.mxu3 %v2231_v58  ;;  %1013 = vmatmul.f32.gmra.mxu0 %v968_v60  ;;  %v2209_v58 = vld [vmem:[%s4293_s1 + $0x910] sm:$0xff]  ;;  %v2182_v60 = vld [vmem:[%s4293_s1 + $0x898] sm:$0xff]  ;;  %v2252_v40 = vld [vmem:[%s4293_s1 + $0xa68] sm:$0xff] }
  0xbd   : >> { %1071 = vmatmul.f32.gmra.mxu2 %v972_v48  ;;  %1204 = vmatmul.f32.gmra.mxu3 %v1159_v63 }
  0xbe   : >> { %1346 = vmatpush.msra.mxu2 %v2214_v3  ;;  %1219 = vmatpush.msra.mxu0 %v2170_v7  ;;  %v3613_v18 = vpop.f32.mrf.mxu2  ;;  %v3615_v20 = vpop.f32.mrf.mxu3  ;;  %v1146_v3 = vrot.slane %v2142_v49, 2  ;;  %v2143_v7 = vld [vmem:[%s2608_s19 + $0x88] sm:$0xfc] }
  0xbf   : >> { %1247 = vmatpush.msra.mxu1 %v2187_v59  ;;  %1375 = vmatpush.msra.mxu3 %v2230_v9  ;;  %v2164_v59 = vld [vmem:[%s4293_s1 + $0x808] sm:$0xff]  ;;  %v2181_v9 = vld [vmem:[%s4293_s1 + $0x890] sm:$0xff] }
  0xc0   : >> { %1042 = vmatmul.f32.gmra.mxu1 %v970_v12  ;;  %1347 = vmatpush.msra.mxu2 %v2213_v13  ;;  %v2207_v12 = vld [vmem:[%s4293_s1 + $0x900] sm:$0xff]  ;;  %v3790_v49 = vld [vmem:[%s2608_s19 + $0x108] sm:$0xff] }
  0xc1   : >> { %1220 = vmatpush.msra.mxu0 %v2169_v16  ;;  %1248 = vmatpush.msra.mxu1 %v2186_v17  ;;  %v3636_v34 = vpop.f32.mrf.mxu0  ;;  %v2180_v16 = vld [vmem:[%s4293_s1 + $0x888] sm:$0xff]  ;;  %v1149_v17 = vrot.slane %v2143_v7, 2 }
  0xc2   : >> { %1376 = vmatpush.msra.mxu3 %v2229_v19  ;;  %1348 = vmatpush.msra.mxu2 %v2212_v21  ;;  %v2223_v19 = vld [vmem:[%s4293_s1 + $0x980] sm:$0xff]  ;;  %v1148_v21 = vsel %vm586_vm1, %v1146_v3, %v1147_v53 }
  0xc3   : >> { %1221 = vmatpush.msra.mxu0 %v2168_v24  ;;  %1249 = vmatpush.msra.mxu1 %v2185_v25  ;;  %v2179_v24 = vld [vmem:[%s4293_s1 + $0x880] sm:$0xff]  ;;  %v1151_v53 = vsel %vm586_vm1, %v1149_v17, %v1150_v1 }
  0xc4   : >> { %1377 = vmatpush.msra.mxu3 %v2228_v30  ;;  %1349 = vmatpush.msra.mxu2 %v2211_v32  ;;  %v2317_v30 = vld [vmem:[%s4293_s1 + $0xbf8] sm:$0xff]  ;;  %v2294_v17 = vld [vmem:[%s4293_s1 + $0xb40] sm:$0xff] }
  0xc5   : >> { %1222 = vmatpush.msra.mxu0 %v2167_v36  ;;  %1250 = vmatpush.msra.mxu1 %v2184_v37  ;;  %v3671_v56 = vpop.f32.mrf.mxu1  ;;  %v2299_v36 = vld [vmem:[%s4293_s1 + $0xb68] sm:$0xff]  ;;  %v2316_v37 = vld [vmem:[%s4293_s1 + $0xbf0] sm:$0xff] }
  0xc6   : >> { %1378 = vmatpush.msra.mxu3 %v2227_v38  ;;  %1016 = vmatmul.f32.gmra.mxu0 %v974_v23  ;;  %v456_v23 = vadd.f32 %v3514_v45, %v427_v28  ;;  %v2315_v45 = vld [vmem:[%s4293_s1 + $0xbe8] sm:$0xff]  ;;  %v2145_v28 = vld [vmem:[%s2608_s19 + $0xe0] sm:$0x3] }
  0xc7   : >> { %1074 = vmatmul.f32.gmra.mxu2 %v978_v43  ;;  %1207 = vmatmul.f32.gmra.mxu3 %v1165_v50  ;;  %v2284_v43 = vld [vmem:[%s4293_s1 + $0xaf0] sm:$0xff]  ;;  %v2298_v50 = vld [vmem:[%s4293_s1 + $0xb60] sm:$0xff] }
  0xc8   : >> { %1350 = vmatpush.msra.mxu2 %v2210_v5  ;;  %1223 = vmatpush.msra.mxu0 %v2166_v51  ;;  %v3699_v48 = vpop.f32.mrf.mxu2  ;;  %v3701_v63 = vpop.f32.mrf.mxu3 }
  0xc9   : >> { %1251 = vmatpush.msra.mxu1 %v2183_v31  ;;  %1379 = vmatpush.msra.mxu3 %v2226_v47  ;;  %v401_v31 = vadd.f32 %v3581_v8, %v3538_v54  ;;  %v2251_v47 = vld [vmem:[%s4293_s1 + $0xa60] sm:$0xff]  ;;  %v2297_v54 = vld [vmem:[%s4293_s1 + $0xb58] sm:$0xff] }
  0xca   : >> { %1045 = vmatmul.f32.gmra.mxu1 %v976_v52  ;;  %1351 = vmatpush.msra.mxu2 %v2209_v58  ;;  %v3793_v58 = vld [vmem:[%s2608_s19 + $0x110] sm:$0xff]  ;;  %v2250_v8 = vld [vmem:[%s4293_s1 + $0xa58] sm:$0xff] }
  0xcb   : >> { %1224 = vmatpush.msra.mxu0 %v2165_v6  ;;  %1252 = vmatpush.msra.mxu1 %v2182_v60  ;;  %v377_v13 = vpop.f32.mrf.mxu0  ;;  %v2283_v6 = vld [vmem:[%s4293_s1 + $0xae8] sm:$0xff]  ;;  %v2314_v60 = vld [vmem:[%s4293_s1 + $0xbe0] sm:$0xff]  ;;  %v430_v3 = vadd.f32 %v3613_v18, %v401_v31 }
  0xcc   : >> { %1380 = vmatpush.msra.mxu3 %v2225_v61  ;;  %1352 = vmatpush.msra.mxu2 %v2208_v2  ;;  %v2296_v2 = vld [vmem:[%s4293_s1 + $0xb50] sm:$0xff]  ;;  %v2295_v18 = vld [vmem:[%s4293_s1 + $0xb48] sm:$0xff] }
  0xcd   : >> { %1225 = vmatpush.msra.mxu0 %v2164_v59  ;;  %1253 = vmatpush.msra.mxu1 %v2181_v9  ;;  %v2282_v59 = vld [vmem:[%s4293_s1 + $0xae0] sm:$0xff]  ;;  %v2313_v9 = vld [vmem:[%s4293_s1 + $0xbd8] sm:$0xff] }
  0xce   : >> { %1381 = vmatpush.msra.mxu3 %v2224_v10  ;;  %1353 = vmatpush.msra.mxu2 %v2207_v12 }
  0xcf   : >> { %1226 = vmatpush.msra.mxu0 %v2163_v15  ;;  %1254 = vmatpush.msra.mxu1 %v2180_v16  ;;  %v406_v25 = vpop.f32.mrf.mxu1  ;;  %v459_v16 = vadd.f32 %v3615_v20, %v430_v3  ;;  %v2247_v20 = vld [vmem:[%s4293_s1 + $0xa40] sm:$0xff] }
  0xd0   : >> { %1382 = vmatpush.msra.mxu3 %v2223_v19  ;;  %1227 = vmatmul.f32.vlgmr.msra.gmra.mxu0 %v1148_v21  ;;  %v407_v4 = vadd.f32 %v406_v25, %v377_v13  ;;  %v2281_v13 = vld [vmem:[%s4293_s1 + $0xad8] sm:$0xff]  ;;  %v2280_v19 = vld [vmem:[%s4293_s1 + $0xad0] sm:$0xff]  ;;  %v3859_v25 = vld [vmem:[%s2608_s19 + $0x128] sm:$0xff] }
  0xd1   : >> { %1354 = vmatmul.f32.vlgmr.msra.gmra.mxu2 %v2195_v55  ;;  %1383 = vmatmul.f32.vlgmr.msra.gmra.mxu3 %v2196_v33  ;;  %v404_v55 = vadd.f32 %v3671_v56, %v3636_v34  ;;  %v2311_v33 = vld [vmem:[%s4293_s1 + $0xbc8] sm:$0xff]  ;;  %v2293_v34 = vld [vmem:[%s4293_s1 + $0xb38] sm:$0xff] }
  0xd2   : >> { %1576 = vmatpush.msrb.mxu2 %v2301_v22  ;;  %1255 = vmatpush.msra.mxu1 %v2179_v24  ;;  %v435_v1 = vpop.f32.mrf.mxu2  ;;  %v464_v32 = vpop.f32.mrf.mxu3  ;;  %v3856_v24 = vld [vmem:[%s2608_s19 + $0x120] sm:$0xff]  ;;  %v2246_v56 = vld [vmem:[%s4293_s1 + $0xa38] sm:$0xff] }
  0xd3   : >> { %1396 = vmatpush.msrb.mxu0 %v2254_v44  ;;  %1256 = vmatmul.f32.vlgmr.msra.gmra.mxu1 %v1151_v53  ;;  %v436_v38 = vadd.f32 %v435_v1, %v407_v4  ;;  %v2279_v44 = vld [vmem:[%s4293_s1 + $0xac8] sm:$0xff]  ;;  %v2310_v53 = vld [vmem:[%s4293_s1 + $0xbc0] sm:$0xff]  ;;  %v2309_v1 = vld [vmem:[%s4293_s1 + $0xbb8] sm:$0xff] }
  0xd4   : >> { %1577 = vmatpush.msrb.mxu2 %v2300_v29  ;;  %1605 = vmatpush.msrb.mxu3 %v2317_v30  ;;  %v2292_v29 = vld [vmem:[%s4293_s1 + $0xb30] sm:$0xff] }
  0xd5   : >> { %1397 = vmatpush.msrb.mxu0 %v2253_v46  ;;  %1547 = vmatpush.msrb.mxu1 %v2285_v39  ;;  %v3782_v5 = vadd.f32 %v464_v32, %v436_v38  ;;  %v484_v51 = vpop.f32.mrf.mxu0  ;;  %v2278_v46 = vld [vmem:[%s4293_s1 + $0xac0] sm:$0xff]  ;;  %v2245_v39 = vld [vmem:[%s4293_s1 + $0xa30] sm:$0xff]  ;;  %v1166_v32 = vrot.slane %v2145_v28, 2  ;;  %v2277_v38 = vld [vmem:[%s4293_s1 + $0xab8] sm:$0xff] }
  0xd6   : >> { %1578 = vmatpush.msrb.mxu2 %v2299_v36  ;;  %1606 = vmatpush.msrb.mxu3 %v2316_v37  ;;  %v485_v52 = vadd.f32 %v484_v51, %v456_v23  ;;  %v2244_v23 = vld [vmem:[%s4293_s1 + $0xa28] sm:$0xff]  ;;  %v2276_v51 = vld [vmem:[%s4293_s1 + $0xab0] sm:$0xff] }
  0xd7   : >> { %1398 = vmatpush.msrb.mxu0 %v2252_v40  ;;  %1548 = vmatpush.msrb.mxu1 %v2284_v43  ;;  %v2146_v40 = vld [vmem:[%s2608_s19 + $0xe8] sm:$0x3] }
  0xd8   : >> { %1579 = vmatpush.msrb.mxu2 %v2298_v50  ;;  %1607 = vmatpush.msrb.mxu3 %v2315_v45  ;;  %v2290_v45 = vld [vmem:[%s4293_s1 + $0xb20] sm:$0xff] }
  0xd9   : >> { %1399 = vmatpush.msrb.mxu0 %v2251_v47  ;;  %1357 = vmatmul.f32.gmra.mxu2 %v3790_v49  ;;  %v513_v61 = vpop.f32.mrf.mxu1  ;;  %v2307_v47 = vld [vmem:[%s4293_s1 + $0xba8] sm:$0xff] }
  0xda   : >> { %1230 = vmatmul.f32.gmra.mxu0 %v3561_v62  ;;  %1386 = vmatmul.f32.gmra.mxu3 %v3793_v58  ;;  %v3814_v7 = vadd.f32 %v513_v61, %v485_v52  ;;  %v2249_v62 = vld [vmem:[%s4293_s1 + $0xa50] sm:$0xff]  ;;  %v1167_v52 = vsel %vm586_vm1, %v1160_v35, %v1166_v32  ;;  %v2275_v61 = vld [vmem:[%s4293_s1 + $0xaa8] sm:$0xff]  ;;  %v2242_v35 = vld [vmem:[%s4293_s1 + $0xa18] sm:$0xff] }
  0xdb   : >> { %1549 = vmatpush.msrb.mxu1 %v2283_v6  ;;  %1580 = vmatpush.msrb.mxu2 %v2297_v54  ;;  %v1168_v6 = vrot.slane %v2146_v40, 2  ;;  %v2370_v40 = vld [vmem:[%s4293_s1 + $0xd70] sm:$0xff] }
  0xdc   : >> { %1400 = vmatpush.msrb.mxu0 %v2250_v8  ;;  %1608 = vmatpush.msrb.mxu3 %v2314_v60  ;;  %v643_v10 = vpop.f32.mrf.mxu2  ;;  %v672_v12 = vpop.f32.mrf.mxu3  ;;  %v3925_v8 = vld [vmem:[%s2608_s19 + $0x138] sm:$0xff]  ;;  %v3928_v60 = vld [vmem:[%s2608_s19 + $0x140] sm:$0xff] }
  0xdd   : >> { %1259 = vmatmul.f32.gmra.mxu1 %v3595_v11  ;;  %1581 = vmatpush.msrb.mxu2 %v2296_v2  ;;  %v3835_v15 = vadd.f32 %v672_v12, %v643_v10  ;;  %v2312_v11 = vld [vmem:[%s4293_s1 + $0xbd0] sm:$0xff]  ;;  %v2306_v2 = vld [vmem:[%s4293_s1 + $0xba0] sm:$0xff]  ;;  %v2287_v12 = vld [vmem:[%s4293_s1 + $0xb08] sm:$0xff] }
  0xde   : >> { %1550 = vmatpush.msrb.mxu1 %v2282_v59  ;;  %1401 = vmatpush.msrb.mxu0 %v2249_v62  ;;  %v1169_v59 = vsel %vm586_vm1, %v1162_v41, %v1168_v6  ;;  %v2288_v62 = vld [vmem:[%s4293_s1 + $0xb10] sm:$0xff]  ;;  %v2274_v10 = vld [vmem:[%s4293_s1 + $0xaa0] sm:$0xff]  ;;  %v2305_v41 = vld [vmem:[%s4293_s1 + $0xb98] sm:$0xff] }
  0xdf   : >> { %1609 = vmatpush.msrb.mxu3 %v2313_v9  ;;  %1582 = vmatpush.msrb.mxu2 %v2295_v18  ;;  %v487_v21 = vpop.f32.mrf.mxu0  ;;  %v2256_v9 = vld [vmem:[%s2608_s19 + $0xf8] sm:$0xfe] }
  0xe0   : >> { %1551 = vmatpush.msrb.mxu1 %v2281_v13  ;;  %1402 = vmatpush.msrb.mxu0 %v2248_v14  ;;  %v488_v22 = vadd.f32 %v487_v21, %v459_v16  ;;  %v2257_v13 = vld [vmem:[%s2608_s19 + $0x100] sm:$0xfe]  ;;  %v3967_v14 = vld [vmem:[%s2608_s19 + $0x118] sm:$0xff]  ;;  %v1512_v21 = vrot.slane %v3793_v58, 1 }
  0xe1   : >> { %1610 = vmatpush.msrb.mxu3 %v2312_v11  ;;  %1583 = vmatpush.msrb.mxu2 %v2294_v17  ;;  %v2273_v17 = vld [vmem:[%s4293_s1 + $0xa98] sm:$0xff]  ;;  %v1515_v28 = vrot.slane %v3967_v14, 1 }
  0xe2   : >> { %1552 = vmatpush.msrb.mxu1 %v2280_v19  ;;  %1403 = vmatpush.msrb.mxu0 %v2247_v20  ;;  %v2240_v19 = vld [vmem:[%s4293_s1 + $0xa08] sm:$0xff]  ;;  %v1511_v20 = vrot.slane %v2256_v9, 1  ;;  %v2367_v9 = vld [vmem:[%s4293_s1 + $0xd58] sm:$0xff] }
  0xe3   : >> { %1611 = vmatpush.msrb.mxu3 %v2311_v33  ;;  %1233 = vmatmul.f32.gmra.mxu0 %v3656_v42  ;;  %v516_v4 = vpop.f32.mrf.mxu1  ;;  %v433_v42 = vadd.f32 %v3699_v48, %v404_v55  ;;  %v2291_v48 = vld [vmem:[%s4293_s1 + $0xb28] sm:$0xff]  ;;  %v2255_v55 = vld [vmem:[%s2608_s19 + $0xf0] sm:$0xfe] }
  0xe4   : >> { %1360 = vmatmul.f32.gmra.mxu2 %v3856_v24  ;;  %1389 = vmatmul.f32.gmra.mxu3 %v3859_v25  ;;  %v3881_v30 = vadd.f32 %v516_v4, %v488_v22  ;;  %v2304_v22 = vld [vmem:[%s4293_s1 + $0xb90] sm:$0xff]  ;;  %v1513_v32 = vsel %vm311_vm0, %v1511_v20, %v1512_v21  ;;  %v4078_v20 = vld [vmem:[%s2608_s19 + $0x148] sm:$0xff] }
  0xe5   : >> { %1553 = vmatpush.msrb.mxu1 %v2279_v44  ;;  %1584 = vmatpush.msrb.mxu2 %v2293_v34  ;;  %v462_v50 = vadd.f32 %v3701_v63, %v433_v42  ;;  %v2243_v63 = vld [vmem:[%s4293_s1 + $0xa20] sm:$0xff]  ;;  %v2272_v34 = vld [vmem:[%s4293_s1 + $0xa90] sm:$0xff] }
  0xe6   : >> { %1404 = vmatpush.msrb.mxu0 %v2246_v56  ;;  %1612 = vmatpush.msrb.mxu3 %v2310_v53  ;;  %v646_v36 = vpop.f32.mrf.mxu2  ;;  %v675_v37 = vpop.f32.mrf.mxu3  ;;  %v2286_v44 = vld [vmem:[%s4293_s1 + $0xb00] sm:$0xff]  ;;  %v1514_v53 = vrot.slane %v2257_v13, 1 }
  0xe7   : >> { %1262 = vmatmul.f32.gmra.mxu1 %v3685_v57  ;;  %1585 = vmatpush.msrb.mxu2 %v2292_v29  ;;  %v3903_v43 = vadd.f32 %v675_v37, %v646_v36  ;;  %v2308_v57 = vld [vmem:[%s4293_s1 + $0xbb0] sm:$0xff]  ;;  %v2239_v56 = vld [vmem:[%s4293_s1 + $0xa00] sm:$0xff]  ;;  %v2303_v29 = vld [vmem:[%s4293_s1 + $0xb88] sm:$0xff] }
  0xe8   : >> { %1554 = vmatpush.msrb.mxu1 %v2278_v46  ;;  %1405 = vmatpush.msrb.mxu0 %v2245_v39  ;;  %v2197_v42 = vld [vmem:[%s2608_s19 + $0x100] sm:$0xff]  ;;  %v1508_v46 = vrot.slane %v2255_v55, 1  ;;  %v1509_v39 = vrot.slane %v3790_v49, 1  ;;  %v2371_v36 = vld [vmem:[%s4293_s1 + $0xd78] sm:$0xff]  ;;  %v2365_v55 = vld [vmem:[%s4293_s1 + $0xd48] sm:$0xff] }
  0xe9   : >> { %1613 = vmatpush.msrb.mxu3 %v2309_v1  ;;  %1586 = vmatpush.msrb.mxu2 %v2291_v48  ;;  %v490_v31 = vpop.f32.mrf.mxu0  ;;  %v2271_v48 = vld [vmem:[%s4293_s1 + $0xa88] sm:$0xff]  ;;  %v2302_v37 = vld [vmem:[%s4293_s1 + $0xb80] sm:$0xff] }
  0xea   : >> { %1555 = vmatpush.msrb.mxu1 %v2277_v38  ;;  %1406 = vmatpush.msrb.mxu0 %v2244_v23  ;;  %v491_v54 = vadd.f32 %v490_v31, %v462_v50  ;;  %v1516_v38 = vsel %vm311_vm0, %v1514_v53, %v1515_v28  ;;  %v1510_v50 = vsel %vm311_vm0, %v1508_v46, %v1509_v39  ;;  %v1519_v31 = vrot.slane %v3859_v25, 1  ;;  %v2352_v13 = vld [vmem:[%s4293_s1 + $0xce0] sm:$0xff] }
  0xeb   : >> { %1614 = vmatpush.msrb.mxu3 %v2308_v57  ;;  %1587 = vmatpush.msrb.mxu2 %v2290_v45  ;;  %v4019_v57 = vld [vmem:[%s2608_s19 + $0x130] sm:$0xff]  ;;  %v1527_v53 = vrot.slane %v4078_v20, 1 }
  0xec   : >> { %1556 = vmatpush.msrb.mxu1 %v2276_v51  ;;  %1407 = vmatpush.msrb.mxu0 %v2243_v63  ;;  %v2355_v51 = vld [vmem:[%s4293_s1 + $0xcf8] sm:$0xff] }
  0xed   : >> { %1615 = vmatpush.msrb.mxu3 %v2307_v47  ;;  %1236 = vmatmul.f32.gmra.mxu0 %v1167_v52  ;;  %v519_v3 = vpop.f32.mrf.mxu1  ;;  %v2339_v63 = vld [vmem:[%s4293_s1 + $0xc78] sm:$0xff]  ;;  %v2369_v47 = vld [vmem:[%s4293_s1 + $0xd68] sm:$0xff] }
  0xee   : >> { %1363 = vmatmul.f32.gmra.mxu2 %v3925_v8  ;;  %1392 = vmatmul.f32.gmra.mxu3 %v3928_v60  ;;  %v3951_v18 = vadd.f32 %v519_v3, %v491_v54  ;;  %v2354_v54 = vld [vmem:[%s4293_s1 + $0xcf0] sm:$0xff]  ;;  %v1520_v3 = vsel %vm311_vm0, %v1512_v21, %v1519_v31  ;;  %v2351_v21 = vld [vmem:[%s4293_s1 + $0xcd8] sm:$0xff] }
  0xef   : >> { %1557 = vmatpush.msrb.mxu1 %v2275_v61  ;;  %1588 = vmatpush.msrb.mxu2 %v2289_v26  ;;  %v2338_v61 = vld [vmem:[%s4293_s1 + $0xc70] sm:$0xff]  ;;  %v1521_v26 = vrot.slane %v4019_v57, 1 }
  0xf0   : >> { %1408 = vmatpush.msrb.mxu0 %v2242_v35  ;;  %1616 = vmatpush.msrb.mxu3 %v2306_v2  ;;  %v649_v16 = vpop.f32.mrf.mxu2  ;;  %v678_v11 = vpop.f32.mrf.mxu3  ;;  %v2368_v2 = vld [vmem:[%s4293_s1 + $0xd60] sm:$0xff] }
  0xf1   : >> { %1265 = vmatmul.f32.gmra.mxu1 %v1169_v59  ;;  %1589 = vmatpush.msrb.mxu2 %v2288_v62  ;;  %v3977_v33 = vadd.f32 %v678_v11, %v649_v16  ;;  %v2353_v62 = vld [vmem:[%s4293_s1 + $0xce8] sm:$0xff]  ;;  %v2366_v16 = vld [vmem:[%s4293_s1 + $0xd50] sm:$0xff]  ;;  %v2336_v11 = vld [vmem:[%s4293_s1 + $0xc60] sm:$0xff] }
  0xf2   : >> { %1558 = vmatpush.msrb.mxu1 %v2274_v10  ;;  %1409 = vmatpush.msrb.mxu0 %v2241_v27  ;;  %v1517_v10 = vrot.slane %v3856_v24, 1 }
  0xf3   : >> { %1617 = vmatpush.msrb.mxu3 %v2305_v41  ;;  %1590 = vmatpush.msrb.mxu2 %v2287_v12  ;;  %v493_v4 = vpop.f32.mrf.mxu0  ;;  %v2337_v41 = vld [vmem:[%s4293_s1 + $0xc68] sm:$0xff]  ;;  %v1522_v12 = vsel %vm311_vm0, %v1515_v28, %v1521_v26 }
  0xf4   : >> { %1559 = vmatpush.msrb.mxu1 %v2273_v17  ;;  %1410 = vmatpush.msrb.mxu0 %v2240_v19  ;;  %v494_v1 = vadd.f32 %v493_v4, %v3782_v5  ;;  %v2270_v5 = vld [vmem:[%s4293_s1 + $0xa80] sm:$0xff]  ;;  %v1518_v19 = vsel %vm311_vm0, %v1509_v39, %v1517_v10  ;;  %v1703_v4 = vrot.slane %v3793_v58, 2  ;;  %v1710_v39 = vrot.slane %v3859_v25, 2 }
  0xf5   : >> { %1618 = vmatpush.msrb.mxu3 %v2304_v22  ;;  %1591 = vmatpush.msrb.mxu2 %v2286_v44  ;;  %v2335_v22 = vld [vmem:[%s4293_s1 + $0xc58] sm:$0xff]  ;;  %v1714_v58 = vrot.slane %v3925_v8, 2 }
  0xf6   : >> { %1560 = vmatpush.msrb.mxu1 %v2272_v34  ;;  %1411 = vmatpush.msrb.mxu0 %v2239_v56  ;;  %v2350_v34 = vld [vmem:[%s4293_s1 + $0xcd0] sm:$0xff]  ;;  %v2364_v56 = vld [vmem:[%s4293_s1 + $0xd40] sm:$0xff]  ;;  %v4115_v25 = vsel %vm586_vm1, %v1703_v4, %v1710_v39 }
  0xf7   : >> { %1619 = vmatpush.msrb.mxu3 %v2303_v29  ;;  %1412 = vmatmul.f32.vlgmr.msrb.gmra.mxu0 %v2197_v42  ;;  %v522_v23 = vpop.f32.mrf.mxu1  ;;  %v2334_v29 = vld [vmem:[%s4293_s1 + $0xc50] sm:$0xff] }
  0xf8   : >> { %1561 = vmatpush.msrb.mxu1 %v2271_v48  ;;  %1592 = vmatmul.f32.vlgmr.msrb.gmra.mxu2 %v1513_v32  ;;  %v4021_v45 = vadd.f32 %v522_v23, %v494_v1  ;;  %v2349_v32 = vld [vmem:[%s4293_s1 + $0xcc8] sm:$0xff]  ;;  %v1528_v23 = vsel %vm311_vm0, %v1521_v26, %v1527_v53  ;;  %v2331_v26 = vld [vmem:[%s4293_s1 + $0xc38] sm:$0xff] }
  0xf9   : >> { %1796 = vmatpush.msra.mxu2 %v2371_v36  ;;  %1620 = vmatpush.msrb.mxu3 %v2302_v37  ;;  %v2363_v36 = vld [vmem:[%s4293_s1 + $0xd38] sm:$0xff]  ;;  %v1523_v37 = vrot.slane %v3925_v8, 1  ;;  %v2323_v8 = vld [vmem:[%s2608_s19 + $0x160] sm:$0x3] }
  0xfa   : >> { %1562 = vmatpush.msrb.mxu1 %v2270_v5  ;;  %1621 = vmatmul.f32.vlgmr.msrb.gmra.mxu3 %v1516_v38  ;;  %v652_v52 = vpop.f32.mrf.mxu2  ;;  %v681_v6 = vpop.f32.mrf.mxu3  ;;  %v2333_v38 = vld [vmem:[%s4293_s1 + $0xc48] sm:$0xff] }
  0xfb   : >> { %1797 = vmatpush.msra.mxu2 %v2370_v40  ;;  %1563 = vmatmul.f32.vlgmr.msrb.gmra.mxu1 %v1510_v50  ;;  %v4040_v35 = vadd.f32 %v681_v6, %v652_v52  ;;  %v2268_v40 = vld [vmem:[%s2608_s19 + $0x158] sm:$0x1]  ;;  %v2348_v50 = vld [vmem:[%s4293_s1 + $0xcc0] sm:$0xff]  ;;  %v1524_v52 = vsel %vm311_vm0, %v1517_v10, %v1523_v37  ;;  %v2267_v10 = vld [vmem:[%s2608_s19 + $0x150] sm:$0x1] }
  0xfc   : >> { %1767 = vmatpush.msra.mxu1 %v2355_v51  ;;  %1738 = vmatpush.msra.mxu0 %v2339_v63  ;;  %v2269_v6 = vld [vmem:[%s2608_s19 + $0x160] sm:$0x1] }
  0xfd   : >> { %1798 = vmatpush.msra.mxu2 %v2369_v47  ;;  %2377 = vmatpush.msra.mxu3 %v2339_v63  ;;  %v701_v59 = vpop.f32.mrf.mxu0  ;;  %v2362_v63 = vld [vmem:[%s4293_s1 + $0xd30] sm:$0xff] }
  0xfe   : >> { %1768 = vmatpush.msra.mxu1 %v2354_v54  ;;  %1739 = vmatpush.msra.mxu0 %v2338_v61  ;;  %v702_v27 = vadd.f32 %v701_v59, %v3835_v15  ;;  %v2347_v54 = vld [vmem:[%s4293_s1 + $0xcb8] sm:$0xff]  ;;  %v2346_v59 = vld [vmem:[%s4293_s1 + $0xcb0] sm:$0xff] }
  0xff   : >> { %1799 = vmatpush.msra.mxu2 %v2368_v2  ;;  %1415 = vmatmul.f32.gmra.mxu0 %v3967_v14 }
 0x100   : >> { %1595 = vmatmul.f32.gmra.mxu2 %v1520_v3  ;;  %2378 = vmatpush.msra.mxu3 %v2338_v61  ;;  %v713_v15 = vadd.f32 %v702_v27, %v3814_v7  ;;  %v1525_v7 = vrot.slane %v3928_v60, 1  ;;  %v2361_v61 = vld [vmem:[%s4293_s1 + $0xd28] sm:$0xff]  ;;  %v1716_v3 = vrot.slane %v3928_v60, 2 }
 0x101   : >> { %1769 = vmatpush.msra.mxu1 %v2353_v62  ;;  %1800 = vmatpush.msra.mxu2 %v2367_v9  ;;  %v799_v17 = vpop.f32.mrf.mxu1  ;;  %v2360_v62 = vld [vmem:[%s4293_s1 + $0xd20] sm:$0xff]  ;;  %v1533_v9 = vrot.slane %v2269_v6, 1  ;;  %v2325_v6 = vld [vmem:[%s4293_s1 + $0xc08] sm:$0xff] }
 0x102   : >> { %1740 = vmatpush.msra.mxu0 %v2337_v41  ;;  %1624 = vmatmul.f32.gmra.mxu3 %v1522_v12  ;;  %v1526_v42 = vsel %vm311_vm0, %v1519_v31, %v1525_v7  ;;  %v2332_v31 = vld [vmem:[%s4293_s1 + $0xc40] sm:$0xff] }
 0x103   : >> { %2379 = vmatpush.msra.mxu3 %v2337_v41  ;;  %1770 = vmatpush.msra.mxu1 %v2352_v13  ;;  %v2330_v41 = vld [vmem:[%s4293_s1 + $0xc30] sm:$0xff] }
 0x104   : >> { %1801 = vmatpush.msra.mxu2 %v2366_v16  ;;  %1741 = vmatpush.msra.mxu0 %v2336_v11  ;;  %v828_v44 = vpop.f32.mrf.mxu2  ;;  %v857_v46 = vpop.f32.mrf.mxu3 }
 0x105   : >> { %1566 = vmatmul.f32.gmra.mxu1 %v1518_v19  ;;  %2380 = vmatpush.msra.mxu3 %v2336_v11  ;;  %v829_v28 = vadd.f32 %v828_v44, %v799_v17  ;;  %v2345_v17 = vld [vmem:[%s4293_s1 + $0xca8] sm:$0xff]  ;;  %v2359_v19 = vld [vmem:[%s4293_s1 + $0xd18] sm:$0xff] }
 0x106   : >> { %1771 = vmatpush.msra.mxu1 %v2351_v21  ;;  %1802 = vmatpush.msra.mxu2 %v2365_v55  ;;  %v2329_v55 = vld [vmem:[%s4293_s1 + $0xc28] sm:$0xff] }
 0x107   : >> { %1742 = vmatpush.msra.mxu0 %v2335_v22  ;;  %2381 = vmatpush.msra.mxu3 %v2335_v22  ;;  %v858_v1 = vadd.f32 %v857_v46, %v829_v28  ;;  %v704_v48 = vpop.f32.mrf.mxu0  ;;  %v1534_v22 = vsel %vm311_vm0, %v1527_v53, %v1533_v9  ;;  %v2358_v28 = vld [vmem:[%s4293_s1 + $0xd10] sm:$0xff]  ;;  %v2328_v53 = vld [vmem:[%s4293_s1 + $0xc20] sm:$0xff]  ;;  %v2343_v46 = vld [vmem:[%s4293_s1 + $0xc98] sm:$0xff] }
 0x108   : >> { %1772 = vmatpush.msra.mxu1 %v2350_v34  ;;  %1803 = vmatpush.msra.mxu2 %v2364_v56  ;;  %v705_v5 = vadd.f32 %v704_v48, %v3903_v43  ;;  %v2344_v34 = vld [vmem:[%s4293_s1 + $0xca0] sm:$0xff]  ;;  %v2327_v48 = vld [vmem:[%s4293_s1 + $0xc18] sm:$0xff] }
 0x109   : >> { %1743 = vmatpush.msra.mxu0 %v2334_v29  ;;  %1598 = vmatmul.f32.gmra.mxu2 %v1526_v42  ;;  %v4126_v43 = vadd.f32 %v858_v1, %v713_v15  ;;  %v4171_v15 = vsel %vm586_vm1, %v1710_v39, %v1716_v3  ;;  %v2357_v39 = vld [vmem:[%s4293_s1 + $0xd08] sm:$0xff] }
 0x10a   : >> { %1418 = vmatmul.f32.gmra.mxu0 %v4019_v57  ;;  %2382 = vmatpush.msra.mxu3 %v2334_v29  ;;  %v714_v51 = vadd.f32 %v705_v5, %v3881_v30  ;;  %v1531_v30 = vrot.slane %v2268_v40, 1  ;;  %v2356_v5 = vld [vmem:[%s4293_s1 + $0xd00] sm:$0xff]  ;;  %v2326_v40 = vld [vmem:[%s4293_s1 + $0xc10] sm:$0xff] }
 0x10b   : >> { %1773 = vmatpush.msra.mxu1 %v2349_v32  ;;  %1804 = vmatpush.msra.mxu2 %v2363_v36  ;;  %v802_v47 = vpop.f32.mrf.mxu1  ;;  %v2318_v32 = vld [vmem:[%s2608_s19 + $0xf0] sm:$0xfc]  ;;  %v2319_v36 = vld [vmem:[%s2608_s19 + $0xf8] sm:$0xfc] }
 0x10c   : >> { %1744 = vmatpush.msra.mxu0 %v2333_v38  ;;  %1627 = vmatmul.f32.gmra.mxu3 %v1528_v23  ;;  %v1532_v12 = vsel %vm311_vm0, %v1525_v7, %v1531_v30  ;;  %v1529_v7 = vrot.slane %v2267_v10, 1  ;;  %v1700_v23 = vrot.slane %v3790_v49, 2  ;;  %v1708_v49 = vrot.slane %v3856_v24, 2  ;;  %v2324_v24 = vld [vmem:[%s4293_s1 + $0xc00] sm:$0xff] }
 0x10d   : >> { %2383 = vmatpush.msra.mxu3 %v2333_v38  ;;  %1774 = vmatpush.msra.mxu1 %v2348_v50 }
 0x10e   : >> { %1805 = vmatpush.msra.mxu2 %v2362_v63  ;;  %1745 = vmatpush.msra.mxu0 %v2332_v31  ;;  %v831_v2 = vpop.f32.mrf.mxu2  ;;  %v860_v13 = vpop.f32.mrf.mxu3  ;;  %v1530_v42 = vsel %vm311_vm0, %v1523_v37, %v1529_v7  ;;  %v2342_v37 = vld [vmem:[%s4293_s1 + $0xc90] sm:$0xff]  ;;  %v1709_v10 = vsel %vm586_vm1, %v1700_v23, %v1708_v49 }
 0x10f   : >> { %1569 = vmatmul.f32.gmra.mxu1 %v1524_v52  ;;  %2384 = vmatpush.msra.mxu3 %v2332_v31  ;;  %v832_v27 = vadd.f32 %v831_v2, %v802_v47  ;;  %v1699_v31 = vrot.slane %v2318_v32, 2  ;;  %v1702_v47 = vrot.slane %v2319_v36, 2 }
 0x110   : >> { %1775 = vmatpush.msra.mxu1 %v2347_v54  ;;  %1806 = vmatpush.msra.mxu2 %v2361_v61  ;;  %v2340_v61 = vld [vmem:[%s4293_s1 + $0xc80] sm:$0xff] }
 0x111   : >> { %1746 = vmatpush.msra.mxu0 %v2331_v26  ;;  %2385 = vmatpush.msra.mxu3 %v2331_v26  ;;  %v861_v16 = vadd.f32 %v860_v13, %v832_v27  ;;  %v707_v11 = vpop.f32.mrf.mxu0  ;;  %v1718_v13 = vrot.slane %v4078_v20, 2 }
 0x112   : >> { %1776 = vmatpush.msra.mxu1 %v2346_v59  ;;  %1807 = vmatpush.msra.mxu2 %v2360_v62  ;;  %v708_v21 = vadd.f32 %v707_v11, %v3977_v33  ;;  %v2320_v33 = vld [vmem:[%s2608_s19 + $0x100] sm:$0xfc]  ;;  %v1704_v59 = vsel %vm586_vm1, %v1702_v47, %v1703_v4  ;;  %v1712_v62 = vrot.slane %v4019_v57, 2  ;;  %v1715_v11 = vsel %vm586_vm1, %v1708_v49, %v1714_v58 }
 0x113   : >> { %1747 = vmatpush.msra.mxu0 %v2330_v41  ;;  %1601 = vmatmul.f32.gmra.mxu2 %v1532_v12  ;;  %v4186_v44 = vadd.f32 %v861_v16, %v714_v51  ;;  %v1705_v1 = vrot.slane %v2320_v33, 2  ;;  %v2341_v51 = vld [vmem:[%s4293_s1 + $0xc88] sm:$0xff]  ;;  %v1724_v33 = vrot.slane %v2323_v8, 2 }
 0x114   : >> { %1421 = vmatmul.f32.gmra.mxu0 %v4078_v20  ;;  %2386 = vmatpush.msra.mxu3 %v2330_v41  ;;  %v715_v56 = vadd.f32 %v708_v21, %v3951_v18  ;;  %v1706_v18 = vrot.slane %v3967_v14, 2  ;;  %v1719_v21 = vsel %vm586_vm1, %v1712_v62, %v1718_v13 }
 0x115   : >> { %1777 = vmatpush.msra.mxu1 %v2345_v17  ;;  %1808 = vmatpush.msra.mxu2 %v2359_v19  ;;  %v805_v29 = vpop.f32.mrf.mxu1  ;;  %v2321_v17 = vld [vmem:[%s2608_s19 + $0x150] sm:$0x3] }
 0x116   : >> { %1748 = vmatpush.msra.mxu0 %v2329_v55  ;;  %1630 = vmatmul.f32.gmra.mxu3 %v1534_v22  ;;  %v1707_v63 = vsel %vm586_vm1, %v1705_v1, %v1706_v18  ;;  %v1713_v27 = vsel %vm586_vm1, %v1706_v18, %v1712_v62 }
 0x117   : >> { %2387 = vmatpush.msra.mxu3 %v2329_v55  ;;  %1778 = vmatpush.msra.mxu1 %v2344_v34  ;;  %v1720_v55 = vrot.slane %v2321_v17, 2 }
 0x118   : >> { %1809 = vmatpush.msra.mxu2 %v2358_v28  ;;  %1749 = vmatpush.msra.mxu0 %v2328_v53  ;;  %v834_v14 = vpop.f32.mrf.mxu2  ;;  %v863_v50 = vpop.f32.mrf.mxu3 }
 0x119   : >> { %1572 = vmatmul.f32.gmra.mxu1 %v1530_v42  ;;  %2388 = vmatpush.msra.mxu3 %v2328_v53  ;;  %v835_v38 = vadd.f32 %v834_v14, %v805_v29  ;;  %v1721_v28 = vsel %vm586_vm1, %v1714_v58, %v1720_v55  ;;  %v2322_v53 = vld [vmem:[%s2608_s19 + $0x158] sm:$0x3]  ;;  %s2372_s19 = sshll.u32 %s2424_s24, 5  ;;  %s177_s24 = sadd.s32 1, %s2424_s24  }
 0x11a   : >> { %1779 = vmatpush.msra.mxu1 %v2343_v46  ;;  %1810 = vmatpush.msra.mxu2 %v2357_v39  ;;  %v1722_v42 = vrot.slane %v2322_v53, 2  ;;  %s4274_s28 = scalar_lea.vmem %s2462_s20, %s2372_s19  ;;  %p174_p4 = scmp.ge.s32.totalorder %s177_s24, 32  }
 0x11b   : >> { %1750 = vmatpush.msra.mxu0 %v2327_v48  ;;  %2389 = vmatpush.msra.mxu3 %v2327_v48  ;;  %v864_v52 = vadd.f32 %v863_v50, %v835_v38  ;;  %v710_v30 = vpop.f32.mrf.mxu0 }
 0x11c   : >> { %1780 = vmatpush.msra.mxu1 %v2342_v37  ;;  %1811 = vmatpush.msra.mxu2 %v2356_v5  ;;  %v711_v54 = vadd.f32 %v710_v30, %v4040_v35  ;;  %v1701_v35 = vsel %vm586_vm1, %v1699_v31, %v1700_v23  ;;  %v1723_v1 = vsel %vm586_vm1, %v1716_v3, %v1722_v42 }
 0x11d   : >> { %1751 = vmatpush.msra.mxu0 %v2326_v40  ;;  %2390 = vmatpush.msra.mxu3 %v2326_v40  ;;  %v4237_v26 = vadd.f32 %v864_v52, %v715_v56 }
 0x11e   : >> { %1781 = vmatpush.msra.mxu1 %v2341_v51  ;;  %1812 = vmatmul.f32.vlgmr.msra.gmra.mxu2 %v1707_v63  ;;  %v716_v2 = vadd.f32 %v711_v54, %v4021_v45 }
 0x11f   : >> { %1752 = vmatpush.msra.mxu0 %v2325_v6  ;;  %2391 = vmatpush.msra.mxu3 %v2325_v6  ;;  %v808_v9 = vpop.f32.mrf.mxu1 }
 0x120   : >> { %1782 = vmatpush.msra.mxu1 %v2340_v61 }
 0x121   : >> { %1753 = vmatpush.msra.mxu0 %v2324_v24  ;;  %2392 = vmatpush.msra.mxu3 %v2324_v24 }
 0x122   : >> { %1754 = vmatmul.f32.vlgmr.msra.gmra.mxu0 %v1701_v35  ;;  %1783 = vmatmul.f32.vlgmr.msra.gmra.mxu1 %v1704_v59  ;;  %v837_v45 = vpop.f32.mrf.mxu2  ;;  %v866_v4 = vpop.f32.mrf.mxu3 }
 0x123   : >> { %1757 = vmatmul.f32.vlgmr.msra.gmra.mxu3 %v1709_v10  ;;  %v838_v41 = vadd.f32 %v837_v45, %v808_v9 }
 0x125   : >> { %v867_v12 = vadd.f32 %v866_v4, %v838_v41  ;;  %v1008_v57 = vpop.f32.mrf.mxu0 }
 0x126   : >> { %1815 = vmatmul.f32.gmra.mxu2 %v1713_v27 }
 0x127   : >> { %v872_v16 = vadd.f32 %v867_v12, %v716_v2 }
 0x129   : >> { %v1037_v19 = vpop.f32.mrf.mxu1 }
 0x12a   : >> { %1786 = vmatmul.f32.gmra.mxu1 %v4115_v25  ;;  %v1038_v7 = vadd.f32 %v1037_v19, %v1008_v57  ;;  %v1725_v25 = vsel %vm586_vm1, %v1718_v13, %v1724_v33 }
 0x12b   : >> { %1760 = vmatmul.f32.gmra.mxu3 %v1715_v11 }
 0x12c   : >> { %v1066_v22 = vpop.f32.mrf.mxu2  ;;  %v1199_v29 = vpop.f32.mrf.mxu3 }
 0x12d   : >> { %v1067_v34 = vadd.f32 %v1066_v22, %v1038_v7 }
 0x12e   : >> { %1818 = vmatmul.f32.gmra.mxu2 %v1719_v21 }
 0x12f   : >> { %v1078_v20 = vadd.f32 %v1067_v34, %v4126_v43  ;;  %v1011_v56 = vpop.f32.mrf.mxu0 }
 0x132   : >> { %1789 = vmatmul.f32.gmra.mxu1 %v4171_v15 }
 0x133   : >> { %1763 = vmatmul.f32.gmra.mxu3 %v1721_v28  ;;  %v1040_v18 = vpop.f32.mrf.mxu1 }
 0x134   : >> { %v1041_v46 = vadd.f32 %v1040_v18, %v1011_v56 }
 0x136   : >> { %1821 = vmatmul.f32.gmra.mxu2 %v1725_v25  ;;  %v1069_v39 = vpop.f32.mrf.mxu2  ;;  %v1202_v36 = vpop.f32.mrf.mxu3 }
 0x137   : >> { %v1070_v43 = vadd.f32 %v1069_v39, %v1041_v46 }
 0x139   : >> { %v1079_v48 = vadd.f32 %v1070_v43, %v4186_v44  ;;  %v1014_v32 = vpop.f32.mrf.mxu0 }
 0x13a   : >> { %1792 = vmatmul.f32.gmra.mxu1 %v1723_v1 }
 0x13d   : >> { %v1043_v15 = vpop.f32.mrf.mxu1 }
 0x13e   : >> { %v1044_v14 = vadd.f32 %v1043_v15, %v1014_v32 }
 0x140   : >> { %v1072_v37 = vpop.f32.mrf.mxu2  ;;  %v1205_v40 = vpop.f32.mrf.mxu3 }
 0x141   : >> { %v1073_v5 = vadd.f32 %v1072_v37, %v1044_v14 }
 0x143   : >> { %v1080_v38 = vadd.f32 %v1073_v5, %v4237_v26  ;;  %v1017_v23 = vpop.f32.mrf.mxu0 }
 0x147   : >> { %v1046_v50 = vpop.f32.mrf.mxu1 }
 0x148   : >> { %v1047_v51 = vadd.f32 %v1046_v50, %v1017_v23  ;;  %v1830_v50 = vperm.slane %v2457_v0, 0 }
 0x14a   : >> { %v1075_v63 = vpop.f32.mrf.mxu2  ;;  %v1208_v52 = vpop.f32.mrf.mxu3 }
 0x14b   : >> { %v1076_v60 = vadd.f32 %v1075_v63, %v1047_v51 }
 0x14d   : >> { %v1081_v31 = vadd.f32 %v1076_v60, %v872_v16  ;;  %v1228_v3 = vpop.f32.mrf.mxu0 }
 0x14e   : >> { %v1229_v47 = vadd.f32 %v1228_v3, %v1199_v29 }
 0x150   : >> { %v1257_v44 = vpop.f32.mrf.mxu1 }
 0x151   : >> { %v1258_v30 = vadd.f32 %v1257_v44, %v1229_v47 }
 0x153   : >> { %v1269_v49 = vadd.f32 %v1258_v30, %v1078_v20 }
 0x154   : >> { %v1355_v6 = vpop.f32.mrf.mxu2  ;;  %v1384_v24 = vpop.f32.mrf.mxu3 }
 0x155   : >> { %v1385_v46 = vadd.f32 %v1384_v24, %v1355_v6 }
 0x157   : >> { %v1231_v54 = vpop.f32.mrf.mxu0 }
 0x158   : >> { %v1232_v61 = vadd.f32 %v1231_v54, %v1202_v36 }
 0x15a   : >> { %v1260_v2 = vpop.f32.mrf.mxu1 }
 0x15b   : >> { %v1261_v35 = vadd.f32 %v1260_v2, %v1232_v61 }
 0x15c   : >> { %v1358_v59 = vpop.f32.mrf.mxu2 }
 0x15d   : >> { %v1270_v26 = vadd.f32 %v1261_v35, %v1079_v48  ;;  %v1387_v10 = vpop.f32.mrf.mxu3 }
 0x15e   : >> { %v1388_v37 = vadd.f32 %v1387_v10, %v1358_v59 }
 0x160   : >> { %v1234_v62 = vpop.f32.mrf.mxu0 }
 0x161   : >> { %v1235_v9 = vadd.f32 %v1234_v62, %v1205_v40 }
 0x164   : >> { %v1263_v45 = vpop.f32.mrf.mxu1 }
 0x165   : >> { %v1264_v27 = vadd.f32 %v1263_v45, %v1235_v9 }
 0x167   : >> { %v4267_v41 = vadd.f32 %v1264_v27, %v1080_v38  ;;  %v1361_v58 = vpop.f32.mrf.mxu2  ;;  %v1390_v57 = vpop.f32.mrf.mxu3 }
 0x16a   : >> { %v1237_v4 = vpop.f32.mrf.mxu0 }
 0x16b   : >> { %v1238_v12 = vadd.f32 %v1237_v4, %v1208_v52 }
 0x16e   : >> { %v1266_v13 = vpop.f32.mrf.mxu1 }
 0x16f   : >> { %v1267_v16 = vadd.f32 %v1266_v13, %v1238_v12 }
 0x171   : >> { %v4269_v11 = vadd.f32 %v1267_v16, %v1081_v31  ;;  %v1364_v17 = vpop.f32.mrf.mxu2  ;;  %v1393_v19 = vpop.f32.mrf.mxu3 }
 0x172   : >> { %v1394_v27 = vadd.f32 %v1393_v19, %v1364_v17 }
 0x174   : >> { %v1413_v21 = vpop.f32.mrf.mxu0 }
 0x175   : >> { %v1414_v1 = vadd.f32 %v1413_v21, %v1385_v46 }
 0x177   : >> { %v1425_v15 = vadd.f32 %v1414_v1, %v1269_v49  ;;  %v1391_v49 = vadd.f32 %v1390_v57, %v1361_v58 }
 0x178   : >> { %v1564_v7 = vpop.f32.mrf.mxu1 }
 0x17b   : >> { %v1593_v55 = vpop.f32.mrf.mxu2 }
 0x17c   : >> { %v1416_v34 = vpop.f32.mrf.mxu0  ;;  %v1594_v39 = vadd.f32 %v1593_v55, %v1564_v7 }
 0x17d   : >> { %v1622_v8 = vpop.f32.mrf.mxu3  ;;  %v1417_v51 = vadd.f32 %v1416_v34, %v1388_v37 }
 0x17e   : >> { %v1623_v43 = vadd.f32 %v1622_v8, %v1594_v39 }
 0x17f   : >> { %v1426_v52 = vadd.f32 %v1417_v51, %v1270_v26 }
 0x180   : >> { %v1634_v38 = vadd.f32 %v1623_v43, %v1425_v15 }
 0x182   : >> { %v1567_v22 = vpop.f32.mrf.mxu1 }
 0x183   : >> { %v1596_v33 = vpop.f32.mrf.mxu2 }
 0x184   : >> { %v1597_v23 = vadd.f32 %v1596_v33, %v1567_v22 }
 0x185   : >> { %v1625_v20 = vpop.f32.mrf.mxu3 }
 0x186   : >> { %v1626_v60 = vadd.f32 %v1625_v20, %v1597_v23 }
 0x187   : >> { %v1419_v28 = vpop.f32.mrf.mxu0 }
 0x188   : >> { %v1635_v6 = vadd.f32 %v1626_v60, %v1426_v52  ;;  %v1420_v24 = vadd.f32 %v1419_v28, %v1391_v49 }
 0x18a   : >> { %v1427_v10 = vadd.f32 %v1420_v24, %v4267_v41 }
 0x18c   : >> { %v1570_v56 = vpop.f32.mrf.mxu1  ;;  %v1599_v53 = vpop.f32.mrf.mxu2 }
 0x18d   : >> { %v1600_v54 = vadd.f32 %v1599_v53, %v1570_v56 }
 0x18f   : >> { %v1628_v29 = vpop.f32.mrf.mxu3 }
 0x190   : >> { %v1629_v35 = vadd.f32 %v1628_v29, %v1600_v54 }
 0x191   : >> { %v1422_v42 = vpop.f32.mrf.mxu0 }
 0x192   : >> { %v1636_v4 = vadd.f32 %v1629_v35, %v1427_v10  ;;  %v1423_v57 = vadd.f32 %v1422_v42, %v1394_v27 }
 0x194   : >> { %v1428_v8 = vadd.f32 %v1423_v57, %v4269_v11 }
 0x196   : >> { %v1573_v25 = vpop.f32.mrf.mxu1  ;;  %v1602_v18 = vpop.f32.mrf.mxu2 }
 0x197   : >> { %v1603_v12 = vadd.f32 %v1602_v18, %v1573_v25 }
 0x199   : >> { %v1631_v48 = vpop.f32.mrf.mxu3 }
 0x19a   : >> { %v1632_v16 = vadd.f32 %v1631_v48, %v1603_v12 }
 0x19c   : >> { %v1637_v34 = vadd.f32 %v1632_v16, %v1428_v8 }
 0x19f   : >> { %v1755_v32 = vpop.f32.mrf.mxu0  ;;  %v1784_v36 = vpop.f32.mrf.mxu1 }
 0x1a0   : >> { %v1785_v14 = vadd.f32 %v1784_v36, %v1755_v32 }
 0x1a1   : >> { %v1813_v5 = vpop.f32.mrf.mxu2 }
 0x1a2   : >> { %v1814_v40 = vadd.f32 %v1813_v5, %v1785_v14 }
 0x1a4   : >> { %v1825_v63 = vadd.f32 %v1814_v40, %v1634_v38 }
 0x1a6   : >> { %v1832_v31 = vadd.f32 %v1830_v50, %v1825_v63  ;;  %v1758_v3 = vpop.f32.mrf.mxu3 }
 0x1a7   : >> { %v1787_v47 = vpop.f32.mrf.mxu1 }
 0x1a8   : >> { %1839 = vst.msk [vmem:[%s4274_s28] sm:$0xff] %vm1838_vm2, %v1832_v31  ;;  %v1788_v44 = vadd.f32 %v1787_v47, %v1758_v3 }
 0x1a9   : >> { %v1816_v30 = vpop.f32.mrf.mxu2 }
 0x1aa   : >> { %v1817_v61 = vadd.f32 %v1816_v30, %v1788_v44 }
 0x1ac   : >> { %v1826_v2 = vadd.f32 %v1817_v61, %v1635_v6 }
 0x1ae   : >> { %v1833_v59 = vadd.f32 %v1830_v50, %v1826_v2  ;;  %v1761_v62 = vpop.f32.mrf.mxu3 }
 0x1af   : >> { %v1790_v9 = vpop.f32.mrf.mxu1 }
 0x1b0   : >> { %1840 = vst.msk [vmem:[%s4274_s28 + $0x8] sm:$0xff] %vm1838_vm2, %v1833_v59  ;;  %v1791_v26 = vadd.f32 %v1790_v9, %v1761_v62 }
 0x1b1   : >> { %v1819_v45 = vpop.f32.mrf.mxu2 }
 0x1b2   : >> { %v1820_v58 = vadd.f32 %v1819_v45, %v1791_v26 }
 0x1b4   : >> { %v1827_v13 = vadd.f32 %v1820_v58, %v1636_v4 }
 0x1b6   : >> { %v1834_v7 = vadd.f32 %v1830_v50, %v1827_v13  ;;  %v1764_v21 = vpop.f32.mrf.mxu3 }
 0x1b7   : >> { %v1793_v55 = vpop.f32.mrf.mxu1 }
 0x1b8   : >> { %1841 = vst.msk [vmem:[%s4274_s28 + $0x10] sm:$0xff] %vm1838_vm2, %v1834_v7  ;;  %v1794_v41 = vadd.f32 %v1793_v55, %v1764_v21 }
 0x1b9   : >> { %v1822_v22 = vpop.f32.mrf.mxu2 }
 0x1ba   : >> { %v1823_v33 = vadd.f32 %v1822_v22, %v1794_v41 }
 0x1bc   : >> { %v1828_v20 = vadd.f32 %v1823_v33, %v1637_v34  ;;  %176 = sbr.rel (!%p174_p4) target bundleno = 15 (0xf), region = 81 }
 0x1be   : >> { %v1835_v17 = vadd.f32 %v1830_v50, %v1828_v20 }
 0x1c0   : >> { %1842 = vst.msk [vmem:[%s4274_s28 + $0x18] sm:$0xff] %vm1838_vm2, %v1835_v17 }
 0x1c1 PF: > { %s13_s12 = sadd.s32 1, %s2420_s12  }
 0x1c2   : > { %p10_p5 = scmp.ge.s32.totalorder %s13_s12, 4  }
 0x1c4   :  { %12 = sbr.rel (!%p10_p5) target bundleno = 1 (0x1), region = 92 }

// kernel: conv_head_forward.3
= control target key start
LH: loop header
LB: loop body
LE: loop exit
PB: predicated region body
PF: predicated region fallthrough
CT: control target
= control target key end

     0   :  { %s1528_s12 = smov 0   ;;  %s2037_s0 = inlined_call_operand.vmem [shape: f32[2,66,66,64], index: 0, kind: input, shape index: {}]   ;;  %s2038_s1 = inlined_call_operand.vmem [shape: f32[3,3,64,128], index: 1, kind: input, shape index: {}]   ;;  %s2039_s2 = inlined_call_operand.vmem [shape: f32[1,128], index: 2, kind: input, shape index: {}]   ;;  %s2040_s3 = inlined_call_operand.vmem [shape: f32[2,64,64,128], index: 3, kind: output, shape index: {}]  }
   0x1 LB: > { %s1223_s13 = sadd.s32 4294967295, %s1502_s12   ;;  %p1227_p0 = scmp.ge.s32.totalorder %s1502_s12, 1  ;;  %s1502_s12 = sphi %s1528_s12, %s13_s12  }
   0x2   : > { %p137_p1 = scmp.lt.s32.totalorder %s1502_s12, 3 }
   0x4   : > { %p138_p2 = pnand %p1227_p0, %p137_p1 }
   0x5   : > { %p161_p3 = scmp.lt.s32.totalorder (!%p138_p2), %s1223_s13, 1  ;;  %s1551_s24 = smov (!%p138_p2), 0  }
   0x6   : > { %141 = sbr.rel (%p138_p2) target bundleno = 340 (0x154), region = 32 }
   0xb   : > { %v1539_v0 = vld [vmem:[%s2039_s2] sm:$0x1]  ;;  %s2042_s13 = smov (!%p161_p3, %s1223_s13), 1 }
   0xc   : > { %s1443_s16 = smul.u32 4752, %s2042_s13  ;;  %s1418_s17 = sshll.u32 %s2042_s13, 12 }
   0xd   : > { %s1544_s20 = scalar_lea.vmem %s2040_s3, %s1418_s17 }
   0xe   : > { %s1549_s23 = scalar_lea.vmem %s2037_s0, %s1443_s16 }
   0xf LB: >> { %v1238_v1 = vld [vmem:[%s2038_s1 + $0x78] sm:$0xff]  ;;  %v1237_v2 = vld [vmem:[%s2038_s1 + $0x70] sm:$0xff]  ;;  %v1236_v3 = vld [vmem:[%s2038_s1 + $0x68] sm:$0xff]  ;;  %s178_s8 = smul.u32 72, %s1506_s24  ;;  %vm213_vm0 = vcmask 523264   ;;  %s1506_s24 = sphi %s1551_s24, %s177_s24  }
  0x10   : >> { %1419 = vmatpush.msra.mxu1 %v1238_v1  ;;  %1420 = vmatpush.msra.mxu2 %v1238_v1  ;;  %v1235_v4 = vld [vmem:[%s2038_s1 + $0x60] sm:$0xff]  ;;  %v1234_v5 = vld [vmem:[%s2038_s1 + $0x58] sm:$0xff]  ;;  %v1233_v6 = vld [vmem:[%s2038_s1 + $0x50] sm:$0xff] }
  0x11   : >> { %1421 = vmatpush.msra.mxu3 %v1238_v1  ;;  %246 = vmatpush.msra.mxu0 %v1238_v1  ;;  %v1232_v7 = vld [vmem:[%s2038_s1 + $0x48] sm:$0xff]  ;;  %s1579_s14 = scalar_lea.vmem %s1549_s23, %s178_s8  ;;  %v1231_v8 = vld [vmem:[%s2038_s1 + $0x40] sm:$0xff]  ;;  %v1262_v11 = vld [vmem:[%s2038_s1 + $0xb8] sm:$0xff] }
  0x12   : >> { %1422 = vmatpush.msra.mxu1 %v1237_v2  ;;  %1423 = vmatpush.msra.mxu2 %v1237_v2  ;;  %v198_v9 = vld [vmem:[%s1579_s14 + $0x11] sm:$0xff]  ;;  %v200_v10 = vld [vmem:[%s1579_s14 + $0x21] sm:$0xff]  ;;  %v201_v24 = vld [vmem:[%s1579_s14 + $0x29] sm:$0xff] }
  0x13   : >> { %1424 = vmatpush.msra.mxu3 %v1237_v2  ;;  %247 = vmatpush.msra.mxu0 %v1237_v2  ;;  %v195_v12 = vld [vmem:[%s2038_s1 + $0x38] sm:$0xff]  ;;  %v1261_v14 = vld [vmem:[%s2038_s1 + $0xb0] sm:$0xff]  ;;  %v1260_v17 = vld [vmem:[%s2038_s1 + $0xa8] sm:$0xff] }
  0x14   : >> { %1425 = vmatpush.msra.mxu1 %v1236_v3  ;;  %1426 = vmatpush.msra.mxu2 %v1236_v3  ;;  %v202_v13 = vld [vmem:[%s1579_s14 + $0x31] sm:$0xff]  ;;  %v193_v19 = vld [vmem:[%s2038_s1 + $0x28] sm:$0xff]  ;;  %v1259_v21 = vld [vmem:[%s2038_s1 + $0xa0] sm:$0xff] }
  0x15   : >> { %1427 = vmatpush.msra.mxu3 %v1236_v3  ;;  %248 = vmatpush.msra.mxu0 %v1236_v3  ;;  %v1286_v15 = vld [vmem:[%s2038_s1 + $0xf8] sm:$0xff]  ;;  %v194_v16 = vld [vmem:[%s2038_s1 + $0x30] sm:$0xff]  ;;  %v196_v20 = vld [vmem:[%s1579_s14 + $0x1] sm:$0xff] }
  0x16   : >> { %1428 = vmatpush.msra.mxu1 %v1235_v4  ;;  %1429 = vmatpush.msra.mxu2 %v1235_v4  ;;  %v1285_v18 = vld [vmem:[%s2038_s1 + $0xf0] sm:$0xff]  ;;  %v1284_v22 = vld [vmem:[%s2038_s1 + $0xe8] sm:$0xff]  ;;  %v192_v23 = vld [vmem:[%s2038_s1 + $0x20] sm:$0xff] }
  0x17   : >> { %1430 = vmatpush.msra.mxu3 %v1235_v4  ;;  %249 = vmatpush.msra.mxu0 %v1235_v4  ;;  %v199_v25 = vld [vmem:[%s1579_s14 + $0x19] sm:$0xff]  ;;  %v1257_v30 = vld [vmem:[%s2038_s1 + $0x90] sm:$0xff]  ;;  %v1256_v34 = vld [vmem:[%s2038_s1 + $0x88] sm:$0xff] }
  0x18   : >> { %1431 = vmatpush.msra.mxu1 %v1234_v5  ;;  %1432 = vmatpush.msra.mxu2 %v1234_v5  ;;  %v1258_v26 = vld [vmem:[%s2038_s1 + $0x98] sm:$0xff]  ;;  %v1283_v27 = vld [vmem:[%s2038_s1 + $0xe0] sm:$0xff]  ;;  %v190_v33 = vld [vmem:[%s2038_s1 + $0x10] sm:$0xff] }
  0x19   : >> { %1433 = vmatpush.msra.mxu3 %v1234_v5  ;;  %250 = vmatpush.msra.mxu0 %v1234_v5  ;;  %v191_v28 = vld [vmem:[%s2038_s1 + $0x18] sm:$0xff]  ;;  %v1281_v35 = vld [vmem:[%s2038_s1 + $0xd0] sm:$0xff]  ;;  %v189_v37 = vld [vmem:[%s2038_s1 + $0x8] sm:$0xff] }
  0x1a   : >> { %1434 = vmatpush.msra.mxu1 %v1233_v6  ;;  %1435 = vmatpush.msra.mxu2 %v1233_v6  ;;  %v203_v29 = vld [vmem:[%s1579_s14 + $0x39] sm:$0xff]  ;;  %v1309_v36 = vld [vmem:[%s2038_s1 + $0x130] sm:$0xff]  ;;  %v1280_v39 = vld [vmem:[%s2038_s1 + $0xc8] sm:$0xff] }
  0x1b   : >> { %1436 = vmatpush.msra.mxu3 %v1233_v6  ;;  %251 = vmatpush.msra.mxu0 %v1233_v6  ;;  %v1282_v31 = vld [vmem:[%s2038_s1 + $0xd8] sm:$0xff]  ;;  %v1255_v38 = vld [vmem:[%s2038_s1 + $0x80] sm:$0xff]  ;;  %v1308_v40 = vld [vmem:[%s2038_s1 + $0x128] sm:$0xff] }
  0x1c   : >> { %1437 = vmatpush.msra.mxu1 %v1232_v7  ;;  %1438 = vmatpush.msra.mxu2 %v1232_v7  ;;  %v1310_v32 = vld [vmem:[%s2038_s1 + $0x138] sm:$0xff]  ;;  %v188_v41 = vld [vmem:[%s2038_s1] sm:$0xff]  ;;  %v197_v47 = vld [vmem:[%s1579_s14 + $0x9] sm:$0xff] }
  0x1d   : >> { %1439 = vmatpush.msra.mxu3 %v1232_v7  ;;  %252 = vmatpush.msra.mxu0 %v1232_v7  ;;  %v344_v42 = vld [vmem:[%s1579_s14 + $0x2] sm:$0xff]  ;;  %v1358_v46 = vld [vmem:[%s2038_s1 + $0x1b8] sm:$0xff]  ;;  %v1357_v52 = vld [vmem:[%s2038_s1 + $0x1b0] sm:$0xff] }
  0x1e   : >> { %1440 = vmatpush.msra.mxu1 %v1231_v8  ;;  %1441 = vmatpush.msra.mxu2 %v1231_v8  ;;  %v180_v43 = vld [vmem:[%s1579_s14] sm:$0xff]  ;;  %v1271_v48 = vld [vmem:[%s1579_s14 + $0x48] sm:$0xff]  ;;  %v1306_v49 = vld [vmem:[%s2038_s1 + $0x118] sm:$0xff] }
  0x1f   : >> { %1241 = vmatmul.msk.f32.vlgmr.msra.gmra.mxu1 %vm213_vm0, %v198_v9  ;;  %1243 = vmatmul.msk.f32.vlgmr.msra.gmra.mxu2 %vm213_vm0, %v200_v10  ;;  %v1279_v44 = vld [vmem:[%s2038_s1 + $0xc0] sm:$0xff]  ;;  %v1382_v50 = vld [vmem:[%s2038_s1 + $0x1f8] sm:$0xff]  ;;  %v1305_v53 = vld [vmem:[%s2038_s1 + $0x110] sm:$0xff] }
  0x20   : >> { %393 = vmatpush.msrb.mxu2 %v1262_v11  ;;  %1442 = vmatpush.msra.mxu3 %v1231_v8  ;;  %v1307_v45 = vld [vmem:[%s2038_s1 + $0x120] sm:$0xff]  ;;  %v1334_v51 = vld [vmem:[%s2038_s1 + $0x178] sm:$0xff]  ;;  %v1381_v54 = vld [vmem:[%s2038_s1 + $0x1f0] sm:$0xff] }
  0x21   : >> { %311 = vmatpush.msrb.mxu1 %v195_v12  ;;  %1245 = vmatmul.msk.f32.vlgmr.msra.gmra.mxu3 %vm213_vm0, %v202_v13  ;;  %v1333_v55 = vld [vmem:[%s2038_s1 + $0x170] sm:$0xff]  ;;  %v1356_v56 = vld [vmem:[%s2038_s1 + $0x1a8] sm:$0xff]  ;;  %v1303_v61 = vld [vmem:[%s2038_s1 + $0x100] sm:$0xff] }
  0x22   : >> { %394 = vmatpush.msrb.mxu2 %v1261_v14  ;;  %486 = vmatpush.msrb.mxu3 %v1286_v15  ;;  %v1304_v57 = vld [vmem:[%s2038_s1 + $0x108] sm:$0xff]  ;;  %v1272_v63 = vld [vmem:[%s1579_s14 + $0x50] sm:$0xff]  ;;  %v1406_v2 = vld [vmem:[%s2038_s1 + $0x238] sm:$0xff] }
  0x23   : >> { %312 = vmatpush.msrb.mxu1 %v194_v16  ;;  %253 = vmatpush.msra.mxu0 %v1231_v8  ;;  %v345_v58 = vld [vmem:[%s1579_s14 + $0xa] sm:$0xff]  ;;  %v1355_v3 = vld [vmem:[%s2038_s1 + $0x1a0] sm:$0xff]  ;;  %v1354_v7 = vld [vmem:[%s2038_s1 + $0x198] sm:$0xff] }
  0x24   : >> { %395 = vmatpush.msrb.mxu2 %v1260_v17  ;;  %487 = vmatpush.msrb.mxu3 %v1285_v18  ;;  %v181_v59 = vld [vmem:[%s1579_s14 + $0x8] sm:$0xff]  ;;  %v1379_v4 = vld [vmem:[%s2038_s1 + $0x1e0] sm:$0xff]  ;;  %v1405_v6 = vld [vmem:[%s2038_s1 + $0x230] sm:$0xff] }
  0x25   : >> { %313 = vmatpush.msrb.mxu1 %v193_v19  ;;  %1239 = vmatmul.msk.f32.vlgmr.msra.gmra.mxu0 %vm213_vm0, %v196_v20  ;;  %v1380_v60 = vld [vmem:[%s2038_s1 + $0x1e8] sm:$0xff]  ;;  %v1331_v5 = vld [vmem:[%s2038_s1 + $0x160] sm:$0xff]  ;;  %v1378_v8 = vld [vmem:[%s2038_s1 + $0x1d8] sm:$0xff] }
  0x26   : >> { %396 = vmatpush.msrb.mxu2 %v1259_v21  ;;  %488 = vmatpush.msrb.mxu3 %v1284_v22  ;;  %v1332_v62 = vld [vmem:[%s2038_s1 + $0x168] sm:$0xff]  ;;  %v1330_v9 = vld [vmem:[%s2038_s1 + $0x158] sm:$0xff]  ;;  %v182_v12 = vld [vmem:[%s1579_s14 + $0x10] sm:$0xff] }
  0x27   : >> { %314 = vmatpush.msrb.mxu1 %v192_v23  ;;  %1244 = vmatmul.msk.f32.gmra.mxu2 %vm213_vm0, %v201_v24  ;;  %v1295_v1 = vld [vmem:[%s1579_s14 + $0x49] sm:$0xff]  ;;  %v346_v10 = vld [vmem:[%s1579_s14 + $0x12] sm:$0xff]  ;;  %v1403_v14 = vld [vmem:[%s2038_s1 + $0x220] sm:$0xff] }
  0x28   : >> { %1242 = vmatmul.msk.f32.gmra.mxu1 %vm213_vm0, %v199_v25  ;;  %397 = vmatpush.msrb.mxu2 %v1258_v26  ;;  %v1404_v11 = vld [vmem:[%s2038_s1 + $0x228] sm:$0xff]  ;;  %v1353_v13 = vld [vmem:[%s2038_s1 + $0x190] sm:$0xff]  ;;  %v1273_v16 = vld [vmem:[%s1579_s14 + $0x58] sm:$0xff] }
  0x29   : >> { %489 = vmatpush.msrb.mxu3 %v1283_v27  ;;  %315 = vmatpush.msrb.mxu1 %v191_v28  ;;  %v1377_v15 = vld [vmem:[%s2038_s1 + $0x1d0] sm:$0xff]  ;;  %v1402_v18 = vld [vmem:[%s2038_s1 + $0x218] sm:$0xff]  ;;  %v1352_v20 = vld [vmem:[%s2038_s1 + $0x188] sm:$0xff] }
  0x2a   : >> { %1246 = vmatmul.msk.f32.gmra.mxu3 %vm213_vm0, %v203_v29  ;;  %398 = vmatpush.msrb.mxu2 %v1257_v30  ;;  %v1296_v17 = vld [vmem:[%s1579_s14 + $0x51] sm:$0xff]  ;;  %v1376_v21 = vld [vmem:[%s2038_s1 + $0x1c8] sm:$0xff]  ;;  %v347_v24 = vld [vmem:[%s1579_s14 + $0x1a] sm:$0xff] }
  0x2b   : >> { %490 = vmatpush.msrb.mxu3 %v1282_v31  ;;  %576 = vmatpush.msrb.mxu0 %v1310_v32  ;;  %v1329_v19 = vld [vmem:[%s2038_s1 + $0x150] sm:$0xff]  ;;  %v1328_v23 = vld [vmem:[%s2038_s1 + $0x148] sm:$0xff]  ;;  %v183_v25 = vld [vmem:[%s1579_s14 + $0x18] sm:$0xff] }
  0x2c   : >> { %316 = vmatpush.msrb.mxu1 %v190_v33  ;;  %399 = vmatpush.msrb.mxu2 %v1256_v34  ;;  %v1401_v22 = vld [vmem:[%s2038_s1 + $0x210] sm:$0xff]  ;;  %v1274_v26 = vld [vmem:[%s1579_s14 + $0x60] sm:$0xff]  ;;  %v1400_v30 = vld [vmem:[%s2038_s1 + $0x208] sm:$0xff] }
  0x2d   : >> { %491 = vmatpush.msrb.mxu3 %v1281_v35  ;;  %577 = vmatpush.msrb.mxu0 %v1309_v36  ;;  %v1297_v27 = vld [vmem:[%s1579_s14 + $0x59] sm:$0xff]  ;;  %v348_v32 = vld [vmem:[%s1579_s14 + $0x22] sm:$0xff] }
  0x2e   : >> { %317 = vmatpush.msrb.mxu1 %v189_v37  ;;  %400 = vmatpush.msrb.mxu2 %v1255_v38  ;;  %v1351_v28 = vld [vmem:[%s2038_s1 + $0x180] sm:$0xff]  ;;  %v1275_v34 = vld [vmem:[%s1579_s14 + $0x68] sm:$0xff] }
  0x2f   : >> { %492 = vmatpush.msrb.mxu3 %v1280_v39  ;;  %578 = vmatpush.msrb.mxu0 %v1308_v40  ;;  %v1375_v29 = vld [vmem:[%s2038_s1 + $0x1c0] sm:$0xff]  ;;  %v349_v37 = vld [vmem:[%s1579_s14 + $0x2a] sm:$0xff] }
  0x30   : >> { %318 = vmatpush.msrb.mxu1 %v188_v41  ;;  %1263 = vmatmul.msk.f32.vlgmr.msrb.gmra.mxu2 %vm213_vm0, %v344_v42  ;;  %v1327_v31 = vld [vmem:[%s2038_s1 + $0x140] sm:$0xff]  ;;  %v185_v38 = vld [vmem:[%s1579_s14 + $0x28] sm:$0xff]  ;;  %v1276_v39 = vld [vmem:[%s1579_s14 + $0x70] sm:$0xff] }
  0x31   : >> { %1247 = vmatmul.msk.f32.vlgmr.msrb.gmra.mxu1 %vm213_vm0, %v180_v43  ;;  %493 = vmatpush.msrb.mxu3 %v1279_v44  ;;  %v184_v33 = vld [vmem:[%s1579_s14 + $0x20] sm:$0xff]  ;;  %v1299_v40 = vld [vmem:[%s1579_s14 + $0x69] sm:$0xff]  ;;  %v350_v41 = vld [vmem:[%s1579_s14 + $0x32] sm:$0xff] }
  0x32   : >> { %579 = vmatpush.msrb.mxu0 %v1307_v45  ;;  %759 = vmatpush.msra.mxu2 %v1358_v46  ;;  %v1298_v35 = vld [vmem:[%s1579_s14 + $0x61] sm:$0xff]  ;;  %v186_v42 = vld [vmem:[%s1579_s14 + $0x30] sm:$0xff]  ;;  %v1277_v43 = vld [vmem:[%s1579_s14 + $0x78] sm:$0xff] }
  0x33   : >> { %1240 = vmatmul.msk.f32.gmra.mxu0 %vm213_vm0, %v197_v47  ;;  %1287 = vmatmul.msk.f32.vlgmr.msrb.gmra.mxu3 %vm213_vm0, %v1271_v48  ;;  %v1399_v36 = vld [vmem:[%s2038_s1 + $0x200] sm:$0xff]  ;;  %v1300_v44 = vld [vmem:[%s1579_s14 + $0x71] sm:$0xff] }
  0x34   : >> { %580 = vmatpush.msrb.mxu0 %v1306_v49  ;;  %849 = vmatpush.msra.mxu3 %v1382_v50  ;;  %v351_v45 = vld [vmem:[%s1579_s14 + $0x3a] sm:$0xff]  ;;  %v1343_v49 = vld [vmem:[%s1579_s14 + $0x90] sm:$0xff] }
  0x35   : >> { %666 = vmatpush.msra.mxu1 %v1334_v51  ;;  %760 = vmatpush.msra.mxu2 %v1357_v52  ;;  %v187_v46 = vld [vmem:[%s1579_s14 + $0x38] sm:$0xff]  ;;  %v1278_v47 = vld [vmem:[%s1579_s14 + $0x80] sm:$0xff]  ;;  %v1319_v50 = vld [vmem:[%s1579_s14 + $0x4a] sm:$0xff] }
  0x36   : >> { %581 = vmatpush.msrb.mxu0 %v1305_v53  ;;  %850 = vmatpush.msra.mxu3 %v1381_v54  ;;  %v1301_v48 = vld [vmem:[%s1579_s14 + $0x79] sm:$0xff]  ;;  %v1302_v51 = vld [vmem:[%s1579_s14 + $0x81] sm:$0xff]  ;;  %v1367_v52 = vld [vmem:[%s1579_s14 + $0x91] sm:$0xff] }
  0x37   : >> { %667 = vmatpush.msra.mxu1 %v1333_v55  ;;  %761 = vmatpush.msra.mxu2 %v1356_v56  ;;  %v1344_v53 = vld [vmem:[%s1579_s14 + $0x98] sm:$0xff] }
  0x38   : >> { %582 = vmatpush.msrb.mxu0 %v1304_v57  ;;  %1264 = vmatmul.msk.f32.gmra.mxu2 %vm213_vm0, %v345_v58  ;;  %v1320_v54 = vld [vmem:[%s1579_s14 + $0x52] sm:$0xff]  ;;  %v1345_v57 = vld [vmem:[%s1579_s14 + $0xa0] sm:$0xff] }
  0x39   : >> { %1248 = vmatmul.msk.f32.gmra.mxu1 %vm213_vm0, %v181_v59  ;;  %851 = vmatpush.msra.mxu3 %v1380_v60  ;;  %v1368_v55 = vld [vmem:[%s1579_s14 + $0x99] sm:$0xff]  ;;  %v1369_v59 = vld [vmem:[%s1579_s14 + $0xa1] sm:$0xff] }
  0x3a   : >> { %583 = vmatpush.msrb.mxu0 %v1303_v61  ;;  %668 = vmatpush.msra.mxu1 %v1332_v62  ;;  %v1391_v56 = vld [vmem:[%s1579_s14 + $0x92] sm:$0xff]  ;;  %v1321_v58 = vld [vmem:[%s1579_s14 + $0x5a] sm:$0xff]  ;;  %v1346_v61 = vld [vmem:[%s1579_s14 + $0xa8] sm:$0xff] }
  0x3b   : >> { %1288 = vmatmul.msk.f32.gmra.mxu3 %vm213_vm0, %v1272_v63  ;;  %1311 = vmatmul.msk.f32.vlgmr.msrb.gmra.mxu0 %vm213_vm0, %v1295_v1  ;;  %v1392_v60 = vld [vmem:[%s1579_s14 + $0x9a] sm:$0xff]  ;;  %v1322_v62 = vld [vmem:[%s1579_s14 + $0x62] sm:$0xff] }
  0x3c   : >> { %939 = vmatpush.msra.mxu0 %v1406_v2  ;;  %762 = vmatpush.msra.mxu2 %v1355_v3  ;;  %v1370_v63 = vld [vmem:[%s1579_s14 + $0xa9] sm:$0xff] }
  0x3d   : >> { %852 = vmatpush.msra.mxu3 %v1379_v4  ;;  %669 = vmatpush.msra.mxu1 %v1331_v5  ;;  %v1393_v1 = vld [vmem:[%s1579_s14 + $0xa2] sm:$0xff]  ;;  %v1347_v2 = vld [vmem:[%s1579_s14 + $0xb0] sm:$0xff] }
  0x3e   : >> { %940 = vmatpush.msra.mxu0 %v1405_v6  ;;  %763 = vmatpush.msra.mxu2 %v1354_v7  ;;  %v1323_v3 = vld [vmem:[%s1579_s14 + $0x6a] sm:$0xff]  ;;  %v1348_v6 = vld [vmem:[%s1579_s14 + $0xb8] sm:$0xff] }
  0x3f   : >> { %853 = vmatpush.msra.mxu3 %v1378_v8  ;;  %670 = vmatpush.msra.mxu1 %v1330_v9  ;;  %v1371_v4 = vld [vmem:[%s1579_s14 + $0xb1] sm:$0xff]  ;;  %v1372_v8 = vld [vmem:[%s1579_s14 + $0xb9] sm:$0xff] }
  0x40   : >> { %1265 = vmatmul.msk.f32.gmra.mxu2 %vm213_vm0, %v346_v10  ;;  %941 = vmatpush.msra.mxu0 %v1404_v11  ;;  %v1394_v5 = vld [vmem:[%s1579_s14 + $0xaa] sm:$0xff]  ;;  %v1324_v7 = vld [vmem:[%s1579_s14 + $0x72] sm:$0xff]  ;;  %v1349_v11 = vld [vmem:[%s1579_s14 + $0xc0] sm:$0xff] }
  0x41   : >> { %1249 = vmatmul.msk.f32.gmra.mxu1 %vm213_vm0, %v182_v12  ;;  %764 = vmatpush.msra.mxu2 %v1353_v13  ;;  %v1395_v9 = vld [vmem:[%s1579_s14 + $0xb2] sm:$0xff]  ;;  %v1325_v12 = vld [vmem:[%s1579_s14 + $0x7a] sm:$0xff] }
  0x42   : >> { %942 = vmatpush.msra.mxu0 %v1403_v14  ;;  %854 = vmatpush.msra.mxu3 %v1377_v15  ;;  %v1373_v13 = vld [vmem:[%s1579_s14 + $0xc1] sm:$0xff] }
  0x43   : >> { %1289 = vmatmul.msk.f32.gmra.mxu3 %vm213_vm0, %v1273_v16  ;;  %1312 = vmatmul.msk.f32.gmra.mxu0 %vm213_vm0, %v1296_v17  ;;  %v1396_v14 = vld [vmem:[%s1579_s14 + $0xba] sm:$0xff] }
  0x44   : >> { %943 = vmatpush.msra.mxu0 %v1402_v18  ;;  %671 = vmatpush.msra.mxu1 %v1329_v19  ;;  %v1350_v18 = vld [vmem:[%s1579_s14 + $0xc8] sm:$0xff] }
  0x45   : >> { %765 = vmatpush.msra.mxu2 %v1352_v20  ;;  %855 = vmatpush.msra.mxu3 %v1376_v21  ;;  %v1326_v20 = vld [vmem:[%s1579_s14 + $0x82] sm:$0xff] }
  0x46   : >> { %944 = vmatpush.msra.mxu0 %v1401_v22  ;;  %672 = vmatpush.msra.mxu1 %v1328_v23  ;;  %v1374_v21 = vld [vmem:[%s1579_s14 + $0xc9] sm:$0xff] }
  0x47   : >> { %766 = vmatpush.msra.mxu2 %v1351_v28  ;;  %856 = vmatpush.msra.mxu3 %v1375_v29  ;;  %v1397_v22 = vld [vmem:[%s1579_s14 + $0xc2] sm:$0xff] }
  0x48   : >> { %1266 = vmatmul.msk.f32.gmra.mxu2 %vm213_vm0, %v347_v24  ;;  %945 = vmatpush.msra.mxu0 %v1400_v30 }
  0x49   : >> { %1250 = vmatmul.msk.f32.gmra.mxu1 %vm213_vm0, %v183_v25 }
  0x4a   : >> { %673 = vmatpush.msra.mxu1 %v1327_v31  ;;  %946 = vmatpush.msra.mxu0 %v1399_v36 }
  0x4b   : >> { %1290 = vmatmul.msk.f32.gmra.mxu3 %vm213_vm0, %v1274_v26  ;;  %1313 = vmatmul.msk.f32.gmra.mxu0 %vm213_vm0, %v1297_v27  ;;  %v1398_v27 = vld [vmem:[%s1579_s14 + $0xca] sm:$0xff]  ;;  %s1415_s14 = sshll.u32 %s1506_s24, 6  ;;  %s177_s24 = sadd.s32 1, %s1506_s24  }
  0x4c   : >> { %s1992_s11 = scalar_lea.vmem %s1544_s20, %s1415_s14  ;;  %p174_p4 = scmp.ge.s32.totalorder %s177_s24, 64  }
  0x50   : >> { %1267 = vmatmul.msk.f32.gmra.mxu2 %vm213_vm0, %v348_v32 }
  0x51   : >> { %1251 = vmatmul.msk.f32.gmra.mxu1 %vm213_vm0, %v184_v33 }
  0x53   : >> { %1291 = vmatmul.msk.f32.gmra.mxu3 %vm213_vm0, %v1275_v34  ;;  %1314 = vmatmul.msk.f32.gmra.mxu0 %vm213_vm0, %v1298_v35 }
  0x58   : >> { %1268 = vmatmul.msk.f32.gmra.mxu2 %vm213_vm0, %v349_v37 }
  0x59   : >> { %1252 = vmatmul.msk.f32.gmra.mxu1 %vm213_vm0, %v185_v38 }
  0x5b   : >> { %1292 = vmatmul.msk.f32.gmra.mxu3 %vm213_vm0, %v1276_v39  ;;  %1315 = vmatmul.msk.f32.gmra.mxu0 %vm213_vm0, %v1299_v40 }
  0x60   : >> { %1269 = vmatmul.msk.f32.gmra.mxu2 %vm213_vm0, %v350_v41 }
  0x61   : >> { %1253 = vmatmul.msk.f32.gmra.mxu1 %vm213_vm0, %v186_v42 }
  0x63   : >> { %1293 = vmatmul.msk.f32.gmra.mxu3 %vm213_vm0, %v1277_v43  ;;  %1316 = vmatmul.msk.f32.gmra.mxu0 %vm213_vm0, %v1300_v44 }
  0x68   : >> { %1270 = vmatmul.msk.f32.gmra.mxu2 %vm213_vm0, %v351_v45 }
  0x69   : >> { %1254 = vmatmul.msk.f32.gmra.mxu1 %vm213_vm0, %v187_v46 }
  0x6b   : >> { %1294 = vmatmul.msk.f32.gmra.mxu3 %vm213_vm0, %v1278_v47  ;;  %1317 = vmatmul.msk.f32.gmra.mxu0 %vm213_vm0, %v1301_v48 }
  0x70   : >> { %1359 = vmatmul.msk.f32.vlgmr.msra.gmra.mxu2 %vm213_vm0, %v1343_v49 }
  0x71   : >> { %1335 = vmatmul.msk.f32.vlgmr.msra.gmra.mxu1 %vm213_vm0, %v1319_v50 }
  0x73   : >> { %1318 = vmatmul.msk.f32.gmra.mxu0 %vm213_vm0, %v1302_v51  ;;  %1383 = vmatmul.msk.f32.vlgmr.msra.gmra.mxu3 %vm213_vm0, %v1367_v52 }
  0x78   : >> { %1360 = vmatmul.msk.f32.gmra.mxu2 %vm213_vm0, %v1344_v53 }
  0x79   : >> { %1336 = vmatmul.msk.f32.gmra.mxu1 %vm213_vm0, %v1320_v54 }
  0x7b   : >> { %1384 = vmatmul.msk.f32.gmra.mxu3 %vm213_vm0, %v1368_v55  ;;  %1407 = vmatmul.msk.f32.vlgmr.msra.gmra.mxu0 %vm213_vm0, %v1391_v56 }
  0x80   : >> { %1361 = vmatmul.msk.f32.gmra.mxu2 %vm213_vm0, %v1345_v57 }
  0x81   : >> { %1337 = vmatmul.msk.f32.gmra.mxu1 %vm213_vm0, %v1321_v58 }
  0x83   : >> { %1385 = vmatmul.msk.f32.gmra.mxu3 %vm213_vm0, %v1369_v59  ;;  %1408 = vmatmul.msk.f32.gmra.mxu0 %vm213_vm0, %v1392_v60 }
  0x88   : >> { %1362 = vmatmul.msk.f32.gmra.mxu2 %vm213_vm0, %v1346_v61 }
  0x89   : >> { %1338 = vmatmul.msk.f32.gmra.mxu1 %vm213_vm0, %v1322_v62 }
  0x8b   : >> { %1386 = vmatmul.msk.f32.gmra.mxu3 %vm213_vm0, %v1370_v63  ;;  %1409 = vmatmul.msk.f32.gmra.mxu0 %vm213_vm0, %v1393_v1 }
  0x90   : >> { %1363 = vmatmul.msk.f32.gmra.mxu2 %vm213_vm0, %v1347_v2 }
  0x91   : >> { %1339 = vmatmul.msk.f32.gmra.mxu1 %vm213_vm0, %v1323_v3 }
  0x93   : >> { %1387 = vmatmul.msk.f32.gmra.mxu3 %vm213_vm0, %v1371_v4  ;;  %1410 = vmatmul.msk.f32.gmra.mxu0 %vm213_vm0, %v1394_v5 }
  0x98   : >> { %1364 = vmatmul.msk.f32.gmra.mxu2 %vm213_vm0, %v1348_v6 }
  0x99   : >> { %1340 = vmatmul.msk.f32.gmra.mxu1 %vm213_vm0, %v1324_v7 }
  0x9b   : >> { %1388 = vmatmul.msk.f32.gmra.mxu3 %vm213_vm0, %v1372_v8  ;;  %1411 = vmatmul.msk.f32.gmra.mxu0 %vm213_vm0, %v1395_v9 }
  0x9c   : >> { %v1902_v10 = vpop.f32.mrf.mxu1 }
  0xa0   : >> { %1365 = vmatmul.msk.f32.gmra.mxu2 %vm213_vm0, %v1349_v11 }
  0xa1   : >> { %1341 = vmatmul.msk.f32.gmra.mxu1 %vm213_vm0, %v1325_v12  ;;  %v1966_v12 = vperm.slane %v1539_v0, 0 }
  0xa2   : >> { %v1910_v15 = vpop.f32.mrf.mxu2  ;;  %v255_v19 = vpop.f32.mrf.mxu0 }
  0xa3   : >> { %1389 = vmatmul.msk.f32.gmra.mxu3 %vm213_vm0, %v1373_v13  ;;  %1412 = vmatmul.msk.f32.gmra.mxu0 %vm213_vm0, %v1396_v14 }
  0xa4   : >> { %v1914_v16 = vpop.f32.mrf.mxu3 }
  0xa5   : >> { %v1916_v17 = vpop.f32.mrf.mxu1 }
  0xa8   : >> { %1366 = vmatmul.msk.f32.gmra.mxu2 %vm213_vm0, %v1350_v18 }
  0xa9   : >> { %1342 = vmatmul.msk.f32.gmra.mxu1 %vm213_vm0, %v1326_v20 }
  0xaa   : >> { %v1924_v23 = vpop.f32.mrf.mxu2 }
  0xab   : >> { %1390 = vmatmul.msk.f32.gmra.mxu3 %vm213_vm0, %v1374_v21  ;;  %1413 = vmatmul.msk.f32.gmra.mxu0 %vm213_vm0, %v1397_v22 }
  0xad   : >> { %v1928_v24 = vpop.f32.mrf.mxu3 }
  0xae   : >> { %v320_v25 = vpop.f32.mrf.mxu1 }
  0xaf   : >> { %v321_v53 = vadd.f32 %v320_v25, %v255_v19 }
  0xb0   : >> { %v258_v26 = vpop.f32.mrf.mxu0 }
  0xb3   : >> { %1414 = vmatmul.msk.f32.gmra.mxu0 %vm213_vm0, %v1398_v27  ;;  %v402_v28 = vpop.f32.mrf.mxu2 }
  0xb4   : >> { %v426_v56 = vadd.f32 %v402_v28, %v321_v53 }
  0xb6   : >> { %v323_v29 = vpop.f32.mrf.mxu1  ;;  %v495_v30 = vpop.f32.mrf.mxu3 }
  0xb7   : >> { %v519_v59 = vadd.f32 %v495_v30, %v426_v56  ;;  %v324_v60 = vadd.f32 %v323_v29, %v258_v26 }
  0xb8   : >> { %v585_v31 = vpop.f32.mrf.mxu0 }
  0xb9   : >> { %v609_v63 = vadd.f32 %v585_v31, %v519_v59 }
  0xbb   : >> { %v405_v32 = vpop.f32.mrf.mxu2 }
  0xbc   : >> { %v427_v1 = vadd.f32 %v405_v32, %v324_v60 }
  0xbe   : >> { %v326_v33 = vpop.f32.mrf.mxu1  ;;  %v498_v34 = vpop.f32.mrf.mxu3 }
  0xbf   : >> { %v520_v5 = vadd.f32 %v498_v34, %v427_v1  ;;  %v327_v7 = vadd.f32 %v326_v33, %v1902_v10 }
  0xc0   : >> { %v588_v35 = vpop.f32.mrf.mxu0 }
  0xc1   : >> { %v610_v13 = vadd.f32 %v588_v35, %v520_v5 }
  0xc3   : >> { %v408_v36 = vpop.f32.mrf.mxu2 }
  0xc4   : >> { %v428_v14 = vadd.f32 %v408_v36, %v327_v7 }
  0xc6   : >> { %v329_v37 = vpop.f32.mrf.mxu1  ;;  %v501_v38 = vpop.f32.mrf.mxu3 }
  0xc7   : >> { %v521_v25 = vadd.f32 %v501_v38, %v428_v14  ;;  %v330_v28 = vadd.f32 %v329_v37, %v1916_v17 }
  0xc8   : >> { %v591_v39 = vpop.f32.mrf.mxu0 }
  0xc9   : >> { %v611_v32 = vadd.f32 %v591_v39, %v521_v25 }
  0xcb   : >> { %v411_v40 = vpop.f32.mrf.mxu2 }
  0xcc   : >> { %v429_v33 = vadd.f32 %v411_v40, %v330_v28 }
  0xce   : >> { %v332_v41 = vpop.f32.mrf.mxu1  ;;  %v504_v42 = vpop.f32.mrf.mxu3 }
  0xcf   : >> { %v522_v59 = vadd.f32 %v504_v42, %v429_v33 }
  0xd0   : >> { %v1932_v43 = vpop.f32.mrf.mxu0 }
  0xd1   : >> { %v612_v39 = vadd.f32 %v1932_v43, %v522_v59 }
  0xd3   : >> { %v1934_v44 = vpop.f32.mrf.mxu2 }
  0xd6   : >> { %v1936_v45 = vpop.f32.mrf.mxu1  ;;  %v1938_v46 = vpop.f32.mrf.mxu3 }
  0xd8   : >> { %v1940_v47 = vpop.f32.mrf.mxu0 }
  0xdb   : >> { %v1942_v48 = vpop.f32.mrf.mxu2 }
  0xde   : >> { %v1944_v49 = vpop.f32.mrf.mxu1  ;;  %v1946_v50 = vpop.f32.mrf.mxu3 }
  0xe0   : >> { %v1948_v51 = vpop.f32.mrf.mxu0 }
  0xe3   : >> { %v1950_v52 = vpop.f32.mrf.mxu2 }
  0xe6   : >> { %v1952_v54 = vpop.f32.mrf.mxu1  ;;  %v1954_v55 = vpop.f32.mrf.mxu3 }
  0xe8   : >> { %v1956_v57 = vpop.f32.mrf.mxu0 }
  0xeb   : >> { %v1958_v58 = vpop.f32.mrf.mxu2 }
  0xee   : >> { %v1960_v61 = vpop.f32.mrf.mxu3  ;;  %v675_v62 = vpop.f32.mrf.mxu1 }
  0xef   : >> { %v699_v3 = vadd.f32 %v675_v62, %v609_v63  ;;  %v333_v62 = vadd.f32 %v332_v41, %v1910_v15 }
  0xf0   : >> { %v1962_v2 = vpop.f32.mrf.mxu0 }
  0xf1   : >> { %v430_v40 = vadd.f32 %v1934_v44, %v333_v62 }
  0xf3   : >> { %v768_v4 = vpop.f32.mrf.mxu2  ;;  %v523_v15 = vadd.f32 %v1938_v46, %v430_v40 }
  0xf4   : >> { %v792_v6 = vadd.f32 %v768_v4, %v699_v3 }
  0xf6   : >> { %v678_v8 = vpop.f32.mrf.mxu1  ;;  %v858_v9 = vpop.f32.mrf.mxu3 }
  0xf7   : >> { %v882_v11 = vadd.f32 %v858_v9, %v792_v6  ;;  %v700_v20 = vadd.f32 %v678_v8, %v610_v13 }
  0xf8   : >> { %v948_v18 = vpop.f32.mrf.mxu0 }
  0xf9   : >> { %v972_v19 = vadd.f32 %v948_v18, %v882_v11  ;;  %v336_v11 = vadd.f32 %v1936_v45, %v1924_v23 }
  0xfb   : >> { %v983_v21 = vadd.f32 %v1966_v12, %v972_v19  ;;  %v771_v22 = vpop.f32.mrf.mxu2 }
  0xfc   : >> { %v793_v26 = vadd.f32 %v771_v22, %v700_v20  ;;  %v613_v20 = vadd.f32 %v1940_v47, %v523_v15 }
  0xfd   : >> { %v991_v27 = vsub.f32 0.0, %v983_v21  ;;  %v431_v21 = vadd.f32 %v1942_v48, %v336_v11 }
  0xfe   : >> { %v681_v10 = vpop.f32.mrf.mxu1  ;;  %v861_v29 = vpop.f32.mrf.mxu3 }
  0xff   : >> { %v999_v30 = vmul.f32 1.442695, %v991_v27  ;;  %v883_v31 = vadd.f32 %v861_v29, %v793_v26  ;;  %v701_v36 = vadd.f32 %v681_v10, %v611_v32  ;;  %v524_v10 = vadd.f32 %v1946_v50, %v431_v21 }
 0x100   : >> { %v951_v34 = vpop.f32.mrf.mxu0  ;;  %v339_v32 = vadd.f32 %v1944_v49, %v1914_v16 }
 0x101   : >> { %1460 = vpow2.f32 %v999_v30  ;;  %v973_v35 = vadd.f32 %v951_v34, %v883_v31  ;;  %v614_v50 = vadd.f32 %v1948_v51, %v524_v10 }
 0x103   : >> { %v984_v53 = vadd.f32 %v1966_v12, %v973_v35  ;;  %v774_v56 = vpop.f32.mrf.mxu2 }
 0x104   : >> { %v794_v60 = vadd.f32 %v774_v56, %v701_v36 }
 0x105   : >> { %v992_v38 = vsub.f32 0.0, %v984_v53 }
 0x106   : >> { %v684_v63 = vpop.f32.mrf.mxu1  ;;  %v864_v17 = vpop.f32.mrf.mxu3 }
 0x107   : >> { %v1461_v37 = vpop.eup %1460  ;;  %v1001_v1 = vmul.f32 1.442695, %v992_v38  ;;  %v884_v3 = vadd.f32 %v864_v17, %v794_v60  ;;  %v702_v7 = vadd.f32 %v684_v63, %v612_v39  ;;  %v432_v60 = vadd.f32 %v1950_v52, %v339_v32 }
 0x108   : >> { %v1015_v4 = vadd.f32 1.0, %v1461_v37  ;;  %v954_v5 = vpop.f32.mrf.mxu0 }
 0x109   : >> { %1462 = vpow2.f32 %v1001_v1  ;;  %v974_v6 = vadd.f32 %v954_v5, %v884_v3  ;;  %v525_v3 = vadd.f32 %v1954_v55, %v432_v60 }
 0x10a   : >> { %1464 = vrcp.f32 %v1015_v4  ;;  %v1034_v29 = vand.u32 2147483648, %v1015_v4  ;;  %v1032_v48 = vand.u32 2147483647, %v1015_v4  ;;  %vm1028_vm2 = vweird.f32 %v1015_v4 }
 0x10b   : >> { %v985_v42 = vadd.f32 %v1966_v12, %v974_v6  ;;  %v777_v8 = vpop.f32.mrf.mxu2 }
 0x10c   : >> { %v795_v41 = vadd.f32 %v777_v8, %v702_v7  ;;  %v1035_v38 = vor.u32 1.1754944e-38, %v1034_v29  ;;  %vm1033_vm4 = vcmp.eq.f32.partialorder %v1032_v48, 8.507059e+37  ;;  %v342_v7 = vadd.f32 %v1952_v54, %v1928_v24 }
 0x10d   : >> { %v993_v9 = vsub.f32 0.0, %v985_v42 }
 0x10e   : >> { %v687_v13 = vpop.f32.mrf.mxu1  ;;  %v867_v43 = vpop.f32.mrf.mxu3 }
 0x10f   : >> { %v1463_v14 = vpop.eup %1462  ;;  %v1003_v44 = vmul.f32 1.442695, %v993_v9  ;;  %v885_v18 = vadd.f32 %v867_v43, %v795_v41  ;;  %v703_v23 = vadd.f32 %v687_v13, %v613_v20  ;;  %v615_v13 = vadd.f32 %v1956_v57, %v525_v3 }
 0x110   : >> { %v1465_v19 = vpop.eup %1464  ;;  %v1980_v22 = vadd.f32 1.0, %v1463_v14  ;;  %v957_v25 = vpop.f32.mrf.mxu0  ;;  %v433_v43 = vadd.f32 %v1958_v58, %v342_v7 }
 0x111   : >> { %v1024_v46 = vmul.f32 %v1465_v19, %v1015_v4  ;;  %1466 = vpow2.f32 %v1003_v44  ;;  %v975_v26 = vadd.f32 %v957_v25, %v885_v18  ;;  %vm1029_vm1 = vweird.f32 %v1465_v19 }
 0x112   : >> { %1468 = vrcp.f32 %v1980_v22  ;;  %vm1030_vm3 = vmor %vm1028_vm2, %vm1029_vm1  ;;  %v1049_v39 = vand.u32 2147483648, %v1980_v22  ;;  %v1047_v5 = vand.u32 2147483647, %v1980_v22  ;;  %vm1043_vm6 = vweird.f32 %v1980_v22 }
 0x113   : >> { %v1025_v45 = vsub.f32 1.0, %v1024_v46  ;;  %v986_v27 = vadd.f32 %v1966_v12, %v975_v26  ;;  %v780_v28 = vpop.f32.mrf.mxu2  ;;  %v526_v58 = vadd.f32 %v1960_v61, %v433_v43 }
 0x114   : >> { %v796_v47 = vadd.f32 %v780_v28, %v703_v23  ;;  %v1050_v14 = vor.u32 1.1754944e-38, %v1049_v39  ;;  %vm1048_vm8 = vcmp.eq.f32.partialorder %v1047_v5, 8.507059e+37 }
 0x115   : >> { %v1026_v30 = vmul.f32 %v1465_v19, %v1025_v45  ;;  %v994_v31 = vsub.f32 0.0, %v986_v27  ;;  %v616_v48 = vadd.f32 %v1962_v2, %v526_v58 }
 0x116   : >> { %v690_v33 = vpop.f32.mrf.mxu1  ;;  %v870_v34 = vpop.f32.mrf.mxu3 }
 0x117   : >> { %v1467_v35 = vpop.eup %1466  ;;  %v1027_v36 = vadd.f32 %v1465_v19, %v1026_v30  ;;  %v1005_v53 = vmul.f32 1.442695, %v994_v31  ;;  %v886_v56 = vadd.f32 %v870_v34, %v796_v47  ;;  %v704_v51 = vadd.f32 %v690_v33, %v614_v50 }
 0x118   : >> { %v1469_v59 = vpop.eup %1468  ;;  %v1994_v62 = vadd.f32 1.0, %v1467_v35  ;;  %v960_v16 = vpop.f32.mrf.mxu0 }
 0x119   : >> { %v1031_v49 = vsel %vm1030_vm3, %v1465_v19, %v1027_v36  ;;  %v1039_v63 = vmul.f32 %v1469_v59, %v1980_v22  ;;  %1470 = vpow2.f32 %v1005_v53  ;;  %v976_v37 = vadd.f32 %v960_v16, %v886_v56 }
 0x11a   : >> { %v1036_v17 = vsel %vm1033_vm4, %v1035_v38, %v1031_v49  ;;  %1472 = vrcp.f32 %v1994_v62  ;;  %vm1044_vm5 = vweird.f32 %v1469_v59  ;;  %v1064_v46 = vand.u32 2147483648, %v1994_v62 }
 0x11b   : >> { %1145 = vst [vmem:[%s1992_s11] sm:$0xff] %v1036_v17  ;;  %v1040_v52 = vsub.f32 1.0, %v1039_v63  ;;  %v783_v1 = vpop.f32.mrf.mxu2  ;;  %v987_v6 = vadd.f32 %v1966_v12, %v976_v37  ;;  %vm1045_vm7 = vmor %vm1043_vm6, %vm1044_vm5  ;;  %v1062_v45 = vand.u32 2147483647, %v1994_v62  ;;  %vm1058_vm10 = vweird.f32 %v1994_v62 }
 0x11c   : >> { %v797_v40 = vadd.f32 %v783_v1, %v704_v51  ;;  %v1065_v61 = vor.u32 1.1754944e-38, %v1064_v46 }
 0x11d   : >> { %v1041_v4 = vmul.f32 %v1469_v59, %v1040_v52  ;;  %v995_v9 = vsub.f32 0.0, %v987_v6  ;;  %vm1063_vm12 = vcmp.eq.f32.partialorder %v1062_v45, 8.507059e+37 }
 0x11e   : >> { %v693_v42 = vpop.f32.mrf.mxu1  ;;  %v873_v8 = vpop.f32.mrf.mxu3 }
 0x11f   : >> { %v1471_v15 = vpop.eup %1470  ;;  %v1042_v41 = vadd.f32 %v1469_v59, %v1041_v4  ;;  %v887_v55 = vadd.f32 %v873_v8, %v797_v40  ;;  %v1007_v19 = vmul.f32 1.442695, %v995_v9  ;;  %v705_v21 = vadd.f32 %v693_v42, %v615_v13 }
 0x120   : >> { %v1473_v11 = vpop.eup %1472  ;;  %v2008_v44 = vadd.f32 1.0, %v1471_v15  ;;  %v963_v18 = vpop.f32.mrf.mxu0 }
 0x121   : >> { %v1046_v24 = vsel %vm1045_vm7, %v1469_v59, %v1042_v41  ;;  %v1054_v54 = vmul.f32 %v1473_v11, %v1994_v62  ;;  %v977_v57 = vadd.f32 %v963_v18, %v887_v55  ;;  %vm1059_vm9 = vweird.f32 %v1473_v11 }
 0x122   : >> { %v1051_v20 = vsel %vm1048_vm8, %v1050_v14, %v1046_v24  ;;  %1474 = vrcp.f32 %v2008_v44  ;;  %vm1060_vm11 = vmor %vm1058_vm10, %vm1059_vm9  ;;  %v1077_v2 = vand.u32 2147483647, %v2008_v44  ;;  %v1079_v62 = vand.u32 2147483648, %v2008_v44 }
 0x123   : >> { %1146 = vst [vmem:[%s1992_s11 + $0x8] sm:$0xff] %v1051_v20  ;;  %v1055_v22 = vsub.f32 1.0, %v1054_v54  ;;  %1476 = vpow2.f32 %v1007_v19  ;;  %v786_v25 = vpop.f32.mrf.mxu2  ;;  %v988_v27 = vadd.f32 %v1966_v12, %v977_v57  ;;  %vm1073_vm14 = vweird.f32 %v2008_v44 }
 0x124   : >> { %v798_v26 = vadd.f32 %v786_v25, %v705_v21  ;;  %v1080_v1 = vor.u32 1.1754944e-38, %v1079_v62  ;;  %vm1078_vm0 = vcmp.eq.f32.partialorder %v1077_v2, 8.507059e+37 }
 0x125   : >> { %v1056_v23 = vmul.f32 %v1473_v11, %v1055_v22  ;;  %v996_v29 = vsub.f32 0.0, %v988_v27 }
 0x126   : >> { %v876_v28 = vpop.f32.mrf.mxu3  ;;  %v696_v31 = vpop.f32.mrf.mxu1 }
 0x127   : >> { %v1057_v10 = vadd.f32 %v1473_v11, %v1056_v23  ;;  %v888_v47 = vadd.f32 %v876_v28, %v798_v26  ;;  %v1009_v36 = vmul.f32 1.442695, %v996_v29  ;;  %v706_v60 = vadd.f32 %v696_v31, %v616_v48 }
 0x128   : >> { %v1475_v30 = vpop.eup %1474  ;;  %v966_v32 = vpop.f32.mrf.mxu0 }
 0x129   : >> { %v1477_v33 = vpop.eup %1476  ;;  %v1061_v34 = vsel %vm1060_vm11, %v1473_v11, %v1057_v10  ;;  %v1069_v35 = vmul.f32 %v1475_v30, %v2008_v44  ;;  %v978_v59 = vadd.f32 %v966_v32, %v888_v47  ;;  %1478 = vpow2.f32 %v1009_v36 }
 0x12a   : >> { %v1066_v53 = vsel %vm1063_vm12, %v1065_v61, %v1061_v34  ;;  %v1019_v56 = vadd.f32 1.0, %v1477_v33  ;;  %vm1074_vm13 = vweird.f32 %v1475_v30 }
 0x12b   : >> { %1147 = vst [vmem:[%s1992_s11 + $0x10] sm:$0xff] %v1066_v53  ;;  %v1070_v50 = vsub.f32 1.0, %v1069_v35  ;;  %v789_v38 = vpop.f32.mrf.mxu2  ;;  %v989_v49 = vadd.f32 %v1966_v12, %v978_v59  ;;  %vm1075_vm15 = vmor %vm1073_vm14, %vm1074_vm13 }
 0x12c   : >> { %1480 = vrcp.f32 %v1019_v56  ;;  %v799_v63 = vadd.f32 %v789_v38, %v706_v60  ;;  %v1094_v55 = vand.u32 2147483648, %v1019_v56  ;;  %v1092_v13 = vand.u32 2147483647, %v1019_v56 }
 0x12d   : >> { %v1071_v16 = vmul.f32 %v1475_v30, %v1070_v50  ;;  %v997_v52 = vsub.f32 0.0, %v989_v49  ;;  %vm1088_vm2 = vweird.f32 %v1019_v56 }
 0x12e   : >> { %v879_v17 = vpop.f32.mrf.mxu3  ;;  %v1095_v24 = vor.u32 1.1754944e-38, %v1094_v55  ;;  %vm1093_vm4 = vcmp.eq.f32.partialorder %v1092_v13, 8.507059e+37 }
 0x12f   : >> { %v1072_v51 = vadd.f32 %v1475_v30, %v1071_v16  ;;  %v889_v37 = vadd.f32 %v879_v17, %v799_v63  ;;  %v1479_v39 = vpop.eup %1478  ;;  %v1011_v4 = vmul.f32 1.442695, %v997_v52 }
 0x130   : >> { %v969_v3 = vpop.f32.mrf.mxu0  ;;  %v1020_v42 = vadd.f32 1.0, %v1479_v39 }
 0x131   : >> { %v1076_v40 = vsel %vm1075_vm15, %v1475_v30, %v1072_v51  ;;  %v979_v5 = vadd.f32 %v969_v3, %v889_v37  ;;  %1482 = vpow2.f32 %v1011_v4 }
 0x132   : >> { %v1481_v6 = vpop.eup %1480  ;;  %v1081_v7 = vsel %vm1078_vm0, %v1080_v1, %v1076_v40  ;;  %1484 = vrcp.f32 %v1020_v42  ;;  %v1109_v22 = vand.u32 2147483648, %v1020_v42  ;;  %v1107_v58 = vand.u32 2147483647, %v1020_v42 }
 0x133   : >> { %1148 = vst [vmem:[%s1992_s11 + $0x18] sm:$0xff] %v1081_v7  ;;  %v1084_v8 = vmul.f32 %v1481_v6, %v1019_v56  ;;  %v990_v15 = vadd.f32 %v1966_v12, %v979_v5  ;;  %vm1089_vm1 = vweird.f32 %v1481_v6  ;;  %vm1103_vm6 = vweird.f32 %v1020_v42 }
 0x134   : >> { %vm1090_vm3 = vmor %vm1088_vm2, %vm1089_vm1  ;;  %v1110_v45 = vor.u32 1.1754944e-38, %v1109_v22  ;;  %vm1108_vm8 = vcmp.eq.f32.partialorder %v1107_v58, 8.507059e+37 }
 0x135   : >> { %v1085_v41 = vsub.f32 1.0, %v1084_v8  ;;  %v998_v9 = vsub.f32 0.0, %v990_v15 }
 0x137   : >> { %v1086_v11 = vmul.f32 %v1481_v6, %v1085_v41  ;;  %v1013_v43 = vmul.f32 1.442695, %v998_v9  ;;  %v1483_v14 = vpop.eup %1482 }
 0x138   : >> { %v1485_v18 = vpop.eup %1484  ;;  %v1021_v54 = vadd.f32 1.0, %v1483_v14 }
 0x139   : >> { %v1087_v44 = vadd.f32 %v1481_v6, %v1086_v11  ;;  %1486 = vpow2.f32 %v1013_v43  ;;  %v1099_v12 = vmul.f32 %v1485_v18, %v1020_v42  ;;  %vm1104_vm5 = vweird.f32 %v1485_v18 }
 0x13a   : >> { %1488 = vrcp.f32 %v1021_v54  ;;  %vm1105_vm7 = vmor %vm1103_vm6, %vm1104_vm5  ;;  %v1124_v47 = vand.u32 2147483648, %v1021_v54  ;;  %v1122_v48 = vand.u32 2147483647, %v1021_v54  ;;  %vm1118_vm10 = vweird.f32 %v1021_v54 }
 0x13b   : >> { %v1091_v19 = vsel %vm1090_vm3, %v1481_v6, %v1087_v44  ;;  %v1100_v21 = vsub.f32 1.0, %v1099_v12 }
 0x13c   : >> { %v1096_v20 = vsel %vm1093_vm4, %v1095_v24, %v1091_v19  ;;  %v1125_v33 = vor.u32 1.1754944e-38, %v1124_v47  ;;  %vm1123_vm12 = vcmp.eq.f32.partialorder %v1122_v48, 8.507059e+37 }
 0x13d   : >> { %1149 = vst [vmem:[%s1992_s11 + $0x20] sm:$0xff] %v1096_v20  ;;  %v1101_v25 = vmul.f32 %v1485_v18, %v1100_v21 }
 0x13f   : >> { %v1487_v57 = vpop.eup %1486  ;;  %v1102_v26 = vadd.f32 %v1485_v18, %v1101_v25 }
 0x140   : >> { %v1022_v46 = vadd.f32 1.0, %v1487_v57  ;;  %v1489_v23 = vpop.eup %1488 }
 0x141   : >> { %v1106_v27 = vsel %vm1105_vm7, %v1485_v18, %v1102_v26  ;;  %v1114_v28 = vmul.f32 %v1489_v23, %v1021_v54  ;;  %vm1119_vm9 = vweird.f32 %v1489_v23 }
 0x142   : >> { %1490 = vrcp.f32 %v1022_v46  ;;  %v1111_v10 = vsel %vm1108_vm8, %v1110_v45, %v1106_v27  ;;  %vm1120_vm11 = vmor %vm1118_vm10, %vm1119_vm9  ;;  %v1139_v53 = vand.u32 2147483648, %v1022_v46  ;;  %v1137_v59 = vand.u32 2147483647, %v1022_v46 }
 0x143   : >> { %1150 = vst [vmem:[%s1992_s11 + $0x28] sm:$0xff] %v1111_v10  ;;  %v1115_v29 = vsub.f32 1.0, %v1114_v28  ;;  %vm1133_vm14 = vweird.f32 %v1022_v46 }
 0x144   : >> { %v1140_v60 = vor.u32 1.1754944e-38, %v1139_v53  ;;  %vm1138_vm0 = vcmp.eq.f32.partialorder %v1137_v59, 8.507059e+37 }
 0x145   : >> { %v1116_v30 = vmul.f32 %v1489_v23, %v1115_v29 }
 0x147   : >> { %v1117_v31 = vadd.f32 %v1489_v23, %v1116_v30 }
 0x148   : >> { %v1491_v61 = vpop.eup %1490 }
 0x149   : >> { %v1129_v32 = vmul.f32 %v1491_v61, %v1022_v46  ;;  %v1121_v34 = vsel %vm1120_vm11, %v1489_v23, %v1117_v31  ;;  %vm1134_vm13 = vweird.f32 %v1491_v61 }
 0x14a   : >> { %v1126_v36 = vsel %vm1123_vm12, %v1125_v33, %v1121_v34  ;;  %vm1135_vm15 = vmor %vm1133_vm14, %vm1134_vm13 }
 0x14b   : >> { %v1130_v35 = vsub.f32 1.0, %v1129_v32  ;;  %1151 = vst [vmem:[%s1992_s11 + $0x30] sm:$0xff] %v1126_v36 }
 0x14d   : >> { %v1131_v56 = vmul.f32 %v1491_v61, %v1130_v35 }
 0x14f   : >> { %v1132_v50 = vadd.f32 %v1491_v61, %v1131_v56  ;;  %176 = sbr.rel (!%p174_p4) target bundleno = 15 (0xf), region = 81 }
 0x151   : >> { %v1136_v38 = vsel %vm1135_vm15, %v1491_v61, %v1132_v50 }
 0x152   : >> { %v1141_v2 = vsel %vm1138_vm0, %v1140_v60, %v1136_v38 }
 0x153   : >> { %1152 = vst [vmem:[%s1992_s11 + $0x38] sm:$0xff] %v1141_v2 }
 0x154 PF: > { %s13_s12 = sadd.s32 1, %s1502_s12  }
 0x155   : > { %p10_p5 = scmp.ge.s32.totalorder %s13_s12, 4  }
 0x157   :  { %12 = sbr.rel (!%p10_p5) target bundleno = 1 (0x1), region = 92 }

</bundles_post_ra>
